<compile_context>
chip_gen: v7x
topology: tpu7x:2x2x1
jax: 0.10.0
libtpu: 0.0.40
codegen_flags: <defaults>
</compile_context>

<pallas_src>
import functools
import math

import jax
import jax.numpy as jnp
from jax.experimental import pallas as pl
from jax.experimental.pallas import tpu as pltpu


def _pick_heads_per_block(num_heads: int, head_size: int,
                          target_cols: int = 256) -> int:
    """Largest divisor of num_heads whose column block is a multiple of 128
    lanes and at most target_cols; falls back to all heads (full-H block)."""
    best = None
    for hpb in range(1, num_heads + 1):
        if num_heads % hpb:
            continue
        cols = hpb * head_size
        if cols % 128 == 0 and cols <= target_cols:
            best = hpb
    return best if best is not None else num_heads


def _entity_aware_attn_kernel(cat_ref, mask_w_ref, mask_e_ref, w_ref, b_ref,
                              wout_ref, eout_ref, *, lw, le, head_size,
                              heads_per_block):
    """One grid step = one (batch element, head block)."""
    f32 = jnp.float32
    bf16 = jnp.bfloat16
    scale = 1.0 / math.sqrt(head_size)
    hb = pl.program_id(1)                 # which head block (weights resident)

    cat = cat_ref[0]                       # (L, H) bf16
    word = cat[:lw]                        # (Lw, H) sublane slice, free
    ent = cat[lw:]                         # (Le, H)
    mask_w = mask_w_ref[0]                 # (1, Lw) additive, bcast over rows
    mask_e = mask_e_ref[0]                 # (1, Le)

    def proj(x, idx, q_scale=None):
        # (S, H) @ (H, hpb*dh): bf16 MXU matmul, f32 accumulation, f32 bias.
        w = w_ref[hb, idx]                 # (H, HB) bf16, resident in VMEM
        y = jnp.dot(x, w, preferred_element_type=f32)
        y = y + b_ref[hb, idx][None, :]
        if q_scale is not None:
            y = y * q_scale                # fold 1/sqrt(dh) into the query
        return y.astype(bf16)              # (S, HB)

    # Stacked-weight order: [query, key, value, w2e_query, e2w_query, e2e_query]
    q_w2w = proj(word, 0, scale)
    k = proj(cat, 1)                       # K/V fused over the concatenated seq
    v = proj(cat, 2)
    q_w2e = proj(word, 3, scale)
    q_e2w = proj(ent, 4, scale)
    q_e2e = proj(ent, 5, scale)

    k_w, k_e = k[:lw], k[lw:]
    v_w, v_e = v[:lw], v[lw:]
    # Hoist the K transposes: each transposed segment is used by two score
    # matmuls per head (word queries and entity queries).
    kT_w = k_w.T                           # (HB, Lw)
    kT_e = k_e.T                           # (HB, Le)

    def attend(s_a, s_b, va, vb):
        # Two-segment softmax over [word keys | entity keys] without building
        # the concatenated (Lq, L) score matrix.
        m = jnp.maximum(jnp.max(s_a, axis=-1, keepdims=True),
                        jnp.max(s_b, axis=-1, keepdims=True))
        p_a = jnp.exp(s_a - m)
        p_b = jnp.exp(s_b - m)
        denom = (jnp.sum(p_a, axis=-1, keepdims=True)
                 + jnp.sum(p_b, axis=-1, keepdims=True))
        inv = pl.reciprocal(denom, approx=True)      # EUP slot, ~free
        ctx = (jnp.dot(p_a.astype(bf16), va, preferred_element_type=f32)
               + jnp.dot(p_b.astype(bf16), vb, preferred_element_type=f32))
        return ctx * inv                              # (Lq, dh) f32

    w_ctx, e_ctx = [], []
    for h in range(heads_per_block):                  # small static unroll
        c0, c1 = h * head_size, (h + 1) * head_size
        kwt = kT_w[c0:c1]                             # (dh, Lw) sublane slice
        ket = kT_e[c0:c1]                             # (dh, Le)
        vw = v_w[:, c0:c1]                            # (Lw, dh)
        ve = v_e[:, c0:c1]                            # (Le, dh)

        s_ww = jnp.dot(q_w2w[:, c0:c1], kwt, preferred_element_type=f32) + mask_w
        s_we = jnp.dot(q_w2e[:, c0:c1], ket, preferred_element_type=f32) + mask_e
        s_ew = jnp.dot(q_e2w[:, c0:c1], kwt, preferred_element_type=f32) + mask_w
        s_ee = jnp.dot(q_e2e[:, c0:c1], ket, preferred_element_type=f32) + mask_e

        w_ctx.append(attend(s_ww, s_we, vw, ve))
        e_ctx.append(attend(s_ew, s_ee, vw, ve))

    # One lane-dense store per output (last-dim width = hpb*dh >= 128).
    wout_ref[0] = jnp.concatenate(w_ctx, axis=-1).astype(wout_ref.dtype)
    eout_ref[0] = jnp.concatenate(e_ctx, axis=-1).astype(eout_ref.dtype)


def entity_aware_self_attention(word_hidden, entity_hidden, attention_mask,
                                weights, biases, num_heads):
    B, Lw, H = word_hidden.shape
    Le = entity_hidden.shape[1]
    L = Lw + Le
    assert H % num_heads == 0
    dh = H // num_heads

    # Only the broadcast additive mask from _compute_extended_attention_mask
    # is supported (no per-head / per-query-row masks).
    assert attention_mask.shape in ((B, 1, 1, L), (B, 1, L), (B, L)), (
        "attention_mask must be the (B, 1, 1, L) extended additive mask")

    hpb = _pick_heads_per_block(num_heads, dh)
    n_blocks = num_heads // hpb
    HB = hpb * dh

    # Split the additive mask into word-key / entity-key segments outside the
    # kernel so the kernel never slices the lane dim of the mask.
    mask = attention_mask.reshape(B, 1, L).astype(jnp.float32)
    mask_w = mask[:, :, :Lw]
    mask_e = mask[:, :, Lw:]

    # bf16 activations: halves the HBM->VMEM DMA and the MXU consumes bf16.
    cat = jnp.concatenate([word_hidden, entity_hidden], axis=1)
    cat = cat.astype(jnp.bfloat16)                               # (B, L, H)

    # Head-block-major parameters (done once in the wrapper).  Constant
    # index_map below keeps the whole stack VMEM-resident for the entire grid.
    w_blocks = (weights.reshape(6, H, n_blocks, HB)
                .transpose(2, 0, 1, 3).astype(jnp.bfloat16))     # (nB, 6, H, HB)
    b_blocks = (biases.reshape(6, n_blocks, HB)
                .transpose(1, 0, 2).astype(jnp.float32))         # (nB, 6, HB)

    out_dtype = word_hidden.dtype
    out_itemsize = jnp.dtype(out_dtype).itemsize

    # VMEM footprint derived from the actual (bf16, head-block) block shapes:
    # resident params + double-buffered activation/mask/output blocks +
    # in-kernel intermediates, with 2x headroom; capped at 48 MiB for v7x.
    resident = 6 * H * H * 2 + 6 * H * 4
    act_block = L * H * 2 + (Lw + Le) * 4
    out_block = (Lw + Le) * HB * out_itemsize
    interm = 6 * L * HB * 2 + 4 * L * L * 4 + (Lw + Le) * HB * 4
    footprint = 2 * resident + 2 * (act_block + out_block) + 2 * interm
    vmem_limit = int(min(48 << 20, max(32 << 20, footprint)))

    # Advisory cost so XLA schedules surrounding ops around the custom call.
    cost = pl.CostEstimate(
        flops=int(8 * B * L * H * H + 4 * B * L * L * H),
        transcendentals=int(B * num_heads * L * L),
        bytes_accessed=int(B * L * H * 2 + B * L * H * out_itemsize
                           + 6 * H * H * 2 + B * L * 4),
    )

    kernel = functools.partial(_entity_aware_attn_kernel, lw=Lw, le=Le,
                               head_size=dh, heads_per_block=hpb)

    out_shapes = (
        jax.ShapeDtypeStruct((B, Lw, H), out_dtype),
        jax.ShapeDtypeStruct((B, Le, H), out_dtype),
    )

    word_ctx, ent_ctx = pl.pallas_call(
        kernel,
        out_shape=out_shapes,
        grid_spec=pltpu.PrefetchScalarGridSpec(
            num_scalar_prefetch=0,
            # head-block is the inner axis: a batch element's activations stay
            # resident across its head blocks; weights never re-stream.
            grid=(B, n_blocks),
            in_specs=[
                pl.BlockSpec((1, L, H), lambda b, h: (b, 0, 0)),
                pl.BlockSpec((1, 1, Lw), lambda b, h: (b, 0, 0)),
                pl.BlockSpec((1, 1, Le), lambda b, h: (b, 0, 0)),
                # Constant index_map -> whole weight/bias stack fetched once.
                pl.BlockSpec((n_blocks, 6, H, HB), lambda b, h: (0, 0, 0, 0)),
                pl.BlockSpec((n_blocks, 6, HB), lambda b, h: (0, 0, 0)),
            ],
            out_specs=[
                # Lane-dense (B, S, H) outputs: head block = last-dim block.
                pl.BlockSpec((1, Lw, HB), lambda b, h: (b, 0, h)),
                pl.BlockSpec((1, Le, HB), lambda b, h: (b, 0, h)),
            ],
        ),
        compiler_params=pltpu.CompilerParams(
            dimension_semantics=("parallel", "parallel"),
            vmem_limit_bytes=vmem_limit),
        cost_estimate=cost,
    )(cat, mask_w, mask_e, w_blocks, b_blocks)

    return word_ctx, ent_ctx


def _reference(word, ent, attention_mask, W, b, num_heads):
    """Pure-JAX f32 mirror of the PyTorch forward (eval mode)."""
    B, Lw, H = word.shape
    Le = ent.shape[1]
    dh = H // num_heads

    def t4s(x):  # (B, S, H) -> (B, nH, S, dh)
        return x.reshape(B, x.shape[1], num_heads, dh).transpose(0, 2, 1, 3)

    cat = jnp.concatenate([word, ent], axis=1)
    q_w2w = t4s(word @ W[0] + b[0])
    k = t4s(cat @ W[1] + b[1])
    v = t4s(cat @ W[2] + b[2])
    q_w2e = t4s(word @ W[3] + b[3])
    q_e2w = t4s(ent @ W[4] + b[4])
    q_e2e = t4s(ent @ W[5] + b[5])

    kw, ke = k[:, :, :Lw, :], k[:, :, Lw:, :]

    def sc(q, kk):
        return jnp.einsum('bhqd,bhkd->bhqk', q, kk)

    word_scores = jnp.concatenate([sc(q_w2w, kw), sc(q_w2e, ke)], axis=3)
    ent_scores = jnp.concatenate([sc(q_e2w, kw), sc(q_e2e, ke)], axis=3)
    scores = jnp.concatenate([word_scores, ent_scores], axis=2)
    scores = scores / math.sqrt(dh) + attention_mask
    probs = jax.nn.softmax(scores, axis=-1)
    ctx = jnp.einsum('bhqk,bhkd->bhqd', probs, v)
    ctx = ctx.transpose(0, 2, 1, 3).reshape(B, Lw + Le, H)
    return ctx[:, :Lw, :], ctx[:, Lw:, :]


if __name__ == "__main__":
    B, Lw, Le, H, nH = 2, 64, 16, 128, 4
    L = Lw + Le

    key = jax.random.PRNGKey(0)
    k1, k2, k3, k4, k5 = jax.random.split(key, 5)

    word = jax.random.normal(k1, (B, Lw, H), jnp.float32)
    ent = jax.random.normal(k2, (B, Le, H), jnp.float32)

    # Additive mask in the PyTorch (B, 1, 1, L) convention: 0 = attend,
    # -10000 = padding (exactly what _compute_extended_attention_mask builds).
    keep = (jax.random.uniform(k3, (B, L)) > 0.15).astype(jnp.float32)
    attn_mask = ((1.0 - keep) * -10000.0).reshape(B, 1, 1, L)

    # Deterministic synthetic parameters (stand-in for nn.Linear init).
    weights = 0.05 * jax.random.normal(k4, (6, H, H), jnp.float32)
    biases = 0.05 * jax.random.normal(k5, (6, H), jnp.float32)

    w_out, e_out = entity_aware_self_attention(word, ent, attn_mask,
                                               weights, biases, nH)
    jax.block_until_ready((w_out, e_out))

    w_ref, e_ref = _reference(word, ent, attn_mask, weights, biases, nH)
    assert w_out.shape == (B, Lw, H) and e_out.shape == (B, Le, H)
    # bf16 matmul inputs + approx reciprocal -> compare at bf16-level tolerance
    # against the f32 reference.
    werr = float(jnp.max(jnp.abs(w_out - w_ref)))
    eerr = float(jnp.max(jnp.abs(e_out - e_ref)))
    assert jnp.allclose(w_out, w_ref, rtol=2e-2, atol=2e-2), werr
    assert jnp.allclose(e_out, e_ref, rtol=2e-2, atol=2e-2), eerr

    print("KERNEL_OK")
</pallas_src>

<mosaic_0001>
module attributes {stable_mosaic.version = 11 : i64} {
  func.func @_entity_aware_attn_kernel(%arg0: i32, %arg1: i32, %arg2: memref<1x80x128xbf16, #tpu.memory_space<vmem>>, %arg3: memref<1x1x64xf32, #tpu.memory_space<vmem>>, %arg4: memref<1x1x16xf32, #tpu.memory_space<vmem>>, %arg5: memref<1x6x128x128xbf16, #tpu.memory_space<vmem>>, %arg6: memref<1x6x128xf32, #tpu.memory_space<vmem>>, %arg7: memref<1x64x128xf32, #tpu.memory_space<vmem>>, %arg8: memref<1x16x128xf32, #tpu.memory_space<vmem>>) attributes {dimension_semantics = [#tpu.dimension_semantics<parallel>, #tpu.dimension_semantics<parallel>], iteration_bounds = array<i64: 2, 1>, scalar_prefetch = 0 : i64, scratch_operands = 0 : i64, tpu.core_type = #tpu.core_type<tc>, window_params = [{transform_indices = @transform_0, window_bounds = array<i64: 1, 80, 128>}, {transform_indices = @transform_1, window_bounds = array<i64: 1, 1, 64>}, {transform_indices = @transform_2, window_bounds = array<i64: 1, 1, 16>}, {pipeline_mode = #tpu.pipeline_mode<synchronous>, transform_indices = @transform_3, window_bounds = array<i64: 1, 6, 128, 128>}, {pipeline_mode = #tpu.pipeline_mode<synchronous>, transform_indices = @transform_4, window_bounds = array<i64: 1, 6, 128>}, {transform_indices = @transform_5, window_bounds = array<i64: 1, 64, 128>}, {transform_indices = @transform_6, window_bounds = array<i64: 1, 16, 128>}]} {
    %c0 = arith.constant 0 : index
    %c0_0 = arith.constant 0 : index
    %c0_1 = arith.constant 0 : index
    %0 = vector.load %arg2[%c0, %c0_0, %c0_1] : memref<1x80x128xbf16, #tpu.memory_space<vmem>>, vector<1x80x128xbf16>
    %1 = vector.shape_cast %0 : vector<1x80x128xbf16> to vector<80x128xbf16>
    %2 = vector.extract_strided_slice %1 {offsets = [0, 0], sizes = [64, 128], strides = [1, 1]} : vector<80x128xbf16> to vector<64x128xbf16>
    %3 = vector.extract_strided_slice %1 {offsets = [64, 0], sizes = [16, 128], strides = [1, 1]} : vector<80x128xbf16> to vector<16x128xbf16>
    %c0_2 = arith.constant 0 : index
    %c0_3 = arith.constant 0 : index
    %c0_4 = arith.constant 0 : index
    %4 = vector.load %arg3[%c0_2, %c0_3, %c0_4] : memref<1x1x64xf32, #tpu.memory_space<vmem>>, vector<1x1x64xf32>
    %5 = vector.shape_cast %4 : vector<1x1x64xf32> to vector<1x64xf32>
    %c0_5 = arith.constant 0 : index
    %c0_6 = arith.constant 0 : index
    %c0_7 = arith.constant 0 : index
    %6 = vector.load %arg4[%c0_5, %c0_6, %c0_7] : memref<1x1x16xf32, #tpu.memory_space<vmem>>, vector<1x1x16xf32>
    %7 = vector.shape_cast %6 : vector<1x1x16xf32> to vector<1x16xf32>
    %8 = arith.index_cast %arg1 : i32 to index
    %c0_8 = arith.constant 0 : index
    %c0_9 = arith.constant 0 : index
    %c0_10 = arith.constant 0 : index
    %9 = vector.load %arg5[%8, %c0_8, %c0_9, %c0_10] : memref<1x6x128x128xbf16, #tpu.memory_space<vmem>>, vector<1x1x128x128xbf16>
    %10 = vector.shape_cast %9 : vector<1x1x128x128xbf16> to vector<128x128xbf16>
    %cst = arith.constant dense<0.000000e+00> : vector<64x128xf32>
    %11 = tpu.matmul %2, %10, %cst {dimension_numbers = #tpu.dot_dimension_numbers<[1], [0], [0], [1], [0, 0, 1, 1], [], []>} : vector<64x128xbf16>, vector<128x128xbf16>, vector<64x128xf32> -> vector<64x128xf32>
    %12 = arith.index_cast %arg1 : i32 to index
    %c0_11 = arith.constant 0 : index
    %c0_12 = arith.constant 0 : index
    %13 = vector.load %arg6[%12, %c0_11, %c0_12] : memref<1x6x128xf32, #tpu.memory_space<vmem>>, vector<1x1x128xf32>
    %14 = vector.shape_cast %13 : vector<1x1x128xf32> to vector<128xf32>
    %15 = vector.shape_cast %14 : vector<128xf32> to vector<1x128xf32>
    %16 = vector.broadcast %15 : vector<1x128xf32> to vector<64x128xf32>
    %17 = arith.addf %11, %16 : vector<64x128xf32>
    %cst_13 = arith.constant 0.176776692 : f32
    %18 = vector.broadcast %cst_13 : f32 to vector<64x128xf32>
    %19 = arith.mulf %17, %18 : vector<64x128xf32>
    %20 = arith.truncf %19 : vector<64x128xf32> to vector<64x128xbf16>
    %21 = arith.index_cast %arg1 : i32 to index
    %c1 = arith.constant 1 : index
    %c0_14 = arith.constant 0 : index
    %c0_15 = arith.constant 0 : index
    %22 = vector.load %arg5[%21, %c1, %c0_14, %c0_15] : memref<1x6x128x128xbf16, #tpu.memory_space<vmem>>, vector<1x1x128x128xbf16>
    %23 = vector.shape_cast %22 : vector<1x1x128x128xbf16> to vector<128x128xbf16>
    %cst_16 = arith.constant dense<0.000000e+00> : vector<80x128xf32>
    %24 = tpu.matmul %1, %23, %cst_16 {dimension_numbers = #tpu.dot_dimension_numbers<[1], [0], [0], [1], [0, 0, 1, 1], [], []>} : vector<80x128xbf16>, vector<128x128xbf16>, vector<80x128xf32> -> vector<80x128xf32>
    %25 = arith.index_cast %arg1 : i32 to index
    %c1_17 = arith.constant 1 : index
    %c0_18 = arith.constant 0 : index
    %26 = vector.load %arg6[%25, %c1_17, %c0_18] : memref<1x6x128xf32, #tpu.memory_space<vmem>>, vector<1x1x128xf32>
    %27 = vector.shape_cast %26 : vector<1x1x128xf32> to vector<128xf32>
    %28 = vector.shape_cast %27 : vector<128xf32> to vector<1x128xf32>
    %29 = vector.broadcast %28 : vector<1x128xf32> to vector<80x128xf32>
    %30 = arith.addf %24, %29 : vector<80x128xf32>
    %31 = arith.truncf %30 : vector<80x128xf32> to vector<80x128xbf16>
    %32 = arith.index_cast %arg1 : i32 to index
    %c2 = arith.constant 2 : index
    %c0_19 = arith.constant 0 : index
    %c0_20 = arith.constant 0 : index
    %33 = vector.load %arg5[%32, %c2, %c0_19, %c0_20] : memref<1x6x128x128xbf16, #tpu.memory_space<vmem>>, vector<1x1x128x128xbf16>
    %34 = vector.shape_cast %33 : vector<1x1x128x128xbf16> to vector<128x128xbf16>
    %cst_21 = arith.constant dense<0.000000e+00> : vector<80x128xf32>
    %35 = tpu.matmul %1, %34, %cst_21 {dimension_numbers = #tpu.dot_dimension_numbers<[1], [0], [0], [1], [0, 0, 1, 1], [], []>} : vector<80x128xbf16>, vector<128x128xbf16>, vector<80x128xf32> -> vector<80x128xf32>
    %36 = arith.index_cast %arg1 : i32 to index
    %c2_22 = arith.constant 2 : index
    %c0_23 = arith.constant 0 : index
    %37 = vector.load %arg6[%36, %c2_22, %c0_23] : memref<1x6x128xf32, #tpu.memory_space<vmem>>, vector<1x1x128xf32>
    %38 = vector.shape_cast %37 : vector<1x1x128xf32> to vector<128xf32>
    %39 = vector.shape_cast %38 : vector<128xf32> to vector<1x128xf32>
    %40 = vector.broadcast %39 : vector<1x128xf32> to vector<80x128xf32>
    %41 = arith.addf %35, %40 : vector<80x128xf32>
    %42 = arith.truncf %41 : vector<80x128xf32> to vector<80x128xbf16>
    %43 = arith.index_cast %arg1 : i32 to index
    %c3 = arith.constant 3 : index
    %c0_24 = arith.constant 0 : index
    %c0_25 = arith.constant 0 : index
    %44 = vector.load %arg5[%43, %c3, %c0_24, %c0_25] : memref<1x6x128x128xbf16, #tpu.memory_space<vmem>>, vector<1x1x128x128xbf16>
    %45 = vector.shape_cast %44 : vector<1x1x128x128xbf16> to vector<128x128xbf16>
    %cst_26 = arith.constant dense<0.000000e+00> : vector<64x128xf32>
    %46 = tpu.matmul %2, %45, %cst_26 {dimension_numbers = #tpu.dot_dimension_numbers<[1], [0], [0], [1], [0, 0, 1, 1], [], []>} : vector<64x128xbf16>, vector<128x128xbf16>, vector<64x128xf32> -> vector<64x128xf32>
    %47 = arith.index_cast %arg1 : i32 to index
    %c3_27 = arith.constant 3 : index
    %c0_28 = arith.constant 0 : index
    %48 = vector.load %arg6[%47, %c3_27, %c0_28] : memref<1x6x128xf32, #tpu.memory_space<vmem>>, vector<1x1x128xf32>
    %49 = vector.shape_cast %48 : vector<1x1x128xf32> to vector<128xf32>
    %50 = vector.shape_cast %49 : vector<128xf32> to vector<1x128xf32>
    %51 = vector.broadcast %50 : vector<1x128xf32> to vector<64x128xf32>
    %52 = arith.addf %46, %51 : vector<64x128xf32>
    %cst_29 = arith.constant 0.176776692 : f32
    %53 = vector.broadcast %cst_29 : f32 to vector<64x128xf32>
    %54 = arith.mulf %52, %53 : vector<64x128xf32>
    %55 = arith.truncf %54 : vector<64x128xf32> to vector<64x128xbf16>
    %56 = arith.index_cast %arg1 : i32 to index
    %c4 = arith.constant 4 : index
    %c0_30 = arith.constant 0 : index
    %c0_31 = arith.constant 0 : index
    %57 = vector.load %arg5[%56, %c4, %c0_30, %c0_31] : memref<1x6x128x128xbf16, #tpu.memory_space<vmem>>, vector<1x1x128x128xbf16>
    %58 = vector.shape_cast %57 : vector<1x1x128x128xbf16> to vector<128x128xbf16>
    %cst_32 = arith.constant dense<0.000000e+00> : vector<16x128xf32>
    %59 = tpu.matmul %3, %58, %cst_32 {dimension_numbers = #tpu.dot_dimension_numbers<[1], [0], [0], [1], [0, 0, 1, 1], [], []>} : vector<16x128xbf16>, vector<128x128xbf16>, vector<16x128xf32> -> vector<16x128xf32>
    %60 = arith.index_cast %arg1 : i32 to index
    %c4_33 = arith.constant 4 : index
    %c0_34 = arith.constant 0 : index
    %61 = vector.load %arg6[%60, %c4_33, %c0_34] : memref<1x6x128xf32, #tpu.memory_space<vmem>>, vector<1x1x128xf32>
    %62 = vector.shape_cast %61 : vector<1x1x128xf32> to vector<128xf32>
    %63 = vector.shape_cast %62 : vector<128xf32> to vector<1x128xf32>
    %64 = vector.broadcast %63 : vector<1x128xf32> to vector<16x128xf32>
    %65 = arith.addf %59, %64 : vector<16x128xf32>
    %cst_35 = arith.constant 0.176776692 : f32
    %66 = vector.broadcast %cst_35 : f32 to vector<16x128xf32>
    %67 = arith.mulf %65, %66 : vector<16x128xf32>
    %68 = arith.truncf %67 : vector<16x128xf32> to vector<16x128xbf16>
    %69 = arith.index_cast %arg1 : i32 to index
    %c5 = arith.constant 5 : index
    %c0_36 = arith.constant 0 : index
    %c0_37 = arith.constant 0 : index
    %70 = vector.load %arg5[%69, %c5, %c0_36, %c0_37] : memref<1x6x128x128xbf16, #tpu.memory_space<vmem>>, vector<1x1x128x128xbf16>
    %71 = vector.shape_cast %70 : vector<1x1x128x128xbf16> to vector<128x128xbf16>
    %cst_38 = arith.constant dense<0.000000e+00> : vector<16x128xf32>
    %72 = tpu.matmul %3, %71, %cst_38 {dimension_numbers = #tpu.dot_dimension_numbers<[1], [0], [0], [1], [0, 0, 1, 1], [], []>} : vector<16x128xbf16>, vector<128x128xbf16>, vector<16x128xf32> -> vector<16x128xf32>
    %73 = arith.index_cast %arg1 : i32 to index
    %c5_39 = arith.constant 5 : index
    %c0_40 = arith.constant 0 : index
    %74 = vector.load %arg6[%73, %c5_39, %c0_40] : memref<1x6x128xf32, #tpu.memory_space<vmem>>, vector<1x1x128xf32>
    %75 = vector.shape_cast %74 : vector<1x1x128xf32> to vector<128xf32>
    %76 = vector.shape_cast %75 : vector<128xf32> to vector<1x128xf32>
    %77 = vector.broadcast %76 : vector<1x128xf32> to vector<16x128xf32>
    %78 = arith.addf %72, %77 : vector<16x128xf32>
    %cst_41 = arith.constant 0.176776692 : f32
    %79 = vector.broadcast %cst_41 : f32 to vector<16x128xf32>
    %80 = arith.mulf %78, %79 : vector<16x128xf32>
    %81 = arith.truncf %80 : vector<16x128xf32> to vector<16x128xbf16>
    %82 = vector.extract_strided_slice %31 {offsets = [0, 0], sizes = [64, 128], strides = [1, 1]} : vector<80x128xbf16> to vector<64x128xbf16>
    %83 = vector.extract_strided_slice %31 {offsets = [64, 0], sizes = [16, 128], strides = [1, 1]} : vector<80x128xbf16> to vector<16x128xbf16>
    %84 = vector.extract_strided_slice %42 {offsets = [0, 0], sizes = [64, 128], strides = [1, 1]} : vector<80x128xbf16> to vector<64x128xbf16>
    %85 = vector.extract_strided_slice %42 {offsets = [64, 0], sizes = [16, 128], strides = [1, 1]} : vector<80x128xbf16> to vector<16x128xbf16>
    %86 = tpu.transpose %82, [1, 0] : vector<64x128xbf16> -> vector<128x64xbf16>
    %87 = tpu.transpose %83, [1, 0] : vector<16x128xbf16> -> vector<128x16xbf16>
    %88 = vector.extract_strided_slice %86 {offsets = [0, 0], sizes = [32, 64], strides = [1, 1]} : vector<128x64xbf16> to vector<32x64xbf16>
    %89 = vector.extract_strided_slice %87 {offsets = [0, 0], sizes = [32, 16], strides = [1, 1]} : vector<128x16xbf16> to vector<32x16xbf16>
    %90 = vector.extract_strided_slice %84 {offsets = [0, 0], sizes = [64, 32], strides = [1, 1]} : vector<64x128xbf16> to vector<64x32xbf16>
    %91 = vector.extract_strided_slice %85 {offsets = [0, 0], sizes = [16, 32], strides = [1, 1]} : vector<16x128xbf16> to vector<16x32xbf16>
    %92 = vector.extract_strided_slice %20 {offsets = [0, 0], sizes = [64, 32], strides = [1, 1]} : vector<64x128xbf16> to vector<64x32xbf16>
    %cst_42 = arith.constant dense<0.000000e+00> : vector<64x64xf32>
    %93 = tpu.matmul %92, %88, %cst_42 {dimension_numbers = #tpu.dot_dimension_numbers<[1], [0], [0], [1], [0, 0, 1, 1], [], []>} : vector<64x32xbf16>, vector<32x64xbf16>, vector<64x64xf32> -> vector<64x64xf32>
    %94 = vector.broadcast %5 : vector<1x64xf32> to vector<64x64xf32>
    %95 = arith.addf %93, %94 : vector<64x64xf32>
    %96 = vector.extract_strided_slice %55 {offsets = [0, 0], sizes = [64, 32], strides = [1, 1]} : vector<64x128xbf16> to vector<64x32xbf16>
    %cst_43 = arith.constant dense<0.000000e+00> : vector<64x16xf32>
    %97 = tpu.matmul %96, %89, %cst_43 {dimension_numbers = #tpu.dot_dimension_numbers<[1], [0], [0], [1], [0, 0, 1, 1], [], []>} : vector<64x32xbf16>, vector<32x16xbf16>, vector<64x16xf32> -> vector<64x16xf32>
    %98 = vector.broadcast %7 : vector<1x16xf32> to vector<64x16xf32>
    %99 = arith.addf %97, %98 : vector<64x16xf32>
    %100 = vector.extract_strided_slice %68 {offsets = [0, 0], sizes = [16, 32], strides = [1, 1]} : vector<16x128xbf16> to vector<16x32xbf16>
    %cst_44 = arith.constant dense<0.000000e+00> : vector<16x64xf32>
    %101 = tpu.matmul %100, %88, %cst_44 {dimension_numbers = #tpu.dot_dimension_numbers<[1], [0], [0], [1], [0, 0, 1, 1], [], []>} : vector<16x32xbf16>, vector<32x64xbf16>, vector<16x64xf32> -> vector<16x64xf32>
    %102 = vector.broadcast %5 : vector<1x64xf32> to vector<16x64xf32>
    %103 = arith.addf %101, %102 : vector<16x64xf32>
    %104 = vector.extract_strided_slice %81 {offsets = [0, 0], sizes = [16, 32], strides = [1, 1]} : vector<16x128xbf16> to vector<16x32xbf16>
    %cst_45 = arith.constant dense<0.000000e+00> : vector<16x16xf32>
    %105 = tpu.matmul %104, %89, %cst_45 {dimension_numbers = #tpu.dot_dimension_numbers<[1], [0], [0], [1], [0, 0, 1, 1], [], []>} : vector<16x32xbf16>, vector<32x16xbf16>, vector<16x16xf32> -> vector<16x16xf32>
    %106 = vector.broadcast %7 : vector<1x16xf32> to vector<16x16xf32>
    %107 = arith.addf %105, %106 : vector<16x16xf32>
    %cst_46 = arith.constant dense<0xFF800000> : vector<64xf32>
    %108 = vector.multi_reduction <maximumf>, %95, %cst_46 [1] : vector<64x64xf32> to vector<64xf32>
    %109 = vector.shape_cast %108 : vector<64xf32> to vector<64x1xf32>
    %cst_47 = arith.constant dense<0xFF800000> : vector<64xf32>
    %110 = vector.multi_reduction <maximumf>, %99, %cst_47 [1] : vector<64x16xf32> to vector<64xf32>
    %111 = vector.shape_cast %110 : vector<64xf32> to vector<64x1xf32>
    %112 = arith.maximumf %109, %111 : vector<64x1xf32>
    %113 = vector.broadcast %112 : vector<64x1xf32> to vector<64x64xf32>
    %114 = arith.subf %95, %113 : vector<64x64xf32>
    %115 = math.exp %114 : vector<64x64xf32>
    %116 = vector.broadcast %112 : vector<64x1xf32> to vector<64x16xf32>
    %117 = arith.subf %99, %116 : vector<64x16xf32>
    %118 = math.exp %117 : vector<64x16xf32>
    %cst_48 = arith.constant dense<0.000000e+00> : vector<64xf32>
    %119 = vector.multi_reduction <add>, %115, %cst_48 [1] : vector<64x64xf32> to vector<64xf32>
    %120 = vector.shape_cast %119 : vector<64xf32> to vector<64x1xf32>
    %cst_49 = arith.constant dense<0.000000e+00> : vector<64xf32>
    %121 = vector.multi_reduction <add>, %118, %cst_49 [1] : vector<64x16xf32> to vector<64xf32>
    %122 = vector.shape_cast %121 : vector<64xf32> to vector<64x1xf32>
    %123 = arith.addf %120, %122 : vector<64x1xf32>
    %124 = tpu.reciprocal %123 {approx = true} : vector<64x1xf32> -> vector<64x1xf32>
    %125 = arith.truncf %115 : vector<64x64xf32> to vector<64x64xbf16>
    %cst_50 = arith.constant dense<0.000000e+00> : vector<64x32xf32>
    %126 = tpu.matmul %125, %90, %cst_50 {dimension_numbers = #tpu.dot_dimension_numbers<[1], [0], [0], [1], [0, 0, 1, 1], [], []>} : vector<64x64xbf16>, vector<64x32xbf16>, vector<64x32xf32> -> vector<64x32xf32>
    %127 = arith.truncf %118 : vector<64x16xf32> to vector<64x16xbf16>
    %cst_51 = arith.constant dense<0.000000e+00> : vector<64x32xf32>
    %128 = tpu.matmul %127, %91, %cst_51 {dimension_numbers = #tpu.dot_dimension_numbers<[1], [0], [0], [1], [0, 0, 1, 1], [], []>} : vector<64x16xbf16>, vector<16x32xbf16>, vector<64x32xf32> -> vector<64x32xf32>
    %129 = arith.addf %126, %128 : vector<64x32xf32>
    %130 = vector.broadcast %124 : vector<64x1xf32> to vector<64x32xf32>
    %131 = arith.mulf %129, %130 : vector<64x32xf32>
    %cst_52 = arith.constant dense<0xFF800000> : vector<16xf32>
    %132 = vector.multi_reduction <maximumf>, %103, %cst_52 [1] : vector<16x64xf32> to vector<16xf32>
    %133 = vector.shape_cast %132 : vector<16xf32> to vector<16x1xf32>
    %cst_53 = arith.constant dense<0xFF800000> : vector<16xf32>
    %134 = vector.multi_reduction <maximumf>, %107, %cst_53 [1] : vector<16x16xf32> to vector<16xf32>
    %135 = vector.shape_cast %134 : vector<16xf32> to vector<16x1xf32>
    %136 = arith.maximumf %133, %135 : vector<16x1xf32>
    %137 = vector.broadcast %136 : vector<16x1xf32> to vector<16x64xf32>
    %138 = arith.subf %103, %137 : vector<16x64xf32>
    %139 = math.exp %138 : vector<16x64xf32>
    %140 = vector.broadcast %136 : vector<16x1xf32> to vector<16x16xf32>
    %141 = arith.subf %107, %140 : vector<16x16xf32>
    %142 = math.exp %141 : vector<16x16xf32>
    %cst_54 = arith.constant dense<0.000000e+00> : vector<16xf32>
    %143 = vector.multi_reduction <add>, %139, %cst_54 [1] : vector<16x64xf32> to vector<16xf32>
    %144 = vector.shape_cast %143 : vector<16xf32> to vector<16x1xf32>
    %cst_55 = arith.constant dense<0.000000e+00> : vector<16xf32>
    %145 = vector.multi_reduction <add>, %142, %cst_55 [1] : vector<16x16xf32> to vector<16xf32>
    %146 = vector.shape_cast %145 : vector<16xf32> to vector<16x1xf32>
    %147 = arith.addf %144, %146 : vector<16x1xf32>
    %148 = tpu.reciprocal %147 {approx = true} : vector<16x1xf32> -> vector<16x1xf32>
    %149 = arith.truncf %139 : vector<16x64xf32> to vector<16x64xbf16>
    %cst_56 = arith.constant dense<0.000000e+00> : vector<16x32xf32>
    %150 = tpu.matmul %149, %90, %cst_56 {dimension_numbers = #tpu.dot_dimension_numbers<[1], [0], [0], [1], [0, 0, 1, 1], [], []>} : vector<16x64xbf16>, vector<64x32xbf16>, vector<16x32xf32> -> vector<16x32xf32>
    %151 = arith.truncf %142 : vector<16x16xf32> to vector<16x16xbf16>
    %cst_57 = arith.constant dense<0.000000e+00> : vector<16x32xf32>
    %152 = tpu.matmul %151, %91, %cst_57 {dimension_numbers = #tpu.dot_dimension_numbers<[1], [0], [0], [1], [0, 0, 1, 1], [], []>} : vector<16x16xbf16>, vector<16x32xbf16>, vector<16x32xf32> -> vector<16x32xf32>
    %153 = arith.addf %150, %152 : vector<16x32xf32>
    %154 = vector.broadcast %148 : vector<16x1xf32> to vector<16x32xf32>
    %155 = arith.mulf %153, %154 : vector<16x32xf32>
    %156 = vector.extract_strided_slice %86 {offsets = [32, 0], sizes = [32, 64], strides = [1, 1]} : vector<128x64xbf16> to vector<32x64xbf16>
    %157 = vector.extract_strided_slice %87 {offsets = [32, 0], sizes = [32, 16], strides = [1, 1]} : vector<128x16xbf16> to vector<32x16xbf16>
    %158 = vector.extract_strided_slice %84 {offsets = [0, 32], sizes = [64, 32], strides = [1, 1]} : vector<64x128xbf16> to vector<64x32xbf16>
    %159 = vector.extract_strided_slice %85 {offsets = [0, 32], sizes = [16, 32], strides = [1, 1]} : vector<16x128xbf16> to vector<16x32xbf16>
    %160 = vector.extract_strided_slice %20 {offsets = [0, 32], sizes = [64, 32], strides = [1, 1]} : vector<64x128xbf16> to vector<64x32xbf16>
    %cst_58 = arith.constant dense<0.000000e+00> : vector<64x64xf32>
    %161 = tpu.matmul %160, %156, %cst_58 {dimension_numbers = #tpu.dot_dimension_numbers<[1], [0], [0], [1], [0, 0, 1, 1], [], []>} : vector<64x32xbf16>, vector<32x64xbf16>, vector<64x64xf32> -> vector<64x64xf32>
    %162 = vector.broadcast %5 : vector<1x64xf32> to vector<64x64xf32>
    %163 = arith.addf %161, %162 : vector<64x64xf32>
    %164 = vector.extract_strided_slice %55 {offsets = [0, 32], sizes = [64, 32], strides = [1, 1]} : vector<64x128xbf16> to vector<64x32xbf16>
    %cst_59 = arith.constant dense<0.000000e+00> : vector<64x16xf32>
    %165 = tpu.matmul %164, %157, %cst_59 {dimension_numbers = #tpu.dot_dimension_numbers<[1], [0], [0], [1], [0, 0, 1, 1], [], []>} : vector<64x32xbf16>, vector<32x16xbf16>, vector<64x16xf32> -> vector<64x16xf32>
    %166 = vector.broadcast %7 : vector<1x16xf32> to vector<64x16xf32>
    %167 = arith.addf %165, %166 : vector<64x16xf32>
    %168 = vector.extract_strided_slice %68 {offsets = [0, 32], sizes = [16, 32], strides = [1, 1]} : vector<16x128xbf16> to vector<16x32xbf16>
    %cst_60 = arith.constant dense<0.000000e+00> : vector<16x64xf32>
    %169 = tpu.matmul %168, %156, %cst_60 {dimension_numbers = #tpu.dot_dimension_numbers<[1], [0], [0], [1], [0, 0, 1, 1], [], []>} : vector<16x32xbf16>, vector<32x64xbf16>, vector<16x64xf32> -> vector<16x64xf32>
    %170 = vector.broadcast %5 : vector<1x64xf32> to vector<16x64xf32>
    %171 = arith.addf %169, %170 : vector<16x64xf32>
    %172 = vector.extract_strided_slice %81 {offsets = [0, 32], sizes = [16, 32], strides = [1, 1]} : vector<16x128xbf16> to vector<16x32xbf16>
    %cst_61 = arith.constant dense<0.000000e+00> : vector<16x16xf32>
    %173 = tpu.matmul %172, %157, %cst_61 {dimension_numbers = #tpu.dot_dimension_numbers<[1], [0], [0], [1], [0, 0, 1, 1], [], []>} : vector<16x32xbf16>, vector<32x16xbf16>, vector<16x16xf32> -> vector<16x16xf32>
    %174 = vector.broadcast %7 : vector<1x16xf32> to vector<16x16xf32>
    %175 = arith.addf %173, %174 : vector<16x16xf32>
    %cst_62 = arith.constant dense<0xFF800000> : vector<64xf32>
    %176 = vector.multi_reduction <maximumf>, %163, %cst_62 [1] : vector<64x64xf32> to vector<64xf32>
    %177 = vector.shape_cast %176 : vector<64xf32> to vector<64x1xf32>
    %cst_63 = arith.constant dense<0xFF800000> : vector<64xf32>
    %178 = vector.multi_reduction <maximumf>, %167, %cst_63 [1] : vector<64x16xf32> to vector<64xf32>
    %179 = vector.shape_cast %178 : vector<64xf32> to vector<64x1xf32>
    %180 = arith.maximumf %177, %179 : vector<64x1xf32>
    %181 = vector.broadcast %180 : vector<64x1xf32> to vector<64x64xf32>
    %182 = arith.subf %163, %181 : vector<64x64xf32>
    %183 = math.exp %182 : vector<64x64xf32>
    %184 = vector.broadcast %180 : vector<64x1xf32> to vector<64x16xf32>
    %185 = arith.subf %167, %184 : vector<64x16xf32>
    %186 = math.exp %185 : vector<64x16xf32>
    %cst_64 = arith.constant dense<0.000000e+00> : vector<64xf32>
    %187 = vector.multi_reduction <add>, %183, %cst_64 [1] : vector<64x64xf32> to vector<64xf32>
    %188 = vector.shape_cast %187 : vector<64xf32> to vector<64x1xf32>
    %cst_65 = arith.constant dense<0.000000e+00> : vector<64xf32>
    %189 = vector.multi_reduction <add>, %186, %cst_65 [1] : vector<64x16xf32> to vector<64xf32>
    %190 = vector.shape_cast %189 : vector<64xf32> to vector<64x1xf32>
    %191 = arith.addf %188, %190 : vector<64x1xf32>
    %192 = tpu.reciprocal %191 {approx = true} : vector<64x1xf32> -> vector<64x1xf32>
    %193 = arith.truncf %183 : vector<64x64xf32> to vector<64x64xbf16>
    %cst_66 = arith.constant dense<0.000000e+00> : vector<64x32xf32>
    %194 = tpu.matmul %193, %158, %cst_66 {dimension_numbers = #tpu.dot_dimension_numbers<[1], [0], [0], [1], [0, 0, 1, 1], [], []>} : vector<64x64xbf16>, vector<64x32xbf16>, vector<64x32xf32> -> vector<64x32xf32>
    %195 = arith.truncf %186 : vector<64x16xf32> to vector<64x16xbf16>
    %cst_67 = arith.constant dense<0.000000e+00> : vector<64x32xf32>
    %196 = tpu.matmul %195, %159, %cst_67 {dimension_numbers = #tpu.dot_dimension_numbers<[1], [0], [0], [1], [0, 0, 1, 1], [], []>} : vector<64x16xbf16>, vector<16x32xbf16>, vector<64x32xf32> -> vector<64x32xf32>
    %197 = arith.addf %194, %196 : vector<64x32xf32>
    %198 = vector.broadcast %192 : vector<64x1xf32> to vector<64x32xf32>
    %199 = arith.mulf %197, %198 : vector<64x32xf32>
    %cst_68 = arith.constant dense<0xFF800000> : vector<16xf32>
    %200 = vector.multi_reduction <maximumf>, %171, %cst_68 [1] : vector<16x64xf32> to vector<16xf32>
    %201 = vector.shape_cast %200 : vector<16xf32> to vector<16x1xf32>
    %cst_69 = arith.constant dense<0xFF800000> : vector<16xf32>
    %202 = vector.multi_reduction <maximumf>, %175, %cst_69 [1] : vector<16x16xf32> to vector<16xf32>
    %203 = vector.shape_cast %202 : vector<16xf32> to vector<16x1xf32>
    %204 = arith.maximumf %201, %203 : vector<16x1xf32>
    %205 = vector.broadcast %204 : vector<16x1xf32> to vector<16x64xf32>
    %206 = arith.subf %171, %205 : vector<16x64xf32>
    %207 = math.exp %206 : vector<16x64xf32>
    %208 = vector.broadcast %204 : vector<16x1xf32> to vector<16x16xf32>
    %209 = arith.subf %175, %208 : vector<16x16xf32>
    %210 = math.exp %209 : vector<16x16xf32>
    %cst_70 = arith.constant dense<0.000000e+00> : vector<16xf32>
    %211 = vector.multi_reduction <add>, %207, %cst_70 [1] : vector<16x64xf32> to vector<16xf32>
    %212 = vector.shape_cast %211 : vector<16xf32> to vector<16x1xf32>
    %cst_71 = arith.constant dense<0.000000e+00> : vector<16xf32>
    %213 = vector.multi_reduction <add>, %210, %cst_71 [1] : vector<16x16xf32> to vector<16xf32>
    %214 = vector.shape_cast %213 : vector<16xf32> to vector<16x1xf32>
    %215 = arith.addf %212, %214 : vector<16x1xf32>
    %216 = tpu.reciprocal %215 {approx = true} : vector<16x1xf32> -> vector<16x1xf32>
    %217 = arith.truncf %207 : vector<16x64xf32> to vector<16x64xbf16>
    %cst_72 = arith.constant dense<0.000000e+00> : vector<16x32xf32>
    %218 = tpu.matmul %217, %158, %cst_72 {dimension_numbers = #tpu.dot_dimension_numbers<[1], [0], [0], [1], [0, 0, 1, 1], [], []>} : vector<16x64xbf16>, vector<64x32xbf16>, vector<16x32xf32> -> vector<16x32xf32>
    %219 = arith.truncf %210 : vector<16x16xf32> to vector<16x16xbf16>
    %cst_73 = arith.constant dense<0.000000e+00> : vector<16x32xf32>
    %220 = tpu.matmul %219, %159, %cst_73 {dimension_numbers = #tpu.dot_dimension_numbers<[1], [0], [0], [1], [0, 0, 1, 1], [], []>} : vector<16x16xbf16>, vector<16x32xbf16>, vector<16x32xf32> -> vector<16x32xf32>
    %221 = arith.addf %218, %220 : vector<16x32xf32>
    %222 = vector.broadcast %216 : vector<16x1xf32> to vector<16x32xf32>
    %223 = arith.mulf %221, %222 : vector<16x32xf32>
    %224 = vector.extract_strided_slice %86 {offsets = [64, 0], sizes = [32, 64], strides = [1, 1]} : vector<128x64xbf16> to vector<32x64xbf16>
    %225 = vector.extract_strided_slice %87 {offsets = [64, 0], sizes = [32, 16], strides = [1, 1]} : vector<128x16xbf16> to vector<32x16xbf16>
    %226 = vector.extract_strided_slice %84 {offsets = [0, 64], sizes = [64, 32], strides = [1, 1]} : vector<64x128xbf16> to vector<64x32xbf16>
    %227 = vector.extract_strided_slice %85 {offsets = [0, 64], sizes = [16, 32], strides = [1, 1]} : vector<16x128xbf16> to vector<16x32xbf16>
    %228 = vector.extract_strided_slice %20 {offsets = [0, 64], sizes = [64, 32], strides = [1, 1]} : vector<64x128xbf16> to vector<64x32xbf16>
    %cst_74 = arith.constant dense<0.000000e+00> : vector<64x64xf32>
    %229 = tpu.matmul %228, %224, %cst_74 {dimension_numbers = #tpu.dot_dimension_numbers<[1], [0], [0], [1], [0, 0, 1, 1], [], []>} : vector<64x32xbf16>, vector<32x64xbf16>, vector<64x64xf32> -> vector<64x64xf32>
    %230 = vector.broadcast %5 : vector<1x64xf32> to vector<64x64xf32>
    %231 = arith.addf %229, %230 : vector<64x64xf32>
    %232 = vector.extract_strided_slice %55 {offsets = [0, 64], sizes = [64, 32], strides = [1, 1]} : vector<64x128xbf16> to vector<64x32xbf16>
    %cst_75 = arith.constant dense<0.000000e+00> : vector<64x16xf32>
    %233 = tpu.matmul %232, %225, %cst_75 {dimension_numbers = #tpu.dot_dimension_numbers<[1], [0], [0], [1], [0, 0, 1, 1], [], []>} : vector<64x32xbf16>, vector<32x16xbf16>, vector<64x16xf32> -> vector<64x16xf32>
    %234 = vector.broadcast %7 : vector<1x16xf32> to vector<64x16xf32>
    %235 = arith.addf %233, %234 : vector<64x16xf32>
    %236 = vector.extract_strided_slice %68 {offsets = [0, 64], sizes = [16, 32], strides = [1, 1]} : vector<16x128xbf16> to vector<16x32xbf16>
    %cst_76 = arith.constant dense<0.000000e+00> : vector<16x64xf32>
    %237 = tpu.matmul %236, %224, %cst_76 {dimension_numbers = #tpu.dot_dimension_numbers<[1], [0], [0], [1], [0, 0, 1, 1], [], []>} : vector<16x32xbf16>, vector<32x64xbf16>, vector<16x64xf32> -> vector<16x64xf32>
    %238 = vector.broadcast %5 : vector<1x64xf32> to vector<16x64xf32>
    %239 = arith.addf %237, %238 : vector<16x64xf32>
    %240 = vector.extract_strided_slice %81 {offsets = [0, 64], sizes = [16, 32], strides = [1, 1]} : vector<16x128xbf16> to vector<16x32xbf16>
    %cst_77 = arith.constant dense<0.000000e+00> : vector<16x16xf32>
    %241 = tpu.matmul %240, %225, %cst_77 {dimension_numbers = #tpu.dot_dimension_numbers<[1], [0], [0], [1], [0, 0, 1, 1], [], []>} : vector<16x32xbf16>, vector<32x16xbf16>, vector<16x16xf32> -> vector<16x16xf32>
    %242 = vector.broadcast %7 : vector<1x16xf32> to vector<16x16xf32>
    %243 = arith.addf %241, %242 : vector<16x16xf32>
    %cst_78 = arith.constant dense<0xFF800000> : vector<64xf32>
    %244 = vector.multi_reduction <maximumf>, %231, %cst_78 [1] : vector<64x64xf32> to vector<64xf32>
    %245 = vector.shape_cast %244 : vector<64xf32> to vector<64x1xf32>
    %cst_79 = arith.constant dense<0xFF800000> : vector<64xf32>
    %246 = vector.multi_reduction <maximumf>, %235, %cst_79 [1] : vector<64x16xf32> to vector<64xf32>
    %247 = vector.shape_cast %246 : vector<64xf32> to vector<64x1xf32>
    %248 = arith.maximumf %245, %247 : vector<64x1xf32>
    %249 = vector.broadcast %248 : vector<64x1xf32> to vector<64x64xf32>
    %250 = arith.subf %231, %249 : vector<64x64xf32>
    %251 = math.exp %250 : vector<64x64xf32>
    %252 = vector.broadcast %248 : vector<64x1xf32> to vector<64x16xf32>
    %253 = arith.subf %235, %252 : vector<64x16xf32>
    %254 = math.exp %253 : vector<64x16xf32>
    %cst_80 = arith.constant dense<0.000000e+00> : vector<64xf32>
    %255 = vector.multi_reduction <add>, %251, %cst_80 [1] : vector<64x64xf32> to vector<64xf32>
    %256 = vector.shape_cast %255 : vector<64xf32> to vector<64x1xf32>
    %cst_81 = arith.constant dense<0.000000e+00> : vector<64xf32>
    %257 = vector.multi_reduction <add>, %254, %cst_81 [1] : vector<64x16xf32> to vector<64xf32>
    %258 = vector.shape_cast %257 : vector<64xf32> to vector<64x1xf32>
    %259 = arith.addf %256, %258 : vector<64x1xf32>
    %260 = tpu.reciprocal %259 {approx = true} : vector<64x1xf32> -> vector<64x1xf32>
    %261 = arith.truncf %251 : vector<64x64xf32> to vector<64x64xbf16>
    %cst_82 = arith.constant dense<0.000000e+00> : vector<64x32xf32>
    %262 = tpu.matmul %261, %226, %cst_82 {dimension_numbers = #tpu.dot_dimension_numbers<[1], [0], [0], [1], [0, 0, 1, 1], [], []>} : vector<64x64xbf16>, vector<64x32xbf16>, vector<64x32xf32> -> vector<64x32xf32>
    %263 = arith.truncf %254 : vector<64x16xf32> to vector<64x16xbf16>
    %cst_83 = arith.constant dense<0.000000e+00> : vector<64x32xf32>
    %264 = tpu.matmul %263, %227, %cst_83 {dimension_numbers = #tpu.dot_dimension_numbers<[1], [0], [0], [1], [0, 0, 1, 1], [], []>} : vector<64x16xbf16>, vector<16x32xbf16>, vector<64x32xf32> -> vector<64x32xf32>
    %265 = arith.addf %262, %264 : vector<64x32xf32>
    %266 = vector.broadcast %260 : vector<64x1xf32> to vector<64x32xf32>
    %267 = arith.mulf %265, %266 : vector<64x32xf32>
    %cst_84 = arith.constant dense<0xFF800000> : vector<16xf32>
    %268 = vector.multi_reduction <maximumf>, %239, %cst_84 [1] : vector<16x64xf32> to vector<16xf32>
    %269 = vector.shape_cast %268 : vector<16xf32> to vector<16x1xf32>
    %cst_85 = arith.constant dense<0xFF800000> : vector<16xf32>
    %270 = vector.multi_reduction <maximumf>, %243, %cst_85 [1] : vector<16x16xf32> to vector<16xf32>
    %271 = vector.shape_cast %270 : vector<16xf32> to vector<16x1xf32>
    %272 = arith.maximumf %269, %271 : vector<16x1xf32>
    %273 = vector.broadcast %272 : vector<16x1xf32> to vector<16x64xf32>
    %274 = arith.subf %239, %273 : vector<16x64xf32>
    %275 = math.exp %274 : vector<16x64xf32>
    %276 = vector.broadcast %272 : vector<16x1xf32> to vector<16x16xf32>
    %277 = arith.subf %243, %276 : vector<16x16xf32>
    %278 = math.exp %277 : vector<16x16xf32>
    %cst_86 = arith.constant dense<0.000000e+00> : vector<16xf32>
    %279 = vector.multi_reduction <add>, %275, %cst_86 [1] : vector<16x64xf32> to vector<16xf32>
    %280 = vector.shape_cast %279 : vector<16xf32> to vector<16x1xf32>
    %cst_87 = arith.constant dense<0.000000e+00> : vector<16xf32>
    %281 = vector.multi_reduction <add>, %278, %cst_87 [1] : vector<16x16xf32> to vector<16xf32>
    %282 = vector.shape_cast %281 : vector<16xf32> to vector<16x1xf32>
    %283 = arith.addf %280, %282 : vector<16x1xf32>
    %284 = tpu.reciprocal %283 {approx = true} : vector<16x1xf32> -> vector<16x1xf32>
    %285 = arith.truncf %275 : vector<16x64xf32> to vector<16x64xbf16>
    %cst_88 = arith.constant dense<0.000000e+00> : vector<16x32xf32>
    %286 = tpu.matmul %285, %226, %cst_88 {dimension_numbers = #tpu.dot_dimension_numbers<[1], [0], [0], [1], [0, 0, 1, 1], [], []>} : vector<16x64xbf16>, vector<64x32xbf16>, vector<16x32xf32> -> vector<16x32xf32>
    %287 = arith.truncf %278 : vector<16x16xf32> to vector<16x16xbf16>
    %cst_89 = arith.constant dense<0.000000e+00> : vector<16x32xf32>
    %288 = tpu.matmul %287, %227, %cst_89 {dimension_numbers = #tpu.dot_dimension_numbers<[1], [0], [0], [1], [0, 0, 1, 1], [], []>} : vector<16x16xbf16>, vector<16x32xbf16>, vector<16x32xf32> -> vector<16x32xf32>
    %289 = arith.addf %286, %288 : vector<16x32xf32>
    %290 = vector.broadcast %284 : vector<16x1xf32> to vector<16x32xf32>
    %291 = arith.mulf %289, %290 : vector<16x32xf32>
    %292 = vector.extract_strided_slice %86 {offsets = [96, 0], sizes = [32, 64], strides = [1, 1]} : vector<128x64xbf16> to vector<32x64xbf16>
    %293 = vector.extract_strided_slice %87 {offsets = [96, 0], sizes = [32, 16], strides = [1, 1]} : vector<128x16xbf16> to vector<32x16xbf16>
    %294 = vector.extract_strided_slice %84 {offsets = [0, 96], sizes = [64, 32], strides = [1, 1]} : vector<64x128xbf16> to vector<64x32xbf16>
    %295 = vector.extract_strided_slice %85 {offsets = [0, 96], sizes = [16, 32], strides = [1, 1]} : vector<16x128xbf16> to vector<16x32xbf16>
    %296 = vector.extract_strided_slice %20 {offsets = [0, 96], sizes = [64, 32], strides = [1, 1]} : vector<64x128xbf16> to vector<64x32xbf16>
    %cst_90 = arith.constant dense<0.000000e+00> : vector<64x64xf32>
    %297 = tpu.matmul %296, %292, %cst_90 {dimension_numbers = #tpu.dot_dimension_numbers<[1], [0], [0], [1], [0, 0, 1, 1], [], []>} : vector<64x32xbf16>, vector<32x64xbf16>, vector<64x64xf32> -> vector<64x64xf32>
    %298 = vector.broadcast %5 : vector<1x64xf32> to vector<64x64xf32>
    %299 = arith.addf %297, %298 : vector<64x64xf32>
    %300 = vector.extract_strided_slice %55 {offsets = [0, 96], sizes = [64, 32], strides = [1, 1]} : vector<64x128xbf16> to vector<64x32xbf16>
    %cst_91 = arith.constant dense<0.000000e+00> : vector<64x16xf32>
    %301 = tpu.matmul %300, %293, %cst_91 {dimension_numbers = #tpu.dot_dimension_numbers<[1], [0], [0], [1], [0, 0, 1, 1], [], []>} : vector<64x32xbf16>, vector<32x16xbf16>, vector<64x16xf32> -> vector<64x16xf32>
    %302 = vector.broadcast %7 : vector<1x16xf32> to vector<64x16xf32>
    %303 = arith.addf %301, %302 : vector<64x16xf32>
    %304 = vector.extract_strided_slice %68 {offsets = [0, 96], sizes = [16, 32], strides = [1, 1]} : vector<16x128xbf16> to vector<16x32xbf16>
    %cst_92 = arith.constant dense<0.000000e+00> : vector<16x64xf32>
    %305 = tpu.matmul %304, %292, %cst_92 {dimension_numbers = #tpu.dot_dimension_numbers<[1], [0], [0], [1], [0, 0, 1, 1], [], []>} : vector<16x32xbf16>, vector<32x64xbf16>, vector<16x64xf32> -> vector<16x64xf32>
    %306 = vector.broadcast %5 : vector<1x64xf32> to vector<16x64xf32>
    %307 = arith.addf %305, %306 : vector<16x64xf32>
    %308 = vector.extract_strided_slice %81 {offsets = [0, 96], sizes = [16, 32], strides = [1, 1]} : vector<16x128xbf16> to vector<16x32xbf16>
    %cst_93 = arith.constant dense<0.000000e+00> : vector<16x16xf32>
    %309 = tpu.matmul %308, %293, %cst_93 {dimension_numbers = #tpu.dot_dimension_numbers<[1], [0], [0], [1], [0, 0, 1, 1], [], []>} : vector<16x32xbf16>, vector<32x16xbf16>, vector<16x16xf32> -> vector<16x16xf32>
    %310 = vector.broadcast %7 : vector<1x16xf32> to vector<16x16xf32>
    %311 = arith.addf %309, %310 : vector<16x16xf32>
    %cst_94 = arith.constant dense<0xFF800000> : vector<64xf32>
    %312 = vector.multi_reduction <maximumf>, %299, %cst_94 [1] : vector<64x64xf32> to vector<64xf32>
    %313 = vector.shape_cast %312 : vector<64xf32> to vector<64x1xf32>
    %cst_95 = arith.constant dense<0xFF800000> : vector<64xf32>
    %314 = vector.multi_reduction <maximumf>, %303, %cst_95 [1] : vector<64x16xf32> to vector<64xf32>
    %315 = vector.shape_cast %314 : vector<64xf32> to vector<64x1xf32>
    %316 = arith.maximumf %313, %315 : vector<64x1xf32>
    %317 = vector.broadcast %316 : vector<64x1xf32> to vector<64x64xf32>
    %318 = arith.subf %299, %317 : vector<64x64xf32>
    %319 = math.exp %318 : vector<64x64xf32>
    %320 = vector.broadcast %316 : vector<64x1xf32> to vector<64x16xf32>
    %321 = arith.subf %303, %320 : vector<64x16xf32>
    %322 = math.exp %321 : vector<64x16xf32>
    %cst_96 = arith.constant dense<0.000000e+00> : vector<64xf32>
    %323 = vector.multi_reduction <add>, %319, %cst_96 [1] : vector<64x64xf32> to vector<64xf32>
    %324 = vector.shape_cast %323 : vector<64xf32> to vector<64x1xf32>
    %cst_97 = arith.constant dense<0.000000e+00> : vector<64xf32>
    %325 = vector.multi_reduction <add>, %322, %cst_97 [1] : vector<64x16xf32> to vector<64xf32>
    %326 = vector.shape_cast %325 : vector<64xf32> to vector<64x1xf32>
    %327 = arith.addf %324, %326 : vector<64x1xf32>
    %328 = tpu.reciprocal %327 {approx = true} : vector<64x1xf32> -> vector<64x1xf32>
    %329 = arith.truncf %319 : vector<64x64xf32> to vector<64x64xbf16>
    %cst_98 = arith.constant dense<0.000000e+00> : vector<64x32xf32>
    %330 = tpu.matmul %329, %294, %cst_98 {dimension_numbers = #tpu.dot_dimension_numbers<[1], [0], [0], [1], [0, 0, 1, 1], [], []>} : vector<64x64xbf16>, vector<64x32xbf16>, vector<64x32xf32> -> vector<64x32xf32>
    %331 = arith.truncf %322 : vector<64x16xf32> to vector<64x16xbf16>
    %cst_99 = arith.constant dense<0.000000e+00> : vector<64x32xf32>
    %332 = tpu.matmul %331, %295, %cst_99 {dimension_numbers = #tpu.dot_dimension_numbers<[1], [0], [0], [1], [0, 0, 1, 1], [], []>} : vector<64x16xbf16>, vector<16x32xbf16>, vector<64x32xf32> -> vector<64x32xf32>
    %333 = arith.addf %330, %332 : vector<64x32xf32>
    %334 = vector.broadcast %328 : vector<64x1xf32> to vector<64x32xf32>
    %335 = arith.mulf %333, %334 : vector<64x32xf32>
    %cst_100 = arith.constant dense<0xFF800000> : vector<16xf32>
    %336 = vector.multi_reduction <maximumf>, %307, %cst_100 [1] : vector<16x64xf32> to vector<16xf32>
    %337 = vector.shape_cast %336 : vector<16xf32> to vector<16x1xf32>
    %cst_101 = arith.constant dense<0xFF800000> : vector<16xf32>
    %338 = vector.multi_reduction <maximumf>, %311, %cst_101 [1] : vector<16x16xf32> to vector<16xf32>
    %339 = vector.shape_cast %338 : vector<16xf32> to vector<16x1xf32>
    %340 = arith.maximumf %337, %339 : vector<16x1xf32>
    %341 = vector.broadcast %340 : vector<16x1xf32> to vector<16x64xf32>
    %342 = arith.subf %307, %341 : vector<16x64xf32>
    %343 = math.exp %342 : vector<16x64xf32>
    %344 = vector.broadcast %340 : vector<16x1xf32> to vector<16x16xf32>
    %345 = arith.subf %311, %344 : vector<16x16xf32>
    %346 = math.exp %345 : vector<16x16xf32>
    %cst_102 = arith.constant dense<0.000000e+00> : vector<16xf32>
    %347 = vector.multi_reduction <add>, %343, %cst_102 [1] : vector<16x64xf32> to vector<16xf32>
    %348 = vector.shape_cast %347 : vector<16xf32> to vector<16x1xf32>
    %cst_103 = arith.constant dense<0.000000e+00> : vector<16xf32>
    %349 = vector.multi_reduction <add>, %346, %cst_103 [1] : vector<16x16xf32> to vector<16xf32>
    %350 = vector.shape_cast %349 : vector<16xf32> to vector<16x1xf32>
    %351 = arith.addf %348, %350 : vector<16x1xf32>
    %352 = tpu.reciprocal %351 {approx = true} : vector<16x1xf32> -> vector<16x1xf32>
    %353 = arith.truncf %343 : vector<16x64xf32> to vector<16x64xbf16>
    %cst_104 = arith.constant dense<0.000000e+00> : vector<16x32xf32>
    %354 = tpu.matmul %353, %294, %cst_104 {dimension_numbers = #tpu.dot_dimension_numbers<[1], [0], [0], [1], [0, 0, 1, 1], [], []>} : vector<16x64xbf16>, vector<64x32xbf16>, vector<16x32xf32> -> vector<16x32xf32>
    %355 = arith.truncf %346 : vector<16x16xf32> to vector<16x16xbf16>
    %cst_105 = arith.constant dense<0.000000e+00> : vector<16x32xf32>
    %356 = tpu.matmul %355, %295, %cst_105 {dimension_numbers = #tpu.dot_dimension_numbers<[1], [0], [0], [1], [0, 0, 1, 1], [], []>} : vector<16x16xbf16>, vector<16x32xbf16>, vector<16x32xf32> -> vector<16x32xf32>
    %357 = arith.addf %354, %356 : vector<16x32xf32>
    %358 = vector.broadcast %352 : vector<16x1xf32> to vector<16x32xf32>
    %359 = arith.mulf %357, %358 : vector<16x32xf32>
    %360 = tpu.concatenate %131, %199, %267, %335 in 1 : vector<64x32xf32>, vector<64x32xf32>, vector<64x32xf32>, vector<64x32xf32> -> vector<64x128xf32>
    %c0_106 = arith.constant 0 : index
    %c0_107 = arith.constant 0 : index
    %c0_108 = arith.constant 0 : index
    %361 = vector.load %arg7[%c0_106, %c0_107, %c0_108] : memref<1x64x128xf32, #tpu.memory_space<vmem>>, vector<1x64x128xf32>
    %362 = vector.shape_cast %361 : vector<1x64x128xf32> to vector<64x128xf32>
    %363 = vector.shape_cast %360 : vector<64x128xf32> to vector<1x64x128xf32>
    tpu.vector_store %arg7[%c0_106, %c0_107, %c0_108], %363 {strides = array<i32>} : memref<1x64x128xf32, #tpu.memory_space<vmem>>, vector<1x64x128xf32>,
    %364 = tpu.concatenate %155, %223, %291, %359 in 1 : vector<16x32xf32>, vector<16x32xf32>, vector<16x32xf32>, vector<16x32xf32> -> vector<16x128xf32>
    %c0_109 = arith.constant 0 : index
    %c0_110 = arith.constant 0 : index
    %c0_111 = arith.constant 0 : index
    %365 = vector.load %arg8[%c0_109, %c0_110, %c0_111] : memref<1x16x128xf32, #tpu.memory_space<vmem>>, vector<1x16x128xf32>
    %366 = vector.shape_cast %365 : vector<1x16x128xf32> to vector<16x128xf32>
    %367 = vector.shape_cast %364 : vector<16x128xf32> to vector<1x16x128xf32>
    tpu.vector_store %arg8[%c0_109, %c0_110, %c0_111], %367 {strides = array<i32>} : memref<1x16x128xf32, #tpu.memory_space<vmem>>, vector<1x16x128xf32>,
    return
  }
  func.func @transform_0(%arg0: i32, %arg1: i32) -> (i32, i32, i32) {
    %c0_i32 = arith.constant 0 : i32
    %c0_i32_0 = arith.constant 0 : i32
    %c0_i32_1 = arith.constant 0 : i32
    return %arg0, %c0_i32, %c0_i32_0 : i32, i32, i32
  }
  func.func @transform_1(%arg0: i32, %arg1: i32) -> (i32, i32, i32) {
    %c0_i32 = arith.constant 0 : i32
    %c0_i32_0 = arith.constant 0 : i32
    %c0_i32_1 = arith.constant 0 : i32
    return %arg0, %c0_i32, %c0_i32_0 : i32, i32, i32
  }
  func.func @transform_2(%arg0: i32, %arg1: i32) -> (i32, i32, i32) {
    %c0_i32 = arith.constant 0 : i32
    %c0_i32_0 = arith.constant 0 : i32
    %c0_i32_1 = arith.constant 0 : i32
    return %arg0, %c0_i32, %c0_i32_0 : i32, i32, i32
  }
  func.func @transform_3(%arg0: i32, %arg1: i32) -> (i32, i32, i32, i32) {
    %c0_i32 = arith.constant 0 : i32
    %c0_i32_0 = arith.constant 0 : i32
    %c0_i32_1 = arith.constant 0 : i32
    %c0_i32_2 = arith.constant 0 : i32
    %c0_i32_3 = arith.constant 0 : i32
    return %c0_i32, %c0_i32_0, %c0_i32_1, %c0_i32_2 : i32, i32, i32, i32
  }
  func.func @transform_4(%arg0: i32, %arg1: i32) -> (i32, i32, i32) {
    %c0_i32 = arith.constant 0 : i32
    %c0_i32_0 = arith.constant 0 : i32
    %c0_i32_1 = arith.constant 0 : i32
    %c0_i32_2 = arith.constant 0 : i32
    return %c0_i32, %c0_i32_0, %c0_i32_1 : i32, i32, i32
  }
  func.func @transform_5(%arg0: i32, %arg1: i32) -> (i32, i32, i32) {
    %c0_i32 = arith.constant 0 : i32
    %c0_i32_0 = arith.constant 0 : i32
    return %arg0, %c0_i32, %arg1 : i32, i32, i32
  }
  func.func @transform_6(%arg0: i32, %arg1: i32) -> (i32, i32, i32) {
    %c0_i32 = arith.constant 0 : i32
    %c0_i32_0 = arith.constant 0 : i32
    return %arg0, %c0_i32, %arg1 : i32, i32, i32
  }
}

</mosaic_0001>

<bundles_post_ra>
// kernel: tpu_custom_call.1
= control target key start
LH: loop header
LB: loop body
LE: loop exit
PB: predicated region body
PF: predicated region fallthrough
CT: control target
= control target key end

     0   :  { %12 = vsyncpa [#allocation3], 0  ;;  %s8203_s0 = inlined_call_operand.hbm [shape: bf16[2,80,128], index: 0, kind: input, shape index: {}]   ;;  %s8204_s1 = inlined_call_operand.vmem [shape: f32[2,1,64], index: 1, kind: input, shape index: {}]   ;;  %s8205_s2 = inlined_call_operand.vmem [shape: f32[2,1,16], index: 2, kind: input, shape index: {}]   ;;  %s8206_s3 = inlined_call_operand.hbm [shape: bf16[1,6,128,128], index: 3, kind: input, shape index: {}]   ;;  %s8207_s4 = inlined_call_operand.vmem [shape: f32[1,6,128], index: 4, kind: input, shape index: {}]   ;;  %s8208_s5 = inlined_call_operand.hbm [shape: f32[2,64,128], index: 5, kind: output, shape index: {0}]   ;;  %s8209_s6 = inlined_call_operand.hbm [shape: f32[2,16,128], index: 6, kind: output, shape index: {1}]  }
   0x1   :  { %14 = vsyncpa [#allocation3 + $0x1], 0 }
   0x2   :  { %15 = vsyncpa [#allocation6], 0 }
   0x3   :  { %16 = vsyncpa [#allocation4], 0 }
   0x4   :  { %18 = vsyncpa [#allocation4 + $0x1], 0 }
   0x5   :  { %19 = vsyncpa [#allocation9], 0 }
   0x6   :  { %21 = vsyncpa [#allocation9 + $0x1], 0  ;;  %s6222_s21 = smov 0   ;;  %s6224_s22 = smov 0  }
   0x7   :  { %s6226_s23 = smov 0   ;;  %s6228_s24 = smov 0  }
   0x8   :  { %s6230_s25 = smov 0   ;;  %s6232_s26 = smov 0  }
   0x9 LB: > { %s4605_s27 = sadd.s32 4294967295, %s6172_s26   ;;  %s4606_s28 = sadd.s32 4294967294, %s6172_s26   ;;  %s6172_s26 = sphi %s6232_s26, %s27_s26   ;;  %s6168_s25 = sphi %s6230_s25, %s8413_s25   ;;  %s6164_s24 = sphi %s6228_s24, %s8412_s24   ;;  %s6160_s23 = sphi %s6226_s23, %s8411_s23   ;;  %s6156_s22 = sphi %s6224_s22, %s8410_s22   ;;  %s6152_s21 = sphi %s6222_s21, %s8409_s21  }
   0xa   : > { %p59_p0 = scmp.ne.s32.totalorder %s6156_s22, %s6152_s21  ;;  %p6256_p1 = scmp.eq.s32.totalorder %s4605_s27, 0 }
   0xb   : > { %p6260_p2 = scmp.eq.s32.totalorder %s4605_s27, 1  ;;  %p185_p3 = scmp.eq.s32.totalorder %s4606_s28, 1 }
   0xc   : > { %s8256_s29 = scalar_select %p6256_p1, 1, 0 }
   0xd   : > { %s8257_s30 = scalar_select %p6260_p2, 1, 0 }
   0xe   : > { %p6266_p4 = por %p6256_p1, %p59_p0  ;;  %p4607_p5 = scmp.ge.s32.totalorder %s6172_s26, 1 }
   0xf   : > { %p6271_p6 = por %p185_p3, %p59_p0  ;;  %p220_p7 = scmp.lt.s32.totalorder %s6172_s26, 3 }
  0x10   : > { %s8258_s7 = scalar_select %p6266_p4, 1, 0 }
  0x11   : > { %s8259_s8 = scalar_select %p6271_p6, 1, 0 }
  0x12   : > { %p6276_p8 = pnand %p4607_p5, %p220_p7  ;;  %s6174_s10 = smov [#allocation5]  }
  0x13   : > { %s232_s11 = sshll.u32 %s6174_s10, 4  ;;  %s39_s13 = sadd.s32 1, %s6168_s25  ;;  %s233_s11 = int_to_ptr.vmem [resolvable:$true] %s232_s11 }
  0x14   : > { %s8260_s9 = scalar_select %p6276_p8, 1, 0 }
  0x15   : > { %p5623_p9 = pneg %p6276_p8  ;;  %s5996_s16 = scalar_lea.hbm %s8206_s3, 6144 }
  0x16   : > { %p5997_p12 = scmp.ne.s32.totalorder %s8206_s3, %s5996_s16  ;;  %p6003_p5 = scmp.lt.u32.totalorder %s5996_s16, %s8206_s3 }
  0x17   : > { %p6285_p11 = pnand %p5623_p9, %p6256_p1 }
  0x19   : > { %p5998_p13 = pneg %p6285_p11 }
  0x1b   : > { %p5999_p0 = pnand %p5998_p13, %p5997_p12 }
  0x1d   : > { %p6000_p3 = pneg %p5999_p0 }
  0x1f   : > { %p6005_p7 = pnand %p6003_p5, %p6000_p3 }
  0x21   : > { %6008 = shalt.err (!%p6005_p7)
}
  0x22   : > { %s6009_s27 = scalar_lea.vmem %s233_s11, 6144  ;;  %p6017_p1 = scmp.lt.s32.totalorder %s233_s11, %s233_s11 }
  0x23   : > { %p6010_p9 = scmp.ne.s32.totalorder %s233_s11, %s6009_s27  ;;  %p6018_p4 = scmp.lt.s32.totalorder %s6009_s27, %s6009_s27 }
  0x25   : > { %p6012_p10 = pnand %p6010_p9, %p5998_p13  ;;  %p6019_p8 = por %p6018_p4, %p6017_p1 }
  0x27   : > { %p6013_p6 = pneg %p6012_p10 }
  0x29   : > { %p6020_p2 = pnand %p6019_p8, %p6013_p6 }
  0x2b   : > { %6023 = shalt.err (!%p6020_p2)
}
  0x2c   : > { %s8214_s28 = smov 64   ;;  %s8215_s10 = smov 4  }
  0x2d   : > { %5626 = dma.hbm_to_vmem [thread:$0]  (!%p6285_p11), %s8206_s3, 6144, %s233_s11, [#allocation6], %s8214_s28, %s8214_s28, %s8215_s10  }
  0x2e   : > { %p41_p1 = scmp.ge.s32.totalorder %s39_s13, 2  ;;  %s46_s16 = sadd.s32 1, %s6160_s23 }
  0x2f   : > { %p53_p2 = scmp.ne.s32.totalorder %s6160_s23, %s6156_s22  ;;  %p54_p4 = scmp.eq.s32.totalorder %s6172_s26, 0 }
  0x30   : > { %s8415_s13 = smov (%p41_p1, %s39_s13), 0  ;;  %p8262_p8 = scmp.ne.s32.totalorder %s8257_s30, 0 }
  0x31   : > { %p55_p6 = por %p54_p4, %p53_p2  ;;  %s43_s12 = ssub.s32 %s6168_s25, %s8415_s13 }
  0x32   : > { %p6317_p10 = por %p8262_p8, %p53_p2  ;;  %p5639_p12 = scmp.lt.s32.totalorder %s6172_s26, 2 }
  0x33   : > { %p44_p13 = scmp.eq.s32.totalorder %s43_s12, 0  ;;  %s249_s18 = sand.u32 1, %s6160_s23  }
  0x34   : > { %s5610_s19 = smul.u32 40, %s249_s18  ;;  %p6329_p11 = pnand %p5639_p12, %p55_p6 }
  0x35   : > { %s6326_s20 = scalar_select %p44_p13, %s6160_s23, %s46_s16  }
  0x36   : > { %s5611_s11 = smul.u32 640, %s6168_s25  ;;  %s253_s27 = scalar_lea.vmem [#allocation2], %s5610_s19 }
  0x37   : > { %s260_s14 = sshll.u32 %s253_s27, 4  ;;  %s6340_s16 = scalar_lea.sflag [#allocation3], %s249_s18  ;;  %s6338_s14 = int_to_ptr.vmem [resolvable:$true] %s260_s14 }
  0x38   : > { %s6336_s10 = scalar_lea.hbm %s8203_s0, %s5611_s11  ;;  %p6026_p3 = pneg %p6329_p11 }
  0x39   : > { %s6024_s12 = scalar_lea.hbm %s6336_s10, 640  ;;  %s6029_s11 = scalar_lea.hbm %s8203_s0, 1280 }
  0x3a   : > { %p6025_p0 = scmp.ne.s32.totalorder %s6336_s10, %s6024_s12  ;;  %p6030_p9 = scmp.lt.u32.totalorder %s6336_s10, %s8203_s0 }
  0x3b   : > { %p6031_p1 = scmp.lt.u32.totalorder %s6029_s11, %s6024_s12  ;;  %p6033_p4 = scmp.lt.u32.totalorder %s6024_s12, %s6336_s10 }
  0x3c   : > { %p6027_p5 = pnand %p6026_p3, %p6025_p0 }
  0x3d   : > { %p6032_p2 = por %p6031_p1, %p6030_p9 }
  0x3e   : > { %p6028_p7 = pneg %p6027_p5 }
  0x3f   : > { %p6034_p6 = por %p6033_p4, %p6032_p2 }
  0x41   : > { %p6035_p8 = pnand %p6034_p6, %p6028_p7 }
  0x43   : > { %6038 = shalt.err (!%p6035_p8)
}
  0x44   : > { %s6039_s18 = scalar_lea.vmem %s6338_s14, 640  ;;  %s6177_s28 = smov [#allocation2]  }
  0x45   : > { %p6040_p12 = scmp.ne.s32.totalorder %s6338_s14, %s6039_s18  ;;  %s6044_s19 = sshll.u32 %s6177_s28, 4  ;;  %s6045_s19 = int_to_ptr.vmem [resolvable:$false] %s6044_s19 }
  0x46   : > { %s6046_s27 = scalar_lea.vmem %s6045_s19, 1280  ;;  %p6047_p5 = scmp.lt.s32.totalorder %s6338_s14, %s6045_s19 }
  0x47   : > { %p6042_p13 = pnand %p6040_p12, %p6026_p3  ;;  %p6048_p9 = scmp.lt.s32.totalorder %s6046_s27, %s6039_s18 }
  0x49   : > { %p6043_p0 = pneg %p6042_p13  ;;  %p6049_p1 = por %p6048_p9, %p6047_p5 }
  0x4b   : > { %p6050_p2 = pnand %p6049_p1, %p6043_p0 }
  0x4d   : > { %6053 = shalt.err (!%p6050_p2)
}
  0x4e   : > { %s8265_s12 = smov 4   ;;  %s8266_s11 = smov 64  }
  0x4f   : > { %5630 = dma.hbm_to_vmem [thread:$0]  (!%p6329_p11), %s6336_s10, 640, %s6338_s14, %s6340_s16, %s8266_s11, %s8266_s11, %s8265_s12  }
  0x50   : > { %p8267_p3 = scmp.ne.s32.totalorder %s8260_s9, 0 }
  0x52   : > { %284 = sbr.rel (%p8267_p3) target bundleno = 2672 (0xa70), region = 40 }
  0x59   : > { %s6374_s30 = sand.u32 1, %s6156_s22   ;;  %p8268_p7 = scmp.ne.s32.totalorder %s8258_s7, 0 }
  0x5a   : > { %s5612_s18 = smul.u32 40, %s6374_s30  ;;  %s287_s28 = scalar_lea.sflag [#allocation3], %s6374_s30 }
  0x5c   : > { %s6378_s19 = scalar_lea.vmem [#allocation2], %s5612_s18 }
  0x5d   : > { %6135 = dma.done.wait (%p8268_p7), %s287_s28, 640  }
  0x5e   : > { %6137 = vsyncadd (%p8268_p7), %s287_s28, 4294966656  ;;  %p8269_p11 = scmp.ne.s32.totalorder %s8256_s29, 0 }
  0x60   : > { %6139 = dma.done.wait (%p8269_p11), [#allocation6], 6144  }
  0x61   : > { %6141 = vsyncadd (%p8269_p11), [#allocation6], 4294961152  ;;  %v8216_v0 = vmov 0.0   ;;  %vm6179_vm0 = vmmov 0   ;;  %v5701_v1 = vld [vmem:[#allocation5 + $0x40] sm:$0xff]   ;;  %v5702_v2 = vld [vmem:[#allocation5 + $0x48] sm:$0xff]  }
  0x62   : > { %5090 = vmatprep.subr.bf16.mxu1 %v8216_v0  ;;  %5106 = vmatprep.mubr.msk.bf16.mxu1 %vm6179_vm0, %v8216_v0  ;;  %v5703_v3 = vld [vmem:[#allocation5 + $0x50] sm:$0xff]   ;;  %v5704_v5 = vld [vmem:[#allocation5 + $0x58] sm:$0xff]   ;;  %v5705_v6 = vld [vmem:[#allocation5 + $0x60] sm:$0xff]   ;;  %vm1253_vm1 = vcmask 261120   ;;  %p334_p4 = scmp.lt.s32.totalorder %s6164_s24, 1  ;;  %vm1502_vm2 = vcmask 523264  }
  0x63   : > { %5091 = vmatpush3.bf16.msra.mxu1 %v5701_v1  ;;  %v6394_v4 = vld [vmem:[%s6378_s19] sm:$0xff]   ;;  %v5714_v7 = vld [vmem:[#allocation5] sm:$0xff]   ;;  %v5715_v8 = vld [vmem:[#allocation5 + $0x8] sm:$0xff]   ;;  %vm1527_vm3 = vcmask 130048   ;;  %s6180_s16 = smov 96   ;;  %s6181_s27 = smov 64  }
  0x64   : > { %5092 = vmatprep.subr.bf16.mxu1 %v8216_v0  ;;  %5082 = vmatprep.mubr.bf16.mxu0 %v6394_v4  ;;  %v5716_v9 = vld [vmem:[#allocation5 + $0x10] sm:$0xff]   ;;  %v5706_v10 = vld [vmem:[#allocation5 + $0x68] sm:$0xff]   ;;  %v5717_v11 = vld [vmem:[#allocation5 + $0x18] sm:$0xff]   ;;  %s6182_s12 = smov 32   ;;  %s4613_s11 = sshll.u32 %s6374_s30, 6  ;;  %vm4350_vm4 = vcmask 785408  }
  0x65   : > { %5066 = vmatprep.subr.bf16.mxu0 %v5714_v7  ;;  %v5707_v12 = vld [vmem:[#allocation5 + $0x70] sm:$0xff]   ;;  %v5718_v13 = vld [vmem:[#allocation5 + $0x20] sm:$0xff]   ;;  %v5708_v14 = vld [vmem:[#allocation5 + $0x78] sm:$0xff]   ;;  %s8056_s18 = scalar_lea.vmem [#allocation7], %s4613_s11  ;;  %s4614_s10 = sshll.u32 %s6374_s30, 4 }
  0x66   : > { %5067 = vmatpush3.bf16.msra.mxu0 %v5714_v7  ;;  %v5729_v15 = vld [vmem:[#allocation5 + $0xc0] sm:$0xff]   ;;  %v5719_v16 = vld [vmem:[#allocation5 + $0x28] sm:$0xff]   ;;  %v5720_v18 = vld [vmem:[#allocation5 + $0x30] sm:$0xff]   ;;  %s4419_s28 = sshll.u32 %s8056_s18, 4  ;;  %s4400_s14 = scalar_lea.sflag [#allocation4], %s6374_s30  ;;  %s8086_s28 = int_to_ptr.vmem [resolvable:$true] %s4419_s28 }
  0x67   : > { %5093 = vmatpush3.bf16.msra.mxu1 %v5702_v2  ;;  %5068 = vmatprep.subr.bf16.mxu0 %v5715_v8  ;;  %v5731_v17 = vld [vmem:[#allocation5 + $0xc8] sm:$0xff]   ;;  %v5732_v19 = vld [vmem:[#allocation5 + $0xd0] sm:$0xff]   ;;  %v6406_v20 = vld [vmem:[%s6378_s19 + $0x8] sm:$0xff]  }
  0x68   : > { %5094 = vmatprep.subr.bf16.mxu1 %v8216_v0  ;;  %v5721_v21 = vld [vmem:[#allocation5 + $0x38] sm:$0xff]   ;;  %v5735_v23 = vld [vmem:[#allocation5 + $0xe0] sm:$0xff]   ;;  %v5737_v26 = vld [vmem:[#allocation5 + $0xe8] sm:$0xff]  }
  0x69   : > { %v5733_v22 = vld [vmem:[#allocation5 + $0xd8] sm:$0xff]   ;;  %v5722_v24 = vld [vmem:[#allocation5 + $0x80] sm:$0xff]   ;;  %v5723_v27 = vld [vmem:[#allocation5 + $0x88] sm:$0xff]  }
  0x6a   : > { %5069 = vmatpush3.bf16.msra.mxu0 %v5715_v8  ;;  %v6412_v25 = vld [vmem:[%s6378_s19 + $0x10] sm:$0xff]   ;;  %v5739_v28 = vld [vmem:[#allocation5 + $0xf0] sm:$0xff]   ;;  %v5741_v31 = vld [vmem:[#allocation5 + $0xf8] sm:$0xff]  }
  0x6b   : > { %5095 = vmatpush3.bf16.msra.mxu1 %v5703_v3  ;;  %5070 = vmatprep.subr.bf16.mxu0 %v5716_v9  ;;  %v5724_v29 = vld [vmem:[#allocation5 + $0x90] sm:$0xff]   ;;  %v5725_v32 = vld [vmem:[#allocation5 + $0x98] sm:$0xff]   ;;  %v5726_v33 = vld [vmem:[#allocation5 + $0xa0] sm:$0xff]  }
  0x6c   : > { %5096 = vmatprep.subr.bf16.mxu1 %v8216_v0  ;;  %v6422_v30 = vld [vmem:[%s6378_s19 + $0x18] sm:$0xff]   ;;  %v6433_v34 = vld [vmem:[%s6378_s19 + $0x20] sm:$0xff]   ;;  %v5744_v37 = vld [vmem:[#allocation5 + $0x140] sm:$0xff]   ;;  %s335_s19 = scalar_select %p334_p4, %s6164_s24, 1 }
  0x6d   : > { %v5727_v35 = vld [vmem:[#allocation5 + $0xa8] sm:$0xff]   ;;  %v5728_v36 = vld [vmem:[#allocation5 + $0xb0] sm:$0xff]   ;;  %v5730_v38 = vld [vmem:[#allocation5 + $0xb8] sm:$0xff]  }
  0x6e   : > { %5071 = vmatpush3.bf16.msra.mxu0 %v5716_v9  ;;  %v5746_v39 = vld [vmem:[#allocation5 + $0x148] sm:$0xff]   ;;  %v5734_v40 = vld [vmem:[#allocation5 + $0x100] sm:$0xff]   ;;  %v5748_v41 = vld [vmem:[#allocation5 + $0x150] sm:$0xff]   ;;  %s6592_s9 = scalar_lea.vmem %s8204_s1, %s335_s19  ;;  %s6620_s15 = scalar_lea.vmem %s8205_s2, %s335_s19 }
  0x6f   : > { %5097 = vmatpush3.bf16.msra.mxu1 %v5704_v5  ;;  %5072 = vmatprep.subr.bf16.mxu0 %v5717_v11  ;;  %v5736_v42 = vld [vmem:[#allocation5 + $0x108] sm:$0xff]   ;;  %v5749_v43 = vld [vmem:[#allocation5 + $0x158] sm:$0xff]   ;;  %v5738_v44 = vld [vmem:[#allocation5 + $0x110] sm:$0xff]   ;;  %s4844_s19 = sshll.u32 %s6164_s24, 10 }
  0x70   : > { %5098 = vmatprep.subr.bf16.mxu1 %v8216_v0  ;;  %v5750_v45 = vld [vmem:[#allocation5 + $0x160] sm:$0xff]   ;;  %v5740_v46 = vld [vmem:[#allocation5 + $0x118] sm:$0xff]   ;;  %v5751_v47 = vld [vmem:[#allocation5 + $0x168] sm:$0xff]  }
  0x71   : > { %v5742_v48 = vld [vmem:[#allocation5 + $0x120] sm:$0xff]   ;;  %v5752_v49 = vld [vmem:[#allocation5 + $0x170] sm:$0xff]   ;;  %v5743_v50 = vld [vmem:[#allocation5 + $0x128] sm:$0xff]  }
  0x72   : > { %5073 = vmatpush3.bf16.msra.mxu0 %v5717_v11  ;;  %v5753_v51 = vld [vmem:[#allocation5 + $0x178] sm:$0xff]   ;;  %v5745_v52 = vld [vmem:[#allocation5 + $0x130] sm:$0xff]  }
  0x73   : > { %5099 = vmatpush3.bf16.msra.mxu1 %v5705_v6  ;;  %5074 = vmatprep.subr.bf16.mxu0 %v5718_v13  ;;  %v5747_v53 = vld [vmem:[#allocation5 + $0x138] sm:$0xff]   ;;  %v6482_v54 = vld [vmem:[%s8207_s4 + $0x1] ss:$0 sm:$0xff]  ;;  %v4615_v5 = vld [vmem:[%s8207_s4] ss:$0 sm:$0xff] }
  0x74   : > { %5100 = vmatprep.subr.bf16.mxu1 %v8216_v0 }
  0x76   : > { %5075 = vmatpush3.bf16.msra.mxu0 %v5718_v13 }
  0x77   : > { %5101 = vmatpush3.bf16.msra.mxu1 %v5706_v10  ;;  %5076 = vmatprep.subr.bf16.mxu0 %v5719_v16 }
  0x78   : > { %5102 = vmatprep.subr.bf16.mxu1 %v8216_v0 }
  0x7a   : > { %5077 = vmatpush3.bf16.msra.mxu0 %v5719_v16 }
  0x7b   : > { %5103 = vmatpush3.bf16.msra.mxu1 %v5707_v12  ;;  %5078 = vmatprep.subr.bf16.mxu0 %v5720_v18 }
  0x7c   : > { %5104 = vmatprep.subr.bf16.mxu1 %v8216_v0 }
  0x7e   : > { %5079 = vmatpush3.bf16.msra.mxu0 %v5720_v18 }
  0x7f   : > { %5105 = vmatpush3.bf16.msra.mxu1 %v5708_v14  ;;  %5080 = vmatprep.subr.bf16.mxu0 %v5721_v21 }
  0x80   : > { %5162 = vmatprep.subr.bf16.mxu1 %v5729_v15 }
  0x82   : > { %5107 = vmatmul.mubr.bf16.vlgmr.msra.gmra.mrb[0].mxu1 %v6394_v4  ;;  %5081 = vmatpush3.bf16.msra.mxu0 %v5721_v21 }
  0x83   : > { %5110 = vmatprep.mubr.msk.bf16.mxu1 %vm6179_vm0, %v8216_v0  ;;  %5163 = vmatpush3.bf16.msra.mxu1 %v5729_v15 }
  0x84   : > { %5164 = vmatprep.subr.bf16.mxu1 %v5731_v17  ;;  %5126 = vmatprep.subr.bf16.mxu0 %v8216_v0 }
  0x85   : > { %5083 = vmatmul.mubr.bf16.vlgmr.msra.gmra.mrb[0].mxu0 %v6406_v20 }
  0x86   : > { %5127 = vmatpush3.bf16.msra.mxu0 %v5722_v24  ;;  %5086 = vmatprep.mubr.bf16.mxu0 %v6412_v25 }
  0x87   : > { %5165 = vmatpush3.bf16.msra.mxu1 %v5731_v17  ;;  %5128 = vmatprep.subr.bf16.mxu0 %v8216_v0 }
  0x88   : > { %5166 = vmatprep.subr.bf16.mxu1 %v5732_v19 }
  0x8a   : > { %5111 = vmatmul.mubr.bf16.gmra.mrb[4].mxu1 %v6406_v20  ;;  %5129 = vmatpush3.bf16.msra.mxu0 %v5723_v27 }
  0x8b   : > { %5114 = vmatprep.mubr.msk.bf16.mxu1 %vm6179_vm0, %v8216_v0  ;;  %5167 = vmatpush3.bf16.msra.mxu1 %v5732_v19 }
  0x8c   : > { %5168 = vmatprep.subr.bf16.mxu1 %v5733_v22  ;;  %5130 = vmatprep.subr.bf16.mxu0 %v8216_v0 }
  0x8d   : > { %5087 = vmatmul.mubr.bf16.gmra.mrb[4].mxu0 %v6422_v30 }
  0x8e   : > { %5131 = vmatpush3.bf16.msra.mxu0 %v5724_v29  ;;  %5142 = vmatprep.mubr.msk.bf16.mxu0 %vm6179_vm0, %v8216_v0 }
  0x8f   : > { %5169 = vmatpush3.bf16.msra.mxu1 %v5733_v22  ;;  %5132 = vmatprep.subr.bf16.mxu0 %v8216_v0 }
  0x90   : > { %5170 = vmatprep.subr.bf16.mxu1 %v5735_v23 }
  0x92   : > { %5115 = vmatmul.mubr.bf16.gmra.mrb[8].mxu1 %v6412_v25  ;;  %5133 = vmatpush3.bf16.msra.mxu0 %v5725_v32 }
  0x93   : > { %5118 = vmatprep.mubr.msk.bf16.mxu1 %vm6179_vm0, %v8216_v0  ;;  %5171 = vmatpush3.bf16.msra.mxu1 %v5735_v23 }
  0x94   : > { %5172 = vmatprep.subr.bf16.mxu1 %v5737_v26  ;;  %5134 = vmatprep.subr.bf16.mxu0 %v8216_v0 }
  0x96   : > { %5135 = vmatpush3.bf16.msra.mxu0 %v5726_v33 }
  0x97   : > { %5173 = vmatpush3.bf16.msra.mxu1 %v5737_v26  ;;  %5136 = vmatprep.subr.bf16.mxu0 %v8216_v0 }
  0x98   : > { %5174 = vmatprep.subr.bf16.mxu1 %v5739_v28 }
  0x9a   : > { %5119 = vmatmul.mubr.bf16.gmra.mrb[12].mxu1 %v6422_v30  ;;  %5137 = vmatpush3.bf16.msra.mxu0 %v5727_v35 }
  0x9b   : > { %5122 = vmatprep.mubr.msk.bf16.mxu1 %vm6179_vm0, %v8216_v0  ;;  %5175 = vmatpush3.bf16.msra.mxu1 %v5739_v28 }
  0x9c   : > { %5176 = vmatprep.subr.bf16.mxu1 %v5741_v31  ;;  %5138 = vmatprep.subr.bf16.mxu0 %v8216_v0 }
  0x9e   : > { %5139 = vmatpush3.bf16.msra.mxu0 %v5728_v36 }
  0x9f   : > { %5177 = vmatpush3.bf16.msra.mxu1 %v5741_v31  ;;  %5140 = vmatprep.subr.bf16.mxu0 %v8216_v0 }
  0xa0   : > { %5206 = vmatprep.subr.bf16.mxu1 %v8216_v0 }
  0xa2   : > { %5123 = vmatmul.mubr.bf16.gmra.mrb[16].mxu1 %v6433_v34  ;;  %5141 = vmatpush3.bf16.msra.mxu0 %v5730_v38 }
  0xa3   : > { %5178 = vmatprep.mubr.bf16.mxu1 %v6394_v4  ;;  %5186 = vmatprep.subr.bf16.mxu0 %v8216_v0 }
  0xa5   : > { %5143 = vmatmul.mubr.bf16.vlgmr.msra.gmra.mrb[8].mxu0 %v6394_v4 }
  0xa6   : > { %5146 = vmatprep.mubr.msk.bf16.mxu0 %vm6179_vm0, %v8216_v0  ;;  %5187 = vmatpush3.bf16.msra.mxu0 %v5734_v40 }
  0xa7   : > { %5188 = vmatprep.subr.bf16.mxu0 %v8216_v0 }
  0xaa   : > { %5179 = vmatmul.mubr.bf16.vlgmr.msra.gmra.mrb[20].mxu1 %v6406_v20  ;;  %5189 = vmatpush3.bf16.msra.mxu0 %v5736_v42 }
  0xab   : > { %5207 = vmatpush3.bf16.msra.mxu1 %v5744_v37  ;;  %5182 = vmatprep.mubr.bf16.mxu1 %v6412_v25 }
  0xac   : > { %5208 = vmatprep.subr.bf16.mxu1 %v8216_v0  ;;  %5190 = vmatprep.subr.bf16.mxu0 %v8216_v0 }
  0xad   : > { %5147 = vmatmul.mubr.bf16.gmra.mrb[12].mxu0 %v6406_v20 }
  0xae   : > { %5150 = vmatprep.mubr.msk.bf16.mxu0 %vm6179_vm0, %v8216_v0  ;;  %5191 = vmatpush3.bf16.msra.mxu0 %v5738_v44 }
  0xaf   : > { %5209 = vmatpush3.bf16.msra.mxu1 %v5746_v39  ;;  %5192 = vmatprep.subr.bf16.mxu0 %v8216_v0 }
  0xb0   : > { %5210 = vmatprep.subr.bf16.mxu1 %v8216_v0 }
  0xb2   : > { %5183 = vmatmul.mubr.bf16.gmra.mrb[24].mxu1 %v6422_v30  ;;  %5193 = vmatpush3.bf16.msra.mxu0 %v5740_v46 }
  0xb3   : > { %5211 = vmatpush3.bf16.msra.mxu1 %v5748_v41  ;;  %5222 = vmatprep.mubr.msk.bf16.mxu1 %vm6179_vm0, %v8216_v0 }
  0xb4   : > { %5212 = vmatprep.subr.bf16.mxu1 %v8216_v0  ;;  %5194 = vmatprep.subr.bf16.mxu0 %v8216_v0 }
  0xb5   : > { %5151 = vmatmul.mubr.bf16.gmra.mrb[16].mxu0 %v6412_v25 }
  0xb6   : > { %5154 = vmatprep.mubr.msk.bf16.mxu0 %vm6179_vm0, %v8216_v0  ;;  %5195 = vmatpush3.bf16.msra.mxu0 %v5742_v48 }
  0xb7   : > { %5213 = vmatpush3.bf16.msra.mxu1 %v5749_v43  ;;  %5196 = vmatprep.subr.bf16.mxu0 %v8216_v0 }
  0xb8   : > { %5214 = vmatprep.subr.bf16.mxu1 %v8216_v0 }
  0xba   : > { %5197 = vmatpush3.bf16.msra.mxu0 %v5743_v50 }
  0xbb   : > { %5215 = vmatpush3.bf16.msra.mxu1 %v5750_v45  ;;  %5198 = vmatprep.subr.bf16.mxu0 %v8216_v0 }
  0xbc   : > { %5216 = vmatprep.subr.bf16.mxu1 %v8216_v0 }
  0xbd   : > { %5155 = vmatmul.mubr.bf16.gmra.mrb[20].mxu0 %v6422_v30 }
  0xbe   : > { %5158 = vmatprep.mubr.msk.bf16.mxu0 %vm6179_vm0, %v8216_v0  ;;  %5199 = vmatpush3.bf16.msra.mxu0 %v5745_v52 }
  0xbf   : > { %5217 = vmatpush3.bf16.msra.mxu1 %v5751_v47  ;;  %5200 = vmatprep.subr.bf16.mxu0 %v8216_v0 }
  0xc0   : > { %5218 = vmatprep.subr.bf16.mxu1 %v8216_v0 }
  0xc2   : > { %5201 = vmatpush3.bf16.msra.mxu0 %v5747_v53 }
  0xc3   : > { %5219 = vmatpush3.bf16.msra.mxu1 %v5752_v49 }
  0xc4   : > { %5220 = vmatprep.subr.bf16.mxu1 %v8216_v0 }
  0xc5   : > { %5159 = vmatmul.mubr.bf16.gmra.mrb[24].mxu0 %v6433_v34 }
  0xc6   : > { %5202 = vmatprep.mubr.msk.bf16.mxu0 %vm6179_vm0, %v8216_v0 }
  0xc7   : > { %5221 = vmatpush3.bf16.msra.mxu1 %v5753_v51 }
  0xca   : > { %5223 = vmatmul.mubr.bf16.vlgmr.msra.gmra.mrb[28].mxu1 %v6433_v34 }
  0xcd   : > { %5203 = vmatmul.mubr.bf16.vlgmr.msra.gmra.mrb[28].mxu0 %v6433_v34 }
 0x155   : > { %v640_v55 = vpop.f32.mrb[0].mxu1 }
 0x156   : > { %v5108_v56 = vpop.f32.mrb[1].mxu1  ;;  %v641_v58 = vadd.f32 %v6482_v54, %v640_v55 }
 0x157   : > { %v643_v57 = vpop.f32.mrb[2].mxu1 }
 0x158   : > { %v644_v59 = vadd.f32 %v6482_v54, %v643_v57  ;;  %v5109_v60 = vpop.f32.mrb[3].mxu1  ;;  %v5084_v7 = vpop.f32.mrb[0].mxu0  ;;  %v4695_v57 = vld [vmem:[%s8207_s4 + $0x3] ss:$0 sm:$0xff] }
 0x159   : > { %v494_v8 = vadd.f32 %v5084_v7, %v4615_v5  ;;  %v485_v9 = vpop.f32.mrb[1].mxu0 }
 0x15a   : > { %v679_v61 = vpack.c.bf16 %v644_v59, %v641_v58  ;;  %v486_v11 = vadd.f32 %v4615_v5, %v485_v9  ;;  %v5085_v12 = vpop.f32.mrb[2].mxu0 }
 0x15b   : > { %v518_v14 = vmul.f32 0.17677669, %v494_v8  ;;  %v497_v15 = vadd.f32 %v5085_v12, %v4615_v5  ;;  %v488_v16 = vpop.f32.mrb[3].mxu0 }
 0x15c   : > { %1215 = vxpose.xlu0.c.b16.start [1/4] (short) %v679_v61, 128  ;;  %v516_v18 = vmul.f32 0.17677669, %v486_v11  ;;  %v489_v19 = vadd.f32 %v4615_v5, %v488_v16 }
 0x15d   : > { %v648_v62 = vpop.f32.mrb[4].mxu1  ;;  %v519_v23 = vmul.f32 0.17677669, %v497_v15 }
 0x15e   : > { %v5112_v63 = vpop.f32.mrb[5].mxu1  ;;  %v649_v2 = vadd.f32 %v6482_v54, %v648_v62  ;;  %v517_v24 = vmul.f32 0.17677669, %v489_v19 }
 0x15f   : > { %v651_v1 = vpop.f32.mrb[6].mxu1  ;;  %v6493_v26 = vpack.c.bf16 %v519_v23, %v518_v14 }
 0x160   : > { %v652_v3 = vadd.f32 %v6482_v54, %v651_v1  ;;  %v5113_v4 = vpop.f32.mrb[7].mxu1  ;;  %v6495_v27 = vpack.c.bf16 %v517_v24, %v516_v18  ;;  %v5088_v28 = vpop.f32.mrb[4].mxu0 }
 0x161   : > { %v510_v29 = vadd.f32 %v5088_v28, %v4615_v5  ;;  %v501_v30 = vpop.f32.mrb[5].mxu0 }
 0x162   : > { %v680_v6 = vpack.c.bf16 %v652_v3, %v649_v2  ;;  %5230 = vmatprep.mubr.msk.bf16.mxu0 %vm1253_vm1, %v6495_v27  ;;  %v502_v32 = vadd.f32 %v4615_v5, %v501_v30  ;;  %v5089_v33 = vpop.f32.mrb[6].mxu0  ;;  %v6513_v3 = vld [vmem:[%s8207_s4 + $0x2] ss:$0 sm:$0xff] }
 0x163   : > { %v522_v35 = vmul.f32 0.17677669, %v510_v29  ;;  %v513_v36 = vadd.f32 %v5089_v33, %v4615_v5  ;;  %v504_v37 = vpop.f32.mrb[7].mxu0 }
 0x164   : > { %1216 = vxpose.xlu0.c.b16.cont [2/4] (short) %v680_v6, 128  ;;  %v520_v39 = vmul.f32 0.17677669, %v502_v32  ;;  %v505_v40 = vadd.f32 %v4615_v5, %v504_v37 }
 0x165   : > { %v656_v10 = vpop.f32.mrb[8].mxu1  ;;  %v523_v44 = vmul.f32 0.17677669, %v513_v36 }
 0x166   : > { %v5116_v13 = vpop.f32.mrb[9].mxu1  ;;  %v657_v20 = vadd.f32 %v6482_v54, %v656_v10  ;;  %v521_v45 = vmul.f32 0.17677669, %v505_v40 }
 0x167   : > { %v659_v17 = vpop.f32.mrb[10].mxu1  ;;  %v6501_v47 = vpack.c.bf16 %v523_v44, %v522_v35 }
 0x168   : > { %v660_v21 = vadd.f32 %v6482_v54, %v659_v17  ;;  %v5117_v22 = vpop.f32.mrb[11].mxu1  ;;  %v6503_v48 = vpack.c.bf16 %v521_v45, %v520_v39 }
 0x16a   : > { %v681_v25 = vpack.c.bf16 %v660_v21, %v657_v20 }
 0x16c   : > { %1217 = vxpose.xlu0.c.b16.cont [3/4] (short) %v681_v25, 128 }
 0x16d   : > { %v664_v31 = vpop.f32.mrb[12].mxu1 }
 0x16e   : > { %v5120_v34 = vpop.f32.mrb[13].mxu1  ;;  %v665_v41 = vadd.f32 %v6482_v54, %v664_v31 }
 0x16f   : > { %v667_v38 = vpop.f32.mrb[14].mxu1 }
 0x170   : > { %v668_v42 = vadd.f32 %v6482_v54, %v667_v38  ;;  %v5121_v43 = vpop.f32.mrb[15].mxu1 }
 0x172   : > { %v682_v46 = vpack.c.bf16 %v668_v42, %v665_v41 }
 0x174   : > { %1218 = vxpose.xlu0.c.b16.end [4/4] (short) %v682_v46, 128 }
 0x175   : > { %v672_v49 = vpop.f32.mrb[16].mxu1 }
 0x176   : > { %v5124_v50 = vpop.f32.mrb[17].mxu1  ;;  %v673_v52 = vadd.f32 %v6482_v54, %v672_v49  ;;  %v4745_v49 = vld [vmem:[%s8207_s4 + $0x5] ss:$0 sm:$0xff] }
 0x177   : > { %v675_v51 = vpop.f32.mrb[18].mxu1 }
 0x178   : > { %v676_v53 = vadd.f32 %v6482_v54, %v675_v51  ;;  %v5125_v55 = vpop.f32.mrb[19].mxu1  ;;  %v790_v6 = vpop.f32.mrb[8].mxu0 }
 0x179   : > { %v791_v8 = vadd.f32 %v6513_v3, %v790_v6  ;;  %v5144_v9 = vpop.f32.mrb[9].mxu0 }
 0x17a   : > { %v683_v56 = vpack.c.bf16 %v676_v53, %v673_v52  ;;  %v793_v11 = vpop.f32.mrb[10].mxu0 }
 0x17b   : > { %v794_v14 = vadd.f32 %v6513_v3, %v793_v11  ;;  %v5145_v15 = vpop.f32.mrb[11].mxu0  ;;  %v4720_v11 = vld [vmem:[%s8207_s4 + $0x4] ss:$0 sm:$0xff] }
 0x17c   : > { %1231 = vxpose.xlu1.c.b16.start.end [1/1] (short) %v683_v56, 128 }
 0x17d   : > { %v5180_v58 = vpop.f32.mrb[20].mxu1  ;;  %v6523_v20 = vpack.c.bf16 %v794_v14, %v791_v8 }
 0x17e   : > { %v949_v59 = vadd.f32 %v5180_v58, %v4695_v57  ;;  %v940_v60 = vpop.f32.mrb[21].mxu1 }
 0x17f   : > { %v941_v61 = vadd.f32 %v4695_v57, %v940_v60  ;;  %v5181_v62 = vpop.f32.mrb[22].mxu1 }
 0x180   : > { %v973_v63 = vmul.f32 0.17677669, %v949_v59  ;;  %v952_v1 = vadd.f32 %v5181_v62, %v4695_v57  ;;  %v943_v2 = vpop.f32.mrb[23].mxu1  ;;  %v798_v29 = vpop.f32.mrb[12].mxu0 }
 0x181   : > { %v971_v54 = vmul.f32 0.17677669, %v941_v61  ;;  %v944_v4 = vadd.f32 %v4695_v57, %v943_v2  ;;  %v799_v31 = vadd.f32 %v6513_v3, %v798_v29  ;;  %v5148_v32 = vpop.f32.mrb[13].mxu0 }
 0x182   : > { %v974_v5 = vmul.f32 0.17677669, %v952_v1  ;;  %v801_v34 = vpop.f32.mrb[14].mxu0 }
 0x183   : > { %v972_v7 = vmul.f32 0.17677669, %v944_v4  ;;  %v802_v36 = vadd.f32 %v6513_v3, %v801_v34  ;;  %v5149_v37 = vpop.f32.mrb[15].mxu0 }
 0x184   : > { %v6516_v10 = vpack.c.bf16 %v974_v5, %v973_v63 }
 0x185   : > { %v6518_v12 = vpack.c.bf16 %v972_v7, %v971_v54  ;;  %v5184_v13 = vpop.f32.mrb[24].mxu1  ;;  %v6531_v38 = vpack.c.bf16 %v802_v36, %v799_v31 }
 0x186   : > { %v965_v16 = vadd.f32 %v5184_v13, %v4695_v57  ;;  %v956_v17 = vpop.f32.mrb[25].mxu1 }
 0x187   : > { %5242 = vmatprep.mubr.msk.bf16.mxu1 %vm1253_vm1, %v6518_v12  ;;  %v957_v18 = vadd.f32 %v4695_v57, %v956_v17  ;;  %v5185_v19 = vpop.f32.mrb[26].mxu1 }
 0x188   : > { %v977_v21 = vmul.f32 0.17677669, %v965_v16  ;;  %v968_v22 = vadd.f32 %v5185_v19, %v4695_v57  ;;  %v959_v23 = vpop.f32.mrb[27].mxu1  ;;  %v806_v39 = vpop.f32.mrb[16].mxu0 }
 0x189   : > { %v975_v24 = vmul.f32 0.17677669, %v957_v18  ;;  %v960_v25 = vadd.f32 %v4695_v57, %v959_v23  ;;  %v807_v40 = vadd.f32 %v6513_v3, %v806_v39  ;;  %v5152_v41 = vpop.f32.mrb[17].mxu0 }
 0x18a   : > { %v978_v28 = vmul.f32 0.17677669, %v968_v22  ;;  %v809_v42 = vpop.f32.mrb[18].mxu0 }
 0x18b   : > { %v976_v30 = vmul.f32 0.17677669, %v960_v25  ;;  %v810_v43 = vadd.f32 %v6513_v3, %v809_v42  ;;  %v5153_v44 = vpop.f32.mrb[19].mxu0 }
 0x18c   : > { %v6526_v33 = vpack.c.bf16 %v978_v28, %v977_v21  ;;  %v6595_v28 = vld [vmem:[%s6592_s9] ss:$0 sm:$0xff] }
 0x18d   : > { %v6528_v35 = vpack.c.bf16 %v976_v30, %v975_v24  ;;  %v6535_v45 = vpack.c.bf16 %v810_v43, %v807_v40 }
 0x190   : > { %v814_v46 = vpop.f32.mrb[20].mxu0 }
 0x191   : > { %v815_v50 = vadd.f32 %v6513_v3, %v814_v46  ;;  %v5156_v51 = vpop.f32.mrb[21].mxu0 }
 0x192   : > { %v817_v52 = vpop.f32.mrb[22].mxu0 }
 0x193   : > { %v818_v55 = vadd.f32 %v6513_v3, %v817_v52  ;;  %v5157_v56 = vpop.f32.mrb[23].mxu0 }
 0x195   : > { %v6542_v60 = vpack.c.bf16 %v818_v55, %v815_v50 }
 0x198   : > { %v822_v2 = vpop.f32.mrb[24].mxu0 }
 0x199   : > { %v823_v54 = vadd.f32 %v6513_v3, %v822_v2  ;;  %v5160_v4 = vpop.f32.mrb[25].mxu0 }
 0x19a   : > { %v825_v6 = vpop.f32.mrb[26].mxu0 }
 0x19b   : > { %v826_v7 = vadd.f32 %v6513_v3, %v825_v6  ;;  %v5161_v8 = vpop.f32.mrb[27].mxu0 }
 0x19d   : > { %v1205_v53 = vpop.f32.mrb[28].mxu1  ;;  %v6548_v9 = vpack.c.bf16 %v826_v7, %v823_v54 }
 0x19e   : > { %v1206_v57 = vadd.f32 %v4745_v49, %v1205_v53  ;;  %v5224_v58 = vpop.f32.mrb[29].mxu1  ;;  %v6623_v53 = vld [vmem:[%s6620_s15] ss:$0 sm:$0xff] }
 0x19f   : > { %v1208_v59 = vpop.f32.mrb[30].mxu1 }
 0x1a0   : > { %v1212_v61 = vmul.f32 0.17677669, %v1206_v57  ;;  %v1209_v62 = vadd.f32 %v4745_v49, %v1208_v59  ;;  %v5225_v63 = vpop.f32.mrb[31].mxu1  ;;  %v1089_v13 = vpop.f32.mrb[28].mxu0 }
 0x1a1   : > { %v1090_v14 = vadd.f32 %v4720_v11, %v1089_v13  ;;  %v5204_v15 = vpop.f32.mrb[29].mxu0 }
 0x1a2   : > { %v1213_v1 = vmul.f32 0.17677669, %v1209_v62  ;;  %v1092_v16 = vpop.f32.mrb[30].mxu0 }
 0x1a3   : > { %v1096_v17 = vmul.f32 0.17677669, %v1090_v14  ;;  %v1093_v18 = vadd.f32 %v4720_v11, %v1092_v16  ;;  %v5205_v19 = vpop.f32.mrb[31].mxu0 }
 0x1a4   : > { %v6545_v5 = vpack.c.bf16 %v1213_v1, %v1212_v61 }
 0x1a5   : > { %v1097_v21 = vmul.f32 0.17677669, %v1093_v18 }
 0x1a7   : > { %v6553_v22 = vpack.c.bf16 %v1097_v21, %v1096_v17 }
 0x1ce   : > { %v1223_v23 = vpop.trf.xlu0 }
 0x1cf   : > { %5226 = vmatprep.subr.bf16.mxu0 %v1223_v23 }
 0x1d0   : > { %5227 = vmatpush3.bf16.msra.mxu0 %v1223_v23 }
 0x1d2   : > { %v1224_v3 = vpop.trf.xlu0 }
 0x1d3   : > { %5228 = vmatprep.subr.bf16.mxu0 %v1224_v3 }
 0x1d4   : > { %5229 = vmatpush3.bf16.msra.mxu0 %v1224_v3 }
 0x1d5   : > { %5250 = vmatprep.subr.bf16.mxu0 %v8216_v0 }
 0x1d7   : > { %5231 = vmatmul.mubr.msk.bf16.vlgmr.msra.gmra.mrb[32].mxu0 %vm1253_vm1, %v6493_v26 }
 0x1d8   : > { %5234 = vmatprep.mubr.msk.bf16.mxu0 %vm1253_vm1, %v6503_v48  ;;  %5251 = vmatpush3.bf16.msra.mxu0 %v1223_v23 }
 0x1d9   : > { %5252 = vmatprep.subr.bf16.mxu0 %v8216_v0 }
 0x1dc   : > { %5253 = vmatpush3.bf16.msra.mxu0 %v1224_v3 }
 0x1dd   : > { %5266 = vmatprep.subr.bf16.mxu0 %v6548_v9 }
 0x1df   : > { %5235 = vmatmul.mubr.msk.bf16.gmra.mrb[36].mxu0 %vm1253_vm1, %v6501_v47 }
 0x1e0   : > { %5254 = vmatprep.mubr.msk.bf16.mxu0 %vm6179_vm0, %v8216_v0 }
 0x1e2   : > { %v1239_v24 = vpop.trf.xlu1 }
 0x1e3   : > { %5238 = vmatprep.subr.bf16.mxu1 %v1239_v24 }
 0x1e4   : > { %5239 = vmatpush3.bf16.msra.mxu1 %v1239_v24 }
 0x1e6   : > { %v1240_v25 = vpop.trf.xlu1 }
 0x1e7   : > { %5240 = vmatprep.subr.bf16.mxu1 %v1240_v25  ;;  %5255 = vmatmul.mubr.msk.bf16.vlgmr.msra.gmra.mrb[40].mxu0 %vm1253_vm1, %v6553_v22 }
 0x1e8   : > { %5267 = vmatpush3.bf16.msra.mxu0 %v6548_v9  ;;  %5241 = vmatpush3.bf16.msra.mxu1 %v1240_v25 }
 0x1e9   : > { %5276 = vmatprep.subr.bf16.mxu0 %v6523_v20  ;;  %5258 = vmatprep.subr.bf16.mxu1 %v8216_v0 }
 0x1eb   : > { %5243 = vmatmul.mubr.msk.bf16.vlgmr.msra.gmra.mrb[32].mxu1 %vm1253_vm1, %v6516_v10 }
 0x1ec   : > { %5259 = vmatpush3.bf16.msra.mxu1 %v1239_v24  ;;  %5246 = vmatprep.mubr.msk.bf16.mxu1 %vm1253_vm1, %v6528_v35 }
 0x1ed   : > { %5260 = vmatprep.subr.bf16.mxu1 %v8216_v0 }
 0x1f0   : > { %5261 = vmatpush3.bf16.msra.mxu1 %v1240_v25 }
 0x1f1   : > { %5292 = vmatprep.subr.bf16.mxu1 %v8216_v0 }
 0x1f3   : > { %5247 = vmatmul.mubr.msk.bf16.gmra.mrb[36].mxu1 %vm1253_vm1, %v6526_v33 }
 0x1f4   : > { %5262 = vmatprep.mubr.msk.bf16.mxu1 %vm6179_vm0, %v8216_v0 }
 0x1fb   : > { %5263 = vmatmul.mubr.msk.bf16.vlgmr.msra.gmra.mrb[40].mxu1 %vm1253_vm1, %v6545_v5 }
 0x1fc   : > { %5293 = vmatpush3.bf16.msra.mxu1 %v6548_v9  ;;  %5294 = vmatprep.mubr.msk.bf16.mxu1 %vm6179_vm0, %v8216_v0 }
 0x1fd   : > { %5298 = vmatprep.subr.bf16.mxu1 %v8216_v0 }
 0x2aa   : > { %v5232_v29 = vpop.f32.mrb[32].mxu0 }
 0x2ab   : > { %v6598_v30 = vadd.f32 %v5232_v29, %v6595_v28  ;;  %v1300_v31 = vpop.f32.mrb[33].mxu0 }
 0x2ac   : > { %v6601_v32 = vadd.f32 %v6595_v28, %v1300_v31  ;;  %v5233_v34 = vpop.f32.mrb[34].mxu0 }
 0x2ad   : > { %v1303_v36 = vpop.f32.mrb[35].mxu0  ;;  %v1509_v37 = vsel %vm1502_vm2, %v6598_v30, -inf  ;;  %v6606_v39 = vadd.f32 %v5233_v34, %v6595_v28 }
 0x2ae   : > { %v6609_v40 = vadd.f32 %v6595_v28, %v1303_v36  ;;  %1510 = vmax.xlane.f32.xlu0 %v1509_v37  ;;  %v1503_v41 = vsel %vm1502_vm2, %v6601_v32, -inf }
 0x2af   : > { %1504 = vmax.xlane.f32.xlu1 %v1503_v41  ;;  %v1512_v44 = vsel %vm1502_vm2, %v6606_v39, -inf }
 0x2b0   : > { %v1506_v42 = vsel %vm1502_vm2, %v6609_v40, -inf }
 0x2b2   : > { %v5236_v43 = vpop.f32.mrb[36].mxu0  ;;  %1507 = vmax.xlane.f32.xlu0 %v1506_v42 }
 0x2b3   : > { %v1316_v46 = vpop.f32.mrb[37].mxu0  ;;  %1513 = vmax.xlane.f32.xlu1 %v1512_v44  ;;  %v6629_v62 = vadd.f32 %v5236_v43, %v6595_v28 }
 0x2b4   : > { %v5237_v49 = vpop.f32.mrb[38].mxu0  ;;  %v6652_v16 = vadd.f32 %v6595_v28, %v1316_v46 }
 0x2b5   : > { %v1319_v50 = vpop.f32.mrb[39].mxu0  ;;  %v6637_v54 = vadd.f32 %v5237_v49, %v6595_v28  ;;  %v1521_v7 = vsel %vm1502_vm2, %v6629_v62, -inf }
 0x2b6   : > { %v6657_v19 = vadd.f32 %v6595_v28, %v1319_v50  ;;  %v1515_v3 = vsel %vm1502_vm2, %v6652_v16, -inf }
 0x2b7   : > { %v1524_v14 = vsel %vm1502_vm2, %v6637_v54, -inf }
 0x2b8   : > { %v1518_v29 = vsel %vm1502_vm2, %v6657_v19, -inf }
 0x2ba   : > { %v1451_v51 = vpop.f32.mrb[40].mxu0 }
 0x2bb   : > { %v5256_v52 = vpop.f32.mrb[41].mxu0  ;;  %v6672_v36 = vadd.f32 %v6595_v28, %v1451_v51 }
 0x2bc   : > { %v1454_v55 = vpop.f32.mrb[42].mxu0 }
 0x2bd   : > { %v5257_v56 = vpop.f32.mrb[43].mxu0  ;;  %v6677_v42 = vadd.f32 %v6595_v28, %v1454_v55  ;;  %v1842_v46 = vsel %vm1502_vm2, %v6672_v36, -inf }
 0x2be   : > { %v5244_v57 = vpop.f32.mrb[32].mxu1 }
 0x2bf   : > { %v6626_v58 = vadd.f32 %v5244_v57, %v6623_v53  ;;  %v1383_v59 = vpop.f32.mrb[33].mxu1  ;;  %v1845_v51 = vsel %vm1502_vm2, %v6677_v42, -inf }
 0x2c0   : > { %v5245_v61 = vpop.f32.mrb[34].mxu1  ;;  %v6642_v6 = vadd.f32 %v6623_v53, %v1383_v59 }
 0x2c1   : > { %v6632_v63 = vadd.f32 %v5245_v61, %v6623_v53  ;;  %v1386_v1 = vpop.f32.mrb[35].mxu1  ;;  %v1534_v2 = vsel %vm1527_vm3, %v6626_v58, -inf  ;;  %v6725_v61 = vpop.trf.xlu0 }
 0x2c2   : > { %1535 = vmax.xlane.f32.xlu0 %v1534_v2  ;;  %v6647_v11 = vadd.f32 %v6623_v53, %v1386_v1  ;;  %v1528_v18 = vsel %vm1527_vm3, %v6642_v6, -inf  ;;  %v6727_v1 = vpop.trf.xlu1 }
 0x2c3   : > { %v1537_v4 = vsel %vm1527_vm3, %v6632_v63, -inf }
 0x2c4   : > { %1538 = vmax.xlane.f32.xlu1 %v1537_v4  ;;  %v1531_v21 = vsel %vm1527_vm3, %v6647_v11, -inf }
 0x2c5   : > { %v6729_v2 = vpop.trf.xlu0 }
 0x2c6   : > { %1522 = vmax.xlane.f32.xlu0 %v1521_v7  ;;  %v5248_v8 = vpop.f32.mrb[36].mxu1  ;;  %v6731_v4 = vpop.trf.xlu1 }
 0x2c7   : > { %v1399_v13 = vpop.f32.mrb[37].mxu1  ;;  %v6662_v23 = vadd.f32 %v5248_v8, %v6623_v53 }
 0x2c8   : > { %1525 = vmax.xlane.f32.xlu1 %v1524_v14  ;;  %v5249_v15 = vpop.f32.mrb[38].mxu1  ;;  %v6682_v44 = vadd.f32 %v6623_v53, %v1399_v13 }
 0x2c9   : > { %v1402_v17 = vpop.f32.mrb[39].mxu1  ;;  %v6667_v25 = vadd.f32 %v5249_v15, %v6623_v53  ;;  %v1546_v37 = vsel %vm1527_vm3, %v6662_v23, -inf  ;;  %v6733_v7 = vpop.trf.xlu0 }
 0x2ca   : > { %1529 = vmax.xlane.f32.xlu0 %v1528_v18  ;;  %v6687_v49 = vadd.f32 %v6623_v53, %v1402_v17  ;;  %v1540_v52 = vsel %vm1527_vm3, %v6682_v44, -inf  ;;  %8270 = vst [vmem:[#allocation14_spill] sm:$0xff] %v6733_v7  ;;  %v6735_v8 = vpop.trf.xlu1 }
 0x2cb   : > { %v1549_v43 = vsel %vm1527_vm3, %v6667_v25, -inf }
 0x2cc   : > { %1532 = vmax.xlane.f32.xlu1 %v1531_v21  ;;  %v1543_v56 = vsel %vm1527_vm3, %v6687_v49, -inf }
 0x2cd   : > { %v6737_v13 = vpop.trf.xlu0 }
 0x2ce   : > { %1516 = vmax.xlane.f32.xlu0 %v1515_v3  ;;  %v1495_v24 = vpop.f32.mrb[40].mxu1  ;;  %8271 = vst [vmem:[#allocation15_spill] sm:$0xff] %v6737_v13  ;;  %v6739_v14 = vpop.trf.xlu1 }
 0x2cf   : > { %v5264_v31 = vpop.f32.mrb[41].mxu1  ;;  %v6690_v50 = vadd.f32 %v6623_v53, %v1495_v24 }
 0x2d0   : > { %1519 = vmax.xlane.f32.xlu1 %v1518_v29  ;;  %v1498_v34 = vpop.f32.mrb[42].mxu1 }
 0x2d1   : > { %v5265_v41 = vpop.f32.mrb[43].mxu1  ;;  %v6697_v55 = vadd.f32 %v6623_v53, %v1498_v34  ;;  %v1848_v57 = vsel %vm1527_vm3, %v6690_v50, -inf  ;;  %v6741_v15 = vpop.trf.xlu0 }
 0x2d2   : > { %1547 = vmax.xlane.f32.xlu0 %v1546_v37  ;;  %8272 = vst [vmem:[#allocation16_spill] sm:$0xff] %v6741_v15  ;;  %v6743_v17 = vpop.trf.xlu1 }
 0x2d3   : > { %v1851_v59 = vsel %vm1527_vm3, %v6697_v55, -inf  ;;  %8273 = vst [vmem:[#allocation17_spill] sm:$0xff] %v6743_v17 }
 0x2d4   : > { %1550 = vmax.xlane.f32.xlu1 %v1549_v43 }
 0x2d5   : > { %v6745_v18 = vpop.trf.xlu0 }
 0x2d6   : > { %1843 = vmax.xlane.f32.xlu0 %v1842_v46  ;;  %8274 = vst [vmem:[#allocation18_spill] sm:$0xff] %v6745_v18  ;;  %v6747_v21 = vpop.trf.xlu1 }
 0x2d7   : > { %8275 = vst [vmem:[#allocation19_spill] sm:$0xff] %v6747_v21 }
 0x2d8   : > { %1846 = vmax.xlane.f32.xlu1 %v1845_v51 }
 0x2da   : > { %1541 = vmax.xlane.f32.xlu0 %v1540_v52 }
 0x2dc   : > { %1544 = vmax.xlane.f32.xlu1 %v1543_v56 }
 0x2de   : > { %1849 = vmax.xlane.f32.xlu0 %v1848_v57 }
 0x2e0   : > { %1852 = vmax.xlane.f32.xlu1 %v1851_v59 }
 0x2f1   : > { %2069 = vrot.lane.b32.xlu1 %v6518_v12, %s6180_s16 }
 0x2f4   : > { %1980 = vrot.lane.b32.xlu0 %v6495_v27, %s6180_s16 }
 0x2f5   : > { %1982 = vrot.lane.b32.xlu1 %v6493_v26, %s6180_s16 }
 0x2f8   : > { %1984 = vrot.lane.b32.xlu0 %v6503_v48, %s6180_s16 }
 0x2f9   : > { %2071 = vrot.lane.b32.xlu1 %v6516_v10, %s6180_s16 }
 0x2fc   : > { %1986 = vrot.lane.b32.xlu0 %v6501_v47, %s6180_s16 }
 0x2fd   : > { %2073 = vrot.lane.b32.xlu1 %v6528_v35, %s6180_s16 }
 0x300   : > { %2155 = vrot.lane.b32.xlu0 %v6553_v22, %s6180_s16 }
 0x301   : > { %2075 = vrot.lane.b32.xlu1 %v6526_v33, %s6180_s16 }
 0x305   : > { %2202 = vrot.lane.b32.xlu1 %v6545_v5, %s6180_s16 }
 0x33b   : > { %v1511_v3 = vpop.xlane.xlu0 %1510 }
 0x33c   : > { %v1505_v24 = vpop.xlane.xlu1 %1504 }
 0x33f   : > { %v1508_v29 = vpop.xlane.xlu0 %1507 }
 0x340   : > { %v1514_v31 = vpop.xlane.xlu1 %1513 }
 0x34f   : > { %v1536_v34 = vpop.xlane.xlu0 %1535 }
 0x350   : > { %v6751_v51 = vmax.f32 %v1511_v3, %v1536_v34 }
 0x351   : > { %v1539_v37 = vpop.xlane.xlu1 %1538 }
 0x352   : > { %v6749_v43 = vmax.f32 %v1514_v31, %v1539_v37  ;;  %v1586_v15 = vsub.f32 %v6626_v58, %v6751_v51 }
 0x353   : > { %v1523_v41 = vpop.xlane.xlu0 %1522 }
 0x354   : > { %v1587_v56 = vsub.f32 %v6632_v63, %v6749_v43  ;;  %v1596_v34 = vmul.f32 1.442695, %v1586_v15 }
 0x355   : > { %v1526_v46 = vpop.xlane.xlu1 %1525 }
 0x356   : > { %v1598_v17 = vmul.f32 1.442695, %v1587_v56 }
 0x357   : > { %v1530_v52 = vpop.xlane.xlu0 %1529 }
 0x358   : > { %v1552_v57 = vmax.f32 %v1505_v24, %v1530_v52  ;;  %5754 = vpow2.f32 %v1598_v17 }
 0x359   : > { %v1533_v59 = vpop.xlane.xlu1 %1532 }
 0x35a   : > { %v1584_v0 = vsub.f32 %v6642_v6, %v1552_v57  ;;  %v1553_v18 = vmax.f32 %v1508_v29, %v1533_v59 }
 0x35b   : > { %v1517_v21 = vpop.xlane.xlu0 %1516 }
 0x35c   : > { %v1585_v31 = vsub.f32 %v6647_v11, %v1553_v18  ;;  %v1592_v13 = vmul.f32 1.442695, %v1584_v0  ;;  %v1561_v29 = vsub.f32 %v6609_v40, %v1553_v18  ;;  %v1560_v40 = vsub.f32 %v6601_v32, %v1552_v57 }
 0x35d   : > { %v1520_v37 = vpop.xlane.xlu1 %1519 }
 0x35e   : > { %v1594_v3 = vmul.f32 1.442695, %v1585_v31  ;;  %v1570_v15 = vmul.f32 1.442695, %v1561_v29  ;;  %v1568_v57 = vmul.f32 1.442695, %v1560_v40 }
 0x35f   : > { %v1548_v7 = vpop.xlane.xlu0 %1547 }
 0x360   : > { %5756 = vpow2.f32 %v1594_v3  ;;  %v6762_v52 = vmax.f32 %v1523_v41, %v1548_v7 }
 0x361   : > { %v1551_v63 = vpop.xlane.xlu1 %1550  ;;  %5758 = vpow2.f32 %v1592_v13 }
 0x362   : > { %5760 = vpow2.f32 %v1596_v34  ;;  %v6759_v24 = vmax.f32 %v1526_v46, %v1551_v63  ;;  %v6766_v17 = vpop.eup %5754  ;;  %v1590_v13 = vsub.f32 %v6662_v23, %v6762_v52 }
 0x363   : > { %v1844_v6 = vpop.xlane.xlu0 %1843  ;;  %8276 = vst [vmem:[#allocation20_spill] sm:$0xff] %v6766_v17  ;;  %5762 = vpow2.f32 %v1570_v15 }
 0x364   : > { %v1591_v11 = vsub.f32 %v6667_v25, %v6759_v24 }
 0x365   : > { %v1847_v58 = vpop.xlane.xlu1 %1846 }
 0x366   : > { %v1606_v7 = vmul.f32 1.442695, %v1591_v11 }
 0x367   : > { %v1542_v0 = vpop.xlane.xlu0 %1541 }
 0x368   : > { %v1556_v56 = vmax.f32 %v1517_v21, %v1542_v0  ;;  %5764 = vpow2.f32 %v1606_v7 }
 0x369   : > { %v1545_v59 = vpop.xlane.xlu1 %1544 }
 0x36a   : > { %v1588_v46 = vsub.f32 %v6682_v44, %v1556_v56  ;;  %v1557_v31 = vmax.f32 %v1520_v37, %v1545_v59  ;;  %v6771_v3 = vpop.eup %5756  ;;  %v1604_v37 = vmul.f32 1.442695, %v1590_v13 }
 0x36b   : > { %8277 = vst [vmem:[#allocation21_spill] sm:$0xff] %v6771_v3  ;;  %v1850_v18 = vpop.xlane.xlu0 %1849  ;;  %v6774_v41 = vpop.eup %5758 }
 0x36c   : > { %8278 = vst [vmem:[#allocation22_spill] sm:$0xff] %v6774_v41  ;;  %v1600_v25 = vmul.f32 1.442695, %v1588_v46  ;;  %v1589_v21 = vsub.f32 %v6687_v49, %v1557_v31  ;;  %v6777_v34 = vpop.eup %5760  ;;  %v6779_v63 = vmax.f32 %v1844_v6, %v1850_v18  ;;  %v1676_v23 = vpack.c.bf16 %v6771_v3, %v6774_v41 }
 0x36d   : > { %8279 = vst [vmem:[#allocation23_spill] sm:$0xff] %v6777_v34  ;;  %v1853_v44 = vpop.xlane.xlu1 %1852  ;;  %v1677_v32 = vpack.c.bf16 %v6766_v17, %v6777_v34  ;;  %v1563_v6 = vsub.f32 %v6606_v39, %v6749_v43  ;;  %v1564_v43 = vsub.f32 %v6652_v16, %v1556_v56  ;;  %v1566_v56 = vsub.f32 %v6629_v62, %v6762_v52 }
 0x36e   : > { %v1602_v29 = vmul.f32 1.442695, %v1589_v21  ;;  %v1855_v0 = vmax.f32 %v1847_v58, %v1853_v44  ;;  %v1862_v49 = vsub.f32 %v6690_v50, %v6779_v63  ;;  %5268 = vmatprep.mubr.msk.bf16.mxu0 %vm1527_vm3, %v1676_v23  ;;  %5766 = vpow2.f32 %v1600_v25 }
 0x36f   : > { %5269 = vmatmul.mubr.msk.bf16.vlgmr.msra.gmra.mrb[44].mxu0 %vm1527_vm3, %v1677_v32  ;;  %v1562_v58 = vsub.f32 %v6598_v30, %v6751_v51  ;;  %v1565_v50 = vsub.f32 %v6657_v19, %v1557_v31  ;;  %v1574_v39 = vmul.f32 1.442695, %v1563_v6  ;;  %v6800_v30 = vpop.eup %5762  ;;  %v1567_v19 = vsub.f32 %v6637_v54, %v6759_v24 }
 0x370   : > { %v1863_v11 = vsub.f32 %v6697_v55, %v1855_v0  ;;  %5768 = vpow2.f32 %v1602_v29  ;;  %v1864_v15 = vmul.f32 1.442695, %v1862_v49  ;;  %5277 = vmatpush3.bf16.msra.mxu0 %v6523_v20  ;;  %v1576_v51 = vmul.f32 1.442695, %v1564_v43 }
 0x371   : > { %5770 = vpow2.f32 %v1604_v37  ;;  %5278 = vmatprep.subr.bf16.mxu0 %v6531_v38  ;;  %v1572_v55 = vmul.f32 1.442695, %v1562_v58  ;;  %v1578_v13 = vmul.f32 1.442695, %v1565_v50  ;;  %v1582_v7 = vmul.f32 1.442695, %v1567_v19  ;;  %v2070_v6 = vpop.permute.xlu1 %2069  ;;  %v1981_v19 = vpop.permute.xlu0 %1980 }
 0x372   : > { %v1866_v59 = vmul.f32 1.442695, %v1863_v11  ;;  %5772 = vpow2.f32 %v1568_v57  ;;  %v6804_v46 = vpop.eup %5764  ;;  %v1857_v54 = vsub.f32 %v6677_v42, %v1855_v0  ;;  %v1580_v52 = vmul.f32 1.442695, %v1566_v56 }
 0x373   : > { %5774 = vpow2.f32 %v1864_v15  ;;  %8280 = vst [vmem:[#allocation24_spill] sm:$0xff] %v6804_v46  ;;  %v1856_v25 = vsub.f32 %v6672_v36, %v6779_v63  ;;  %v8287_v32 = vmov 0.0  }
 0x374   : > { %5279 = vmatpush3.bf16.msra.mxu0 %v6531_v38  ;;  %5776 = vpow2.f32 %v1866_v59  ;;  %v1860_v44 = vmul.f32 1.442695, %v1857_v54 }
 0x375   : > { %5280 = vmatprep.subr.bf16.mxu0 %v6535_v45  ;;  %5778 = vpow2.f32 %v1574_v39  ;;  %v1858_v37 = vmul.f32 1.442695, %v1856_v25  ;;  %v1983_v50 = vpop.permute.xlu1 %1982  ;;  %v1985_v56 = vpop.permute.xlu0 %1984 }
 0x376   : > { %5780 = vpow2.f32 %v1572_v55 }
 0x377   : > { %5782 = vpow2.f32 %v1578_v13 }
 0x378   : > { %5281 = vmatpush3.bf16.msra.mxu0 %v6535_v45  ;;  %v6807_v16 = vpop.eup %5766  ;;  %5784 = vpow2.f32 %v1576_v51 }
 0x379   : > { %8281 = vst [vmem:[#allocation25_spill] sm:$0xff] %v6807_v16  ;;  %5282 = vmatprep.subr.bf16.mxu0 %v6542_v60  ;;  %5786 = vpow2.f32 %v1582_v7  ;;  %v2072_v13 = vpop.permute.xlu1 %2071 }
 0x37a   : > { %v6812_v31 = vpop.eup %5768  ;;  %5788 = vpow2.f32 %v1580_v52 }
 0x37b   : > { %8282 = vst [vmem:[#allocation26_spill] sm:$0xff] %v6812_v31  ;;  %v6814_v40 = vpop.eup %5770  ;;  %v1678_v24 = vpack.c.bf16 %v6812_v31, %v6807_v16  ;;  %5790 = vpow2.f32 %v1860_v44 }
 0x37c   : > { %8283 = vst [vmem:[#allocation27_spill] sm:$0xff] %v6814_v40  ;;  %v6819_v18 = vpop.eup %5772  ;;  %5283 = vmatpush3.bf16.msra.mxu0 %v6542_v60  ;;  %v1679_v62 = vpack.c.bf16 %v6804_v46, %v6814_v40  ;;  %5792 = vpow2.f32 %v1858_v37 }
 0x37d   : > { %8284 = vst [vmem:[#allocation28_spill] sm:$0xff] %v6819_v18  ;;  %5322 = vmatprep.subr.bf16.mxu0 %v6727_v1  ;;  %5272 = vmatprep.mubr.msk.bf16.mxu0 %vm1527_vm3, %v1678_v24  ;;  %v1672_v42 = vpack.c.bf16 %v6800_v30, %v6819_v18  ;;  %v6830_v21 = vpop.eup %5774  ;;  %v2074_v51 = vpop.permute.xlu1 %2073 }
 0x37e   : > { %8285 = vst [vmem:[#allocation29_spill] sm:$0xff] %v6830_v21  ;;  %5273 = vmatmul.mubr.msk.bf16.gmra.mrb[48].mxu0 %vm1527_vm3, %v1679_v62  ;;  %v6833_v23 = vpop.eup %5776 }
 0x37f   : > { %8286 = vst [vmem:[#allocation30_spill] sm:$0xff] %v6833_v23  ;;  %5284 = vmatprep.mubr.msk.bf16.mxu0 %vm1502_vm2, %v1672_v42  ;;  %v1885_v36 = vpack.c.bf16 %v6833_v23, %v6830_v21  ;;  %v6838_v63 = vpop.eup %5778 }
 0x380   : > { %v6840_v29 = vpop.eup %5780 }
 0x381   : > { %5295 = vmatmul.mubr.msk.bf16.vlgmr.msra.gmra.mrb[44].mxu1 %vm1527_vm3, %v1885_v36  ;;  %v6843_v0 = vpop.eup %5782  ;;  %v1673_v57 = vpack.c.bf16 %v6838_v63, %v6840_v29  ;;  %v2076_v7 = vpop.permute.xlu1 %2075 }
 0x382   : > { %5299 = vmatpush3.bf16.msra.mxu1 %v6523_v20  ;;  %5306 = vmatprep.mubr.msk.bf16.mxu1 %vm6179_vm0, %v8287_v32  ;;  %v6851_v49 = vpop.eup %5784 }
 0x383   : > { %5300 = vmatprep.subr.bf16.mxu1 %v8287_v32  ;;  %8288 = vst [vmem:[#allocation31_spill] sm:$0xff] %v6851_v49  ;;  %v1674_v11 = vpack.c.bf16 %v6843_v0, %v6851_v49  ;;  %v6860_v58 = vpop.eup %5786 }
 0x384   : > { %v6863_v15 = vpop.eup %5788 }
 0x385   : > { %8289 = vst [vmem:[#allocation32_spill] sm:$0xff] %v6863_v15  ;;  %v1675_v59 = vpack.c.bf16 %v6860_v58, %v6863_v15  ;;  %v6871_v39 = vpop.eup %5790 }
 0x386   : > { %5285 = vmatmul.mubr.msk.bf16.vlgmr.msra.gmra.mrb[44].mxu0 %vm1502_vm2, %v1673_v57  ;;  %5301 = vmatpush3.bf16.msra.mxu1 %v6531_v38  ;;  %8290 = vst [vmem:[#allocation33_spill] sm:$0xff] %v6871_v39  ;;  %v6874_v43 = vpop.eup %5792 }
 0x387   : > { %5323 = vmatpush3.bf16.msra.mxu0 %v6727_v1  ;;  %5288 = vmatprep.mubr.msk.bf16.mxu0 %vm1502_vm2, %v1674_v11  ;;  %8291 = vst [vmem:[#allocation34_spill] sm:$0xff] %v6874_v43  ;;  %v1884_v55 = vpack.c.bf16 %v6871_v39, %v6874_v43 }
 0x388   : > { %5324 = vmatprep.subr.bf16.mxu0 %v6731_v4  ;;  %5302 = vmatprep.subr.bf16.mxu1 %v8287_v32 }
 0x38a   : > { %5303 = vmatpush3.bf16.msra.mxu1 %v6535_v45 }
 0x38b   : > { %5325 = vmatpush3.bf16.msra.mxu0 %v6731_v4  ;;  %5304 = vmatprep.subr.bf16.mxu1 %v8287_v32 }
 0x38c   : > { %5342 = vmatprep.subr.bf16.mxu0 %v8287_v32 }
 0x38e   : > { %5289 = vmatmul.mubr.msk.bf16.gmra.mrb[48].mxu0 %vm1502_vm2, %v1675_v59  ;;  %5305 = vmatpush3.bf16.msra.mxu1 %v6542_v60 }
 0x38f   : > { %5326 = vmatprep.mubr.msk.bf16.mxu0 %vm1253_vm1, %v2070_v6  ;;  %5310 = vmatprep.subr.bf16.mxu1 %v6725_v61 }
 0x391   : > { %5307 = vmatmul.mubr.msk.bf16.vlgmr.msra.gmra.mrb[44].mxu1 %vm1502_vm2, %v1884_v55 }
 0x392   : > { %5311 = vmatpush3.bf16.msra.mxu1 %v6725_v61  ;;  %5314 = vmatprep.mubr.msk.bf16.mxu1 %vm1253_vm1, %v1981_v19 }
 0x393   : > { %5312 = vmatprep.subr.bf16.mxu1 %v6729_v2 }
 0x396   : > { %5327 = vmatmul.mubr.msk.bf16.vlgmr.msra.gmra.mrb[52].mxu0 %vm1253_vm1, %v2072_v13  ;;  %5313 = vmatpush3.bf16.msra.mxu1 %v6729_v2 }
 0x397   : > { %5343 = vmatpush3.bf16.msra.mxu0 %v6727_v1  ;;  %5330 = vmatprep.mubr.msk.bf16.mxu0 %vm1253_vm1, %v2074_v51  ;;  %v1987_v1 = vpop.permute.xlu0 %1986 }
 0x398   : > { %5334 = vmatprep.subr.bf16.mxu1 %v8287_v32  ;;  %5344 = vmatprep.subr.bf16.mxu0 %v8287_v32 }
 0x399   : > { %5315 = vmatmul.mubr.msk.bf16.vlgmr.msra.gmra.mrb[48].mxu1 %vm1253_vm1, %v1983_v50 }
 0x39a   : > { %5318 = vmatprep.mubr.msk.bf16.mxu1 %vm1253_vm1, %v1985_v56  ;;  %5335 = vmatpush3.bf16.msra.mxu1 %v6725_v61  ;;  %v2203_v61 = vpop.permute.xlu1 %2202 }
 0x39b   : > { %5345 = vmatpush3.bf16.msra.mxu0 %v6731_v4  ;;  %5336 = vmatprep.subr.bf16.mxu1 %v8287_v32  ;;  %v2156_v4 = vpop.permute.xlu0 %2155 }
 0x39c   : > { %5376 = vmatprep.subr.bf16.mxu0 %v8287_v32 }
 0x39e   : > { %5331 = vmatmul.mubr.msk.bf16.gmra.mrb[56].mxu0 %vm1253_vm1, %v2076_v7  ;;  %5337 = vmatpush3.bf16.msra.mxu1 %v6729_v2 }
 0x39f   : > { %5346 = vmatprep.mubr.msk.bf16.mxu0 %vm6179_vm0, %v8287_v32 }
 0x3a1   : > { %5319 = vmatmul.mubr.msk.bf16.gmra.mrb[52].mxu1 %vm1253_vm1, %v1987_v1 }
 0x3a2   : > { %5338 = vmatprep.mubr.msk.bf16.mxu1 %vm6179_vm0, %v8287_v32 }
 0x3a6   : > { %5347 = vmatmul.mubr.msk.bf16.vlgmr.msra.gmra.mrb[60].mxu0 %vm1253_vm1, %v2203_v61 }
 0x3a7   : > { %5378 = vmatprep.mubr.msk.bf16.mxu0 %vm6179_vm0, %v8287_v32 }
 0x3a9   : > { %5339 = vmatmul.mubr.msk.bf16.vlgmr.msra.gmra.mrb[56].mxu1 %vm1253_vm1, %v2156_v4 }
 0x459   : > { %v6908_v54 = vpop.f32.mrb[44].mxu0 }
 0x45a   : > { %8292 = vst [vmem:[#allocation35_spill] sm:$0xff] %v6908_v54  ;;  %v6910_v2 = vpop.f32.mrb[45].mxu0 }
 0x45b   : > { %8293 = vst [vmem:[#allocation36_spill] sm:$0xff] %v6910_v2  ;;  %v6912_v24 = vpop.f32.mrb[46].mxu0 }
 0x45c   : > { %8294 = vst [vmem:[#allocation37_spill] sm:$0xff] %v6912_v24  ;;  %v6914_v62 = vpop.f32.mrb[47].mxu0 }
 0x45d   : > { %8295 = vst [vmem:[#allocation38_spill] sm:$0xff] %v6914_v62 }
 0x461   : > { %v6916_v52 = vpop.f32.mrb[48].mxu0 }
 0x462   : > { %8296 = vst [vmem:[#allocation39_spill] sm:$0xff] %v6916_v52  ;;  %v6918_v25 = vpop.f32.mrb[49].mxu0 }
 0x463   : > { %8297 = vst [vmem:[#allocation40_spill] sm:$0xff] %v6918_v25  ;;  %v6920_v42 = vpop.f32.mrb[50].mxu0 }
 0x464   : > { %8298 = vst [vmem:[#allocation41_spill] sm:$0xff] %v6920_v42  ;;  %v6922_v44 = vpop.f32.mrb[51].mxu0  ;;  %v6924_v36 = vpop.f32.mrb[44].mxu1 }
 0x465   : > { %8299 = vst [vmem:[#allocation42_spill] sm:$0xff] %v6922_v44  ;;  %8300 = vst [vmem:[#allocation43_spill] sm:$0xff] %v6924_v36  ;;  %v5308_v37 = vpop.f32.mrb[45].mxu1 }
 0x466   : > { %v6926_v57 = vpop.f32.mrb[46].mxu1 }
 0x467   : > { %8301 = vst [vmem:[#allocation44_spill] sm:$0xff] %v6926_v57  ;;  %v5309_v6 = vpop.f32.mrb[47].mxu1 }
 0x469   : > { %v5328_v11 = vpop.f32.mrb[52].mxu0 }
 0x46a   : > { %v6929_v50 = vadd.f32 %v5328_v11, %v6623_v53  ;;  %v2123_v59 = vpop.f32.mrb[53].mxu0 }
 0x46b   : > { %v5329_v55 = vpop.f32.mrb[54].mxu0  ;;  %v6932_v13 = vadd.f32 %v6623_v53, %v2123_v59 }
 0x46c   : > { %v6935_v19 = vadd.f32 %v5329_v55, %v6623_v53  ;;  %v2126_v51 = vpop.f32.mrb[55].mxu0  ;;  %v2278_v56 = vsel %vm1527_vm3, %v6929_v50, -inf  ;;  %v5316_v7 = vpop.f32.mrb[48].mxu1 }
 0x46d   : > { %2279 = vmax.xlane.f32.xlu0 %v2278_v56  ;;  %v2034_v1 = vpop.f32.mrb[49].mxu1  ;;  %v6942_v37 = vadd.f32 %v6623_v53, %v2126_v51  ;;  %v2272_v59 = vsel %vm1527_vm3, %v6932_v13, -inf  ;;  %v6955_v51 = vadd.f32 %v5316_v7, %v6595_v28 }
 0x46e   : > { %v2281_v61 = vsel %vm1527_vm3, %v6935_v19, -inf  ;;  %v5317_v4 = vpop.f32.mrb[50].mxu1 }
 0x46f   : > { %2282 = vmax.xlane.f32.xlu1 %v2281_v61  ;;  %v6945_v6 = vadd.f32 %v5317_v4, %v6595_v28  ;;  %v2037_v11 = vpop.f32.mrb[51].mxu1  ;;  %v2275_v2 = vsel %vm1527_vm3, %v6942_v37, -inf  ;;  %v2254_v57 = vsel %vm1502_vm2, %v6955_v51, -inf }
 0x470   : > { %v6950_v56 = vadd.f32 %v6595_v28, %v2037_v11 }
 0x471   : > { %2273 = vmax.xlane.f32.xlu0 %v2272_v59  ;;  %v5332_v55 = vpop.f32.mrb[56].mxu0  ;;  %v2257_v62 = vsel %vm1502_vm2, %v6945_v6, -inf }
 0x472   : > { %v2139_v25 = vpop.f32.mrb[57].mxu0  ;;  %v2251_v36 = vsel %vm1502_vm2, %v6950_v56, -inf }
 0x473   : > { %2258 = vmax.xlane.f32.xlu1 %v2257_v62  ;;  %v5333_v61 = vpop.f32.mrb[58].mxu0  ;;  %v6965_v62 = vadd.f32 %v6595_v28, %v2034_v1 }
 0x474   : > { %v2142_v4 = vpop.f32.mrb[59].mxu0  ;;  %v5320_v54 = vpop.f32.mrb[52].mxu1  ;;  %v6960_v59 = vadd.f32 %v5333_v61, %v6623_v53 }
 0x475   : > { %2276 = vmax.xlane.f32.xlu0 %v2275_v2  ;;  %v2050_v11 = vpop.f32.mrb[53].mxu1  ;;  %v6970_v2 = vadd.f32 %v6623_v53, %v2142_v4  ;;  %v2248_v21 = vsel %vm1502_vm2, %v6965_v62, -inf }
 0x476   : > { %v5321_v52 = vpop.f32.mrb[54].mxu1  ;;  %v2293_v44 = vsel %vm1527_vm3, %v6960_v59, -inf }
 0x477   : > { %2252 = vmax.xlane.f32.xlu1 %v2251_v36  ;;  %v2053_v7 = vpop.f32.mrb[55].mxu1  ;;  %v6975_v36 = vadd.f32 %v5332_v55, %v6623_v53 }
 0x478   : > { %v6990_v16 = vadd.f32 %v6595_v28, %v2053_v7  ;;  %v7005_v7 = vadd.f32 %v6595_v28, %v2050_v11 }
 0x479   : > { %2255 = vmax.xlane.f32.xlu0 %v2254_v57  ;;  %v2241_v42 = vpop.f32.mrb[60].mxu0  ;;  %v6980_v57 = vadd.f32 %v5321_v52, %v6595_v28  ;;  %v6995_v52 = vadd.f32 %v5320_v54, %v6595_v28 }
 0x47a   : > { %v5348_v61 = vpop.f32.mrb[61].mxu0 }
 0x47b   : > { %2294 = vmax.xlane.f32.xlu1 %v2293_v44  ;;  %v2244_v24 = vpop.f32.mrb[62].mxu0  ;;  %v2287_v61 = vsel %vm1527_vm3, %v6970_v2, -inf  ;;  %v6985_v44 = vadd.f32 %v6623_v53, %v2139_v25 }
 0x47c   : > { %v5349_v1 = vpop.f32.mrb[63].mxu0  ;;  %v2194_v43 = vpop.f32.mrb[56].mxu1  ;;  %v7000_v25 = vadd.f32 %v6623_v53, %v2244_v24  ;;  %v2260_v24 = vsel %vm1502_vm2, %v7005_v7, -inf }
 0x47d   : > { %2249 = vmax.xlane.f32.xlu0 %v2248_v21  ;;  %v5340_v4 = vpop.f32.mrb[57].mxu1  ;;  %v2290_v1 = vsel %vm1527_vm3, %v6975_v36, -inf  ;;  %v2269_v21 = vsel %vm1502_vm2, %v6980_v57, -inf }
 0x47e   : > { %v2197_v40 = vpop.f32.mrb[58].mxu1  ;;  %v2284_v4 = vsel %vm1527_vm3, %v6985_v44, -inf  ;;  %v2615_v54 = vsel %vm1527_vm3, %v7000_v25, -inf }
 0x47f   : > { %2288 = vmax.xlane.f32.xlu1 %v2287_v61  ;;  %v5341_v55 = vpop.f32.mrb[59].mxu1  ;;  %v2263_v61 = vsel %vm1502_vm2, %v6990_v16, -inf }
 0x480   : > { %v2266_v55 = vsel %vm1502_vm2, %v6995_v52, -inf }
 0x481   : > { %2291 = vmax.xlane.f32.xlu0 %v2290_v1  ;;  %v7012_v1 = vadd.f32 %v6623_v53, %v2241_v42  ;;  %v7038_v53 = vadd.f32 %v6595_v28, %v2197_v40 }
 0x483   : > { %2270 = vmax.xlane.f32.xlu1 %v2269_v21  ;;  %v7017_v21 = vadd.f32 %v6595_v28, %v2194_v43  ;;  %v2612_v11 = vsel %vm1527_vm3, %v7012_v1, -inf  ;;  %v2609_v43 = vsel %vm1502_vm2, %v7038_v53, -inf }
 0x485   : > { %2285 = vmax.xlane.f32.xlu0 %v2284_v4  ;;  %v2606_v4 = vsel %vm1502_vm2, %v7017_v21, -inf }
 0x487   : > { %2264 = vmax.xlane.f32.xlu1 %v2263_v61 }
 0x489   : > { %2267 = vmax.xlane.f32.xlu0 %v2266_v55 }
 0x48b   : > { %2616 = vmax.xlane.f32.xlu1 %v2615_v54 }
 0x48d   : > { %2261 = vmax.xlane.f32.xlu0 %v2260_v24 }
 0x491   : > { %2613 = vmax.xlane.f32.xlu0 %v2612_v11 }
 0x495   : > { %2607 = vmax.xlane.f32.xlu0 %v2606_v4 }
 0x49c   : > { %2509 = vrot.lane.b32.xlu1 %v6523_v20, %s6180_s16 }
 0x4a0   : > { %2511 = vrot.lane.b32.xlu1 %v6531_v38, %s6180_s16 }
 0x4ab   : > { %2425 = vrot.lane.b32.xlu0 %v6548_v9, %s6180_s16 }
 0x4af   : > { %2515 = vrot.lane.b32.xlu0 %v6542_v60, %s6180_s16 }
 0x4b3   : > { %2825 = vrot.lane.b32.xlu0 %v6518_v12, %s6181_s27 }
 0x4b7   : > { %2827 = vrot.lane.b32.xlu0 %v6516_v10, %s6181_s27 }
 0x4bb   : > { %2829 = vrot.lane.b32.xlu0 %v6528_v35, %s6181_s27 }
 0x4bf   : > { %2831 = vrot.lane.b32.xlu0 %v6526_v33, %s6181_s27 }
 0x4c3   : > { %2956 = vrot.lane.b32.xlu0 %v6545_v5, %s6181_s27 }
 0x4c4   : > { %2610 = vmax.xlane.f32.xlu1 %v2609_v43 }
 0x4d5   : > { %2513 = vrot.lane.b32.xlu1 %v6535_v45, %s6180_s16 }
 0x4d9   : > { %2740 = vrot.lane.b32.xlu1 %v6495_v27, %s6181_s27 }
 0x4dd   : > { %2742 = vrot.lane.b32.xlu1 %v6493_v26, %s6181_s27 }
 0x4e1   : > { %2744 = vrot.lane.b32.xlu1 %v6503_v48, %s6181_s27 }
 0x4e5   : > { %2746 = vrot.lane.b32.xlu1 %v6501_v47, %s6181_s27 }
 0x4e9   : > { %2910 = vrot.lane.b32.xlu1 %v6553_v22, %s6181_s27 }
 0x4ed   : > { %3178 = vrot.lane.b32.xlu1 %v6548_v9, %s6181_s27 }
 0x4fa   : > { %v2280_v28 = vpop.xlane.xlu0 %2279 }
 0x4fc   : > { %v2283_v40 = vpop.xlane.xlu1 %2282 }
 0x4fe   : > { %v2274_v42 = vpop.xlane.xlu0 %2273 }
 0x500   : > { %v2259_v61 = vpop.xlane.xlu1 %2258 }
 0x501   : > { %v7064_v17 = vmax.f32 %v2259_v61, %v2283_v40 }
 0x502   : > { %v2277_v55 = vpop.xlane.xlu0 %2276 }
 0x504   : > { %v2253_v54 = vpop.xlane.xlu1 %2252 }
 0x505   : > { %v2297_v24 = vmax.f32 %v2253_v54, %v2277_v55 }
 0x506   : > { %v2256_v11 = vpop.xlane.xlu0 %2255 }
 0x507   : > { %v2329_v43 = vsub.f32 %v6942_v37, %v2297_v24  ;;  %v7062_v46 = vmax.f32 %v2256_v11, %v2280_v28 }
 0x508   : > { %v2295_v4 = vpop.xlane.xlu1 %2294 }
 0x509   : > { %v2338_v49 = vmul.f32 1.442695, %v2329_v43  ;;  %v2330_v54 = vsub.f32 %v6929_v50, %v7062_v46 }
 0x50a   : > { %v2250_v34 = vpop.xlane.xlu0 %2249 }
 0x50b   : > { %v2296_v41 = vmax.f32 %v2250_v34, %v2274_v42  ;;  %5794 = vpow2.f32 %v2338_v49  ;;  %v2331_v34 = vsub.f32 %v6935_v19, %v7064_v17  ;;  %v2340_v42 = vmul.f32 1.442695, %v2330_v54 }
 0x50c   : > { %v2289_v15 = vpop.xlane.xlu1 %2288 }
 0x50d   : > { %v2328_v18 = vsub.f32 %v6932_v13, %v2296_v41  ;;  %v2342_v28 = vmul.f32 1.442695, %v2331_v34  ;;  %v2304_v19 = vsub.f32 %v6965_v62, %v2296_v41 }
 0x50e   : > { %v2292_v23 = vpop.xlane.xlu0 %2291 }
 0x50f   : > { %v2336_v39 = vmul.f32 1.442695, %v2328_v18  ;;  %v2312_v34 = vmul.f32 1.442695, %v2304_v19 }
 0x510   : > { %v2271_v31 = vpop.xlane.xlu1 %2270 }
 0x511   : > { %5796 = vpow2.f32 %v2336_v39  ;;  %v7076_v40 = vmax.f32 %v2271_v31, %v2295_v4 }
 0x512   : > { %v2286_v55 = vpop.xlane.xlu0 %2285  ;;  %5798 = vpow2.f32 %v2340_v42 }
 0x513   : > { %5800 = vpow2.f32 %v2342_v28  ;;  %v2335_v31 = vsub.f32 %v6960_v59, %v7076_v40 }
 0x514   : > { %v2265_v37 = vpop.xlane.xlu1 %2264 }
 0x515   : > { %v7068_v3 = vmax.f32 %v2265_v37, %v2289_v15  ;;  %v7078_v61 = vpop.eup %5794  ;;  %v2350_v41 = vmul.f32 1.442695, %v2335_v31 }
 0x516   : > { %v2268_v13 = vpop.xlane.xlu0 %2267 }
 0x517   : > { %v7072_v18 = vmax.f32 %v2268_v13, %v2292_v23  ;;  %v2333_v49 = vsub.f32 %v6970_v2, %v7068_v3 }
 0x519   : > { %v2334_v15 = vsub.f32 %v6975_v36, %v7072_v18  ;;  %v2346_v23 = vmul.f32 1.442695, %v2333_v49  ;;  %v2617_v36 = vpop.xlane.xlu1 %2616 }
 0x51a   : > { %v2262_v39 = vpop.xlane.xlu0 %2261 }
 0x51b   : > { %v2300_v50 = vmax.f32 %v2262_v39, %v2286_v55  ;;  %v7080_v11 = vpop.eup %5796  ;;  %v2305_v55 = vsub.f32 %v6950_v56, %v2297_v24  ;;  %v2348_v37 = vmul.f32 1.442695, %v2334_v15  ;;  %5802 = vpow2.f32 %v2346_v23 }
 0x51c   : > { %8302 = vst [vmem:[#allocation45_spill] sm:$0xff] %v7080_v11  ;;  %v2420_v2 = vpack.c.bf16 %v7078_v61, %v7080_v11  ;;  %v7092_v13 = vpop.eup %5798 }
 0x51d   : > { %v2332_v43 = vsub.f32 %v6985_v44, %v2300_v50  ;;  %v2314_v44 = vmul.f32 1.442695, %v2305_v55  ;;  %8303 = vst [vmem:[#allocation46_spill] sm:$0xff] %v7092_v13  ;;  %v7094_v59 = vpop.permute.xlu1 %2509  ;;  %v7096_v56 = vpop.eup %5800 }
 0x51e   : > { %v2614_v4 = vpop.xlane.xlu0 %2613  ;;  %5352 = vmatprep.mubr.msk.bf16.mxu1 %vm1527_vm3, %v2420_v2  ;;  %v2421_v24 = vpack.c.bf16 %v7096_v56, %v7092_v13 }
 0x51f   : > { %v2344_v54 = vmul.f32 1.442695, %v2332_v43 }
 0x521   : > { %5804 = vpow2.f32 %v2344_v54  ;;  %v7107_v39 = vpop.permute.xlu1 %2511  ;;  %v2306_v54 = vsub.f32 %v6955_v51, %v7062_v46  ;;  %v2310_v46 = vsub.f32 %v6995_v52, %v7072_v18 }
 0x522   : > { %v2608_v62 = vpop.xlane.xlu0 %2607  ;;  %5806 = vpow2.f32 %v2348_v37  ;;  %v2308_v37 = vsub.f32 %v7005_v7, %v2300_v50 }
 0x523   : > { %5808 = vpow2.f32 %v2312_v34  ;;  %v2307_v34 = vsub.f32 %v6945_v6, %v7064_v17 }
 0x524   : > { %5810 = vpow2.f32 %v2350_v41  ;;  %v2309_v41 = vsub.f32 %v6990_v16, %v7068_v3  ;;  %v2324_v16 = vmul.f32 1.442695, %v2310_v46 }
 0x525   : > { %5812 = vpow2.f32 %v2314_v44  ;;  %v7102_v49 = vpop.eup %5802  ;;  %v2316_v44 = vmul.f32 1.442695, %v2306_v54 }
 0x526   : > { %v2426_v42 = vpop.permute.xlu0 %2425 }
 0x527   : > { %5350 = vmatprep.subr.bf16.mxu1 %v2426_v42  ;;  %5377 = vmatpush3.bf16.msra.mxu0 %v2426_v42  ;;  %5814 = vpow2.f32 %v2316_v44 }
 0x528   : > { %5351 = vmatpush3.bf16.msra.mxu1 %v2426_v42  ;;  %5382 = vmatprep.subr.bf16.mxu0 %v8287_v32  ;;  %v2320_v42 = vmul.f32 1.442695, %v2308_v37 }
 0x529   : > { %5360 = vmatprep.subr.bf16.mxu1 %v7094_v59 }
 0x52a   : > { %5816 = vpow2.f32 %v2320_v42 }
 0x52b   : > { %5353 = vmatmul.mubr.msk.bf16.vlgmr.msra.gmra.mrb[60].mxu1 %vm1527_vm3, %v2421_v24  ;;  %v7105_v28 = vpop.eup %5804  ;;  %v2618_v24 = vmax.f32 %v2608_v62, %v2614_v4 }
 0x52c   : > { %8304 = vst [vmem:[#allocation47_spill] sm:$0xff] %v7105_v28  ;;  %5361 = vmatpush3.bf16.msra.mxu1 %v7094_v59  ;;  %v2422_v15 = vpack.c.bf16 %v7102_v49, %v7105_v28  ;;  %v7113_v19 = vpop.eup %5806 }
 0x52d   : > { %5362 = vmatprep.subr.bf16.mxu1 %v7107_v39  ;;  %8305 = vst [vmem:[#allocation48_spill] sm:$0xff] %v7113_v19  ;;  %v7115_v23 = vpop.eup %5808  ;;  %v2626_v51 = vsub.f32 %v7012_v1, %v2618_v24  ;;  %v2620_v37 = vsub.f32 %v7017_v21, %v2618_v24 }
 0x52e   : > { %5356 = vmatprep.mubr.msk.bf16.mxu1 %vm1527_vm3, %v2422_v15  ;;  %v7118_v43 = vpop.eup %5810  ;;  %v2318_v15 = vmul.f32 1.442695, %v2307_v34 }
 0x52f   : > { %v7121_v2 = vpop.eup %5812  ;;  %v2423_v31 = vpack.c.bf16 %v7118_v43, %v7113_v19  ;;  %v2322_v19 = vmul.f32 1.442695, %v2309_v41  ;;  %v2628_v7 = vmul.f32 1.442695, %v2626_v51  ;;  %v2622_v46 = vmul.f32 1.442695, %v2620_v37 }
 0x530   : > { %5363 = vmatpush3.bf16.msra.mxu1 %v7107_v39  ;;  %v2416_v55 = vpack.c.bf16 %v7121_v2, %v7115_v23  ;;  %5818 = vpow2.f32 %v2318_v15 }
 0x531   : > { %5820 = vpow2.f32 %v2322_v19  ;;  %v7142_v52 = vpop.eup %5814 }
 0x533   : > { %5357 = vmatmul.mubr.msk.bf16.gmra.mrb[64].mxu1 %vm1527_vm3, %v2423_v31  ;;  %v2311_v31 = vsub.f32 %v6980_v57, %v7076_v40  ;;  %v2516_v40 = vpop.permute.xlu0 %2515 }
 0x534   : > { %5368 = vmatprep.mubr.msk.bf16.mxu1 %vm1502_vm2, %v2416_v55  ;;  %v7144_v1 = vpop.eup %5816 }
 0x535   : > { %v2326_v6 = vmul.f32 1.442695, %v2311_v31  ;;  %8306 = vst [vmem:[#allocation49_spill] sm:$0xff] %v7144_v1 }
 0x537   : > { %5822 = vpow2.f32 %v2326_v6  ;;  %v2826_v42 = vpop.permute.xlu0 %2825 }
 0x538   : > { %5824 = vpow2.f32 %v2324_v16 }
 0x539   : > { %5826 = vpow2.f32 %v2628_v7  ;;  %v8311_v7 = vld [vmem:[#allocation15_spill] sm:$0xff] }
 0x53a   : > { %v7146_v18 = vpop.eup %5818 }
 0x53b   : > { %v2828_v24 = vpop.permute.xlu0 %2827 }
 0x551   : > { %v2611_v17 = vpop.xlane.xlu1 %2610 }
 0x552   : > { %v2619_v3 = vmax.f32 %v2611_v17, %v2617_v36  ;;  %v7148_v36 = vpop.eup %5820  ;;  %v2830_v17 = vpop.permute.xlu0 %2829 }
 0x553   : > { %v2418_v62 = vpack.c.bf16 %v7148_v36, %v7144_v1  ;;  %v7159_v55 = vpop.eup %5822 }
 0x554   : > { %v2627_v50 = vsub.f32 %v7000_v25, %v2619_v3  ;;  %v2417_v25 = vpack.c.bf16 %v7146_v18, %v7142_v52  ;;  %v2621_v19 = vsub.f32 %v7038_v53, %v2619_v3  ;;  %v7162_v54 = vpop.eup %5824  ;;  %v8310_v3 = vld [vmem:[#allocation14_spill] sm:$0xff] }
 0x555   : > { %v2514_v4 = vpop.permute.xlu1 %2513  ;;  %8307 = vst [vmem:[#allocation50_spill] sm:$0xff] %v7162_v54  ;;  %v7165_v41 = vpop.eup %5826  ;;  %v2419_v31 = vpack.c.bf16 %v7159_v55, %v7162_v54 }
 0x556   : > { %v2630_v57 = vmul.f32 1.442695, %v2627_v50  ;;  %5364 = vmatprep.subr.bf16.mxu1 %v2514_v4  ;;  %8308 = vst [vmem:[#allocation51_spill] sm:$0xff] %v7165_v41  ;;  %v2624_v15 = vmul.f32 1.442695, %v2621_v19 }
 0x557   : > { %5365 = vmatpush3.bf16.msra.mxu1 %v2514_v4 }
 0x558   : > { %5366 = vmatprep.subr.bf16.mxu1 %v2516_v40  ;;  %5828 = vpow2.f32 %v2630_v57 }
 0x559   : > { %v2741_v34 = vpop.permute.xlu1 %2740  ;;  %5830 = vpow2.f32 %v2624_v15 }
 0x55a   : > { %5832 = vpow2.f32 %v2622_v46 }
 0x55b   : > { %5367 = vmatpush3.bf16.msra.mxu1 %v2516_v40 }
 0x55c   : > { %5406 = vmatprep.subr.bf16.mxu1 %v6735_v8 }
 0x55d   : > { %v2743_v21 = vpop.permute.xlu1 %2742 }
 0x55e   : > { %5369 = vmatmul.mubr.msk.bf16.vlgmr.msra.gmra.mrb[60].mxu1 %vm1502_vm2, %v2417_v25 }
 0x55f   : > { %5372 = vmatprep.mubr.msk.bf16.mxu1 %vm1502_vm2, %v2418_v62  ;;  %5407 = vmatpush3.bf16.msra.mxu1 %v6735_v8 }
 0x560   : > { %5408 = vmatprep.subr.bf16.mxu1 %v6739_v14 }
 0x561   : > { %v2745_v51 = vpop.permute.xlu1 %2744 }
 0x562   : > { %v7167_v44 = vpop.eup %5828 }
 0x563   : > { %5409 = vmatpush3.bf16.msra.mxu1 %v6739_v14  ;;  %v2649_v53 = vpack.c.bf16 %v7167_v44, %v7165_v41 }
 0x564   : > { %5426 = vmatprep.subr.bf16.mxu1 %v8287_v32 }
 0x565   : > { %5379 = vmatmul.mubr.msk.bf16.vlgmr.msra.gmra.mrb[64].mxu0 %vm1527_vm3, %v2649_v53  ;;  %v7237_v53 = vld [vmem:[%s6620_s15] ss:$0 sm:$0xff]  ;;  %s6054_s15 = scalar_lea.vmem %s8086_s28, 1024 }
 0x566   : > { %5373 = vmatmul.mubr.msk.bf16.gmra.mrb[64].mxu1 %vm1502_vm2, %v2419_v31  ;;  %5383 = vmatpush3.bf16.msra.mxu0 %v7094_v59  ;;  %v7188_v59 = vpop.eup %5830  ;;  %p6055_p6 = scmp.ne.s32.totalorder %s8086_s28, %s6054_s15 }
 0x567   : > { %5410 = vmatprep.mubr.msk.bf16.mxu1 %vm1253_vm1, %v2826_v42  ;;  %5384 = vmatprep.subr.bf16.mxu0 %v8287_v32  ;;  %v7191_v6 = vpop.eup %5832 }
 0x568   : > { %5390 = vmatprep.mubr.msk.bf16.mxu0 %vm6179_vm0, %v8287_v32  ;;  %8309 = vst [vmem:[#allocation52_spill] sm:$0xff] %v7191_v6  ;;  %v2648_v16 = vpack.c.bf16 %v7188_v59, %v7191_v6  ;;  %p6056_p8 = pnand %p6055_p6, %p6317_p10 }
 0x56a   : > { %5385 = vmatpush3.bf16.msra.mxu0 %v7107_v39  ;;  %v2747_v39 = vpop.permute.xlu1 %2746  ;;  %p6057_p12 = pneg %p6056_p8 }
 0x56b   : > { %5386 = vmatprep.subr.bf16.mxu0 %v8287_v32 }
 0x56e   : > { %5411 = vmatmul.mubr.msk.bf16.vlgmr.msra.gmra.mrb[68].mxu1 %vm1253_vm1, %v2828_v24  ;;  %5387 = vmatpush3.bf16.msra.mxu0 %v2514_v4 }
 0x56f   : > { %5427 = vmatpush3.bf16.msra.mxu1 %v6735_v8  ;;  %5414 = vmatprep.mubr.msk.bf16.mxu1 %vm1253_vm1, %v2830_v17  ;;  %v2832_v8 = vpop.permute.xlu0 %2831 }
 0x570   : > { %5388 = vmatprep.subr.bf16.mxu0 %v8287_v32  ;;  %5428 = vmatprep.subr.bf16.mxu1 %v8287_v32 }
 0x572   : > { %5389 = vmatpush3.bf16.msra.mxu0 %v2516_v40 }
 0x573   : > { %5429 = vmatpush3.bf16.msra.mxu1 %v6739_v14  ;;  %5394 = vmatprep.subr.bf16.mxu0 %v8310_v3  ;;  %v2911_v14 = vpop.permute.xlu1 %2910  ;;  %v2957_v50 = vpop.permute.xlu0 %2956 }
 0x574   : > { %5460 = vmatprep.subr.bf16.mxu1 %v8287_v32 }
 0x575   : > { %5391 = vmatmul.mubr.msk.bf16.vlgmr.msra.gmra.mrb[64].mxu0 %vm1502_vm2, %v2648_v16 }
 0x576   : > { %5415 = vmatmul.mubr.msk.bf16.gmra.mrb[72].mxu1 %vm1253_vm1, %v2832_v8  ;;  %5395 = vmatpush3.bf16.msra.mxu0 %v8310_v3 }
 0x577   : > { %5398 = vmatprep.mubr.msk.bf16.mxu0 %vm1253_vm1, %v2741_v34  ;;  %5396 = vmatprep.subr.bf16.mxu0 %v8311_v7  ;;  %v3179_v4 = vpop.permute.xlu1 %3178 }
 0x578   : > { %5430 = vmatprep.mubr.msk.bf16.mxu1 %vm6179_vm0, %v8287_v32 }
 0x57a   : > { %5397 = vmatpush3.bf16.msra.mxu0 %v8311_v7 }
 0x57b   : > { %5418 = vmatprep.subr.bf16.mxu0 %v8287_v32 }
 0x57d   : > { %5399 = vmatmul.mubr.msk.bf16.vlgmr.msra.gmra.mrb[68].mxu0 %vm1253_vm1, %v2743_v21 }
 0x57e   : > { %5431 = vmatmul.mubr.msk.bf16.vlgmr.msra.gmra.mrb[76].mxu1 %vm1253_vm1, %v2957_v50  ;;  %5402 = vmatprep.mubr.msk.bf16.mxu0 %vm1253_vm1, %v2745_v51 }
 0x57f   : > { %5419 = vmatpush3.bf16.msra.mxu0 %v8310_v3  ;;  %5461 = vmatpush3.bf16.msra.mxu1 %v3179_v4 }
 0x580   : > { %5420 = vmatprep.subr.bf16.mxu0 %v8287_v32  ;;  %5462 = vmatprep.mubr.msk.bf16.mxu1 %vm6179_vm0, %v8287_v32 }
 0x581   : > { %5466 = vmatprep.subr.bf16.mxu1 %v8287_v32 }
 0x583   : > { %5421 = vmatpush3.bf16.msra.mxu0 %v8311_v7 }
 0x584   : > { %5434 = vmatprep.subr.bf16.mxu0 %v3179_v4 }
 0x585   : > { %5403 = vmatmul.mubr.msk.bf16.gmra.mrb[72].mxu0 %vm1253_vm1, %v2747_v39 }
 0x586   : > { %5422 = vmatprep.mubr.msk.bf16.mxu0 %vm6179_vm0, %v8287_v32 }
 0x58d   : > { %5423 = vmatmul.mubr.msk.bf16.vlgmr.msra.gmra.mrb[76].mxu0 %vm1253_vm1, %v2911_v14 }
 0x58e   : > { %5435 = vmatpush3.bf16.msra.mxu0 %v3179_v4 }
 0x631   : > { %v7220_v57 = vpop.f32.mrb[60].mxu1 }
 0x632   : > { %8312 = vst [vmem:[#allocation14_spill] sm:$0xff] %v7220_v57  ;;  %v7222_v40 = vpop.f32.mrb[61].mxu1 }
 0x633   : > { %8313 = vst [vmem:[#allocation15_spill] sm:$0xff] %v7222_v40  ;;  %v7224_v25 = vpop.f32.mrb[62].mxu1 }
 0x634   : > { %8314 = vst [vmem:[#allocation53_spill] sm:$0xff] %v7224_v25  ;;  %v7226_v62 = vpop.f32.mrb[63].mxu1 }
 0x635   : > { %8315 = vst [vmem:[#allocation54_spill] sm:$0xff] %v7226_v62 }
 0x639   : > { %v7228_v19 = vpop.f32.mrb[64].mxu1 }
 0x63a   : > { %8316 = vst [vmem:[#allocation55_spill] sm:$0xff] %v7228_v19  ;;  %v7230_v37 = vpop.f32.mrb[65].mxu1 }
 0x63b   : > { %8317 = vst [vmem:[#allocation56_spill] sm:$0xff] %v7230_v37  ;;  %v7232_v34 = vpop.f32.mrb[66].mxu1  ;;  %v7264_v37 = vld [vmem:[%s6592_s9] ss:$0 sm:$0xff]  ;;  %s8096_s9 = scalar_lea.hbm %s8208_s5, %s4844_s19 }
 0x63c   : > { %8318 = vst [vmem:[#allocation57_spill] sm:$0xff] %v7232_v34  ;;  %v7234_v42 = vpop.f32.mrb[67].mxu1 }
 0x63d   : > { %8319 = vst [vmem:[#allocation58_spill] sm:$0xff] %v7234_v42 }
 0x641   : > { %v5412_v15 = vpop.f32.mrb[68].mxu1 }
 0x642   : > { %v7240_v31 = vadd.f32 %v7237_v53, %v5412_v15  ;;  %v2879_v46 = vpop.f32.mrb[69].mxu1 }
 0x643   : > { %v7243_v21 = vadd.f32 %v7237_v53, %v2879_v46  ;;  %v5413_v24 = vpop.f32.mrb[70].mxu1 }
 0x644   : > { %v2882_v51 = vpop.f32.mrb[71].mxu1  ;;  %v3032_v17 = vsel %vm1527_vm3, %v7240_v31, -inf  ;;  %v7248_v39 = vadd.f32 %v7237_v53, %v5413_v24 }
 0x645   : > { %3033 = vmax.xlane.f32.xlu1 %v3032_v17  ;;  %v3026_v3 = vsel %vm1527_vm3, %v7243_v21, -inf  ;;  %v7253_v16 = vadd.f32 %v7237_v53, %v2882_v51 }
 0x646   : > { %3027 = vmax.xlane.f32.xlu0 %v3026_v3  ;;  %v3035_v14 = vsel %vm1527_vm3, %v7248_v39, -inf }
 0x647   : > { %v3029_v3 = vsel %vm1527_vm3, %v7253_v16, -inf }
 0x648   : > { %v7255_v8 = vpop.f32.mrb[64].mxu0 }
 0x649   : > { %8320 = vst [vmem:[#allocation59_spill] sm:$0xff] %v7255_v8  ;;  %v5416_v7 = vpop.f32.mrb[72].mxu1  ;;  %v5392_v50 = vpop.f32.mrb[65].mxu0 }
 0x64a   : > { %v2895_v4 = vpop.f32.mrb[73].mxu1  ;;  %3036 = vmax.xlane.f32.xlu0 %v3035_v14  ;;  %v7259_v15 = vpop.f32.mrb[66].mxu0 }
 0x64b   : > { %8321 = vst [vmem:[#allocation60_spill] sm:$0xff] %v7259_v15  ;;  %v5417_v46 = vpop.f32.mrb[74].mxu1  ;;  %v5393_v24 = vpop.f32.mrb[67].mxu0  ;;  %v7293_v41 = vadd.f32 %v7237_v53, %v2895_v4 }
 0x64c   : > { %v2898_v17 = vpop.f32.mrb[75].mxu1  ;;  %v7288_v62 = vadd.f32 %v7237_v53, %v5417_v46 }
 0x64e   : > { %3030 = vmax.xlane.f32.xlu0 %v3029_v3  ;;  %v3047_v46 = vsel %vm1527_vm3, %v7288_v62, -inf }
 0x650   : > { %v5400_v51 = vpop.f32.mrb[68].mxu0 }
 0x651   : > { %v2995_v19 = vpop.f32.mrb[76].mxu1  ;;  %v7267_v8 = vadd.f32 %v7264_v37, %v5400_v51  ;;  %v2794_v25 = vpop.f32.mrb[69].mxu0 }
 0x652   : > { %v5432_v50 = vpop.f32.mrb[77].mxu1  ;;  %v5401_v57 = vpop.f32.mrb[70].mxu0  ;;  %v7270_v15 = vadd.f32 %v7264_v37, %v2794_v25 }
 0x653   : > { %v2998_v14 = vpop.f32.mrb[78].mxu1  ;;  %v7273_v24 = vadd.f32 %v7264_v37, %v5401_v57  ;;  %v2797_v40 = vpop.f32.mrb[71].mxu0  ;;  %v3008_v3 = vsel %vm1502_vm2, %v7267_v8, -inf  ;;  %v7283_v50 = vadd.f32 %v7237_v53, %v5416_v7 }
 0x654   : > { %v5433_v34 = vpop.f32.mrb[79].mxu1  ;;  %3009 = vmax.xlane.f32.xlu1 %v3008_v3  ;;  %v7278_v42 = vadd.f32 %v7264_v37, %v2797_v40  ;;  %v3002_v57 = vsel %vm1502_vm2, %v7270_v15, -inf }
 0x655   : > { %v3011_v51 = vsel %vm1502_vm2, %v7273_v24, -inf  ;;  %v3044_v7 = vsel %vm1527_vm3, %v7283_v50, -inf }
 0x656   : > { %3012 = vmax.xlane.f32.xlu0 %v3011_v51  ;;  %v3005_v40 = vsel %vm1502_vm2, %v7278_v42, -inf }
 0x658   : > { %3003 = vmax.xlane.f32.xlu1 %v3002_v57  ;;  %v5404_v25 = vpop.f32.mrb[72].mxu0  ;;  %v7298_v57 = vadd.f32 %v7237_v53, %v2898_v17 }
 0x659   : > { %v2810_v34 = vpop.f32.mrb[73].mxu0  ;;  %v7303_v6 = vadd.f32 %v7264_v37, %v5404_v25 }
 0x65a   : > { %3006 = vmax.xlane.f32.xlu0 %v3005_v40  ;;  %v5405_v3 = vpop.f32.mrb[74].mxu0  ;;  %v3038_v40 = vsel %vm1527_vm3, %v7293_v41, -inf  ;;  %v3041_v17 = vsel %vm1527_vm3, %v7298_v57, -inf  ;;  %v7313_v11 = vadd.f32 %v7264_v37, %v2810_v34  ;;  %v7328_v34 = vadd.f32 %v7237_v53, %v2998_v14 }
 0x65b   : > { %v2813_v51 = vpop.f32.mrb[75].mxu0  ;;  %v7308_v28 = vadd.f32 %v7264_v37, %v5405_v3  ;;  %v3020_v25 = vsel %vm1502_vm2, %v7303_v6, -inf }
 0x65c   : > { %3045 = vmax.xlane.f32.xlu1 %v3044_v7 }
 0x65d   : > { %v3023_v3 = vsel %vm1502_vm2, %v7308_v28, -inf }
 0x65e   : > { %3048 = vmax.xlane.f32.xlu0 %v3047_v46 }
 0x660   : > { %3039 = vmax.xlane.f32.xlu1 %v3038_v40  ;;  %v2949_v4 = vpop.f32.mrb[76].mxu0  ;;  %v7318_v40 = vadd.f32 %v7264_v37, %v2813_v51 }
 0x661   : > { %v5424_v13 = vpop.f32.mrb[77].mxu0  ;;  %v7333_v51 = vadd.f32 %v7264_v37, %v2949_v4 }
 0x662   : > { %3042 = vmax.xlane.f32.xlu0 %v3041_v17  ;;  %v2952_v7 = vpop.f32.mrb[78].mxu0  ;;  %v7323_v13 = vadd.f32 %v7237_v53, %v2995_v19  ;;  %v3014_v17 = vsel %vm1502_vm2, %v7313_v11, -inf }
 0x663   : > { %v5425_v46 = vpop.f32.mrb[79].mxu0  ;;  %v7338_v19 = vadd.f32 %v7264_v37, %v2952_v7  ;;  %v3355_v14 = vsel %vm1502_vm2, %v7333_v51, -inf }
 0x664   : > { %3021 = vmax.xlane.f32.xlu1 %v3020_v25  ;;  %v3017_v46 = vsel %vm1502_vm2, %v7318_v40, -inf  ;;  %v3361_v25 = vsel %vm1527_vm3, %v7323_v13, -inf }
 0x666   : > { %3024 = vmax.xlane.f32.xlu0 %v3023_v3  ;;  %v3364_v3 = vsel %vm1527_vm3, %v7328_v34, -inf }
 0x668   : > { %3015 = vmax.xlane.f32.xlu1 %v3014_v17  ;;  %v3358_v17 = vsel %vm1502_vm2, %v7338_v19, -inf }
 0x66a   : > { %3018 = vmax.xlane.f32.xlu0 %v3017_v46 }
 0x66c   : > { %3362 = vmax.xlane.f32.xlu1 %v3361_v25 }
 0x66e   : > { %3365 = vmax.xlane.f32.xlu0 %v3364_v3 }
 0x670   : > { %3356 = vmax.xlane.f32.xlu1 %v3355_v14 }
 0x672   : > { %3359 = vmax.xlane.f32.xlu0 %v3358_v17 }
 0x681   : > { %3260 = vrot.lane.b32.xlu1 %v6531_v38, %s6181_s27 }
 0x685   : > { %3262 = vrot.lane.b32.xlu1 %v6535_v45, %s6181_s27 }
 0x688   : > { %3258 = vrot.lane.b32.xlu0 %v6523_v20, %s6181_s27 }
 0x689   : > { %3264 = vrot.lane.b32.xlu1 %v6542_v60, %s6181_s27 }
 0x68c   : > { %3489 = vrot.lane.b32.xlu0 %v6495_v27, %s6182_s12 }
 0x68d   : > { %3574 = vrot.lane.b32.xlu1 %v6518_v12, %s6182_s12 }
 0x690   : > { %3491 = vrot.lane.b32.xlu0 %v6493_v26, %s6182_s12 }
 0x691   : > { %3576 = vrot.lane.b32.xlu1 %v6516_v10, %s6182_s12 }
 0x694   : > { %3493 = vrot.lane.b32.xlu0 %v6503_v48, %s6182_s12 }
 0x695   : > { %3578 = vrot.lane.b32.xlu1 %v6528_v35, %s6182_s12 }
 0x698   : > { %3495 = vrot.lane.b32.xlu0 %v6501_v47, %s6182_s12 }
 0x699   : > { %3580 = vrot.lane.b32.xlu1 %v6526_v33, %s6182_s12 }
 0x69c   : > { %3659 = vrot.lane.b32.xlu0 %v6553_v22, %s6182_s12 }
 0x69d   : > { %3705 = vrot.lane.b32.xlu1 %v6545_v5, %s6182_s12 }
 0x6d2   : > { %v3034_v10 = vpop.xlane.xlu1 %3033 }
 0x6d3   : > { %v3028_v26 = vpop.xlane.xlu0 %3027 }
 0x6d7   : > { %v3037_v27 = vpop.xlane.xlu0 %3036 }
 0x6db   : > { %v3031_v12 = vpop.xlane.xlu0 %3030 }
 0x6e1   : > { %v3010_v48 = vpop.xlane.xlu1 %3009 }
 0x6e2   : > { %v7376_v35 = vmax.f32 %v3010_v48, %v3034_v10 }
 0x6e3   : > { %v3013_v4 = vpop.xlane.xlu0 %3012 }
 0x6e4   : > { %v7374_v7 = vmax.f32 %v3013_v4, %v3037_v27  ;;  %v3084_v5 = vsub.f32 %v7240_v31, %v7376_v35 }
 0x6e5   : > { %v3004_v47 = vpop.xlane.xlu1 %3003 }
 0x6e6   : > { %v3085_v33 = vsub.f32 %v7248_v39, %v7374_v7  ;;  %v3050_v46 = vmax.f32 %v3004_v47, %v3028_v26  ;;  %v3094_v48 = vmul.f32 1.442695, %v3084_v5 }
 0x6e7   : > { %v3007_v25 = vpop.xlane.xlu0 %3006 }
 0x6e8   : > { %v3051_v22 = vmax.f32 %v3007_v25, %v3031_v12  ;;  %v3082_v3 = vsub.f32 %v7243_v21, %v3050_v46  ;;  %v3096_v17 = vmul.f32 1.442695, %v3085_v33 }
 0x6e9   : > { %v3046_v14 = vpop.xlane.xlu1 %3045 }
 0x6ea   : > { %v3083_v54 = vsub.f32 %v7253_v16, %v3051_v22  ;;  %v3090_v27 = vmul.f32 1.442695, %v3082_v3  ;;  %5834 = vpow2.f32 %v3096_v17  ;;  %v3059_v31 = vsub.f32 %v7278_v42, %v3051_v22 }
 0x6eb   : > { %v3049_v4 = vpop.xlane.xlu0 %3048 }
 0x6ec   : > { %v3092_v10 = vmul.f32 1.442695, %v3083_v54  ;;  %5836 = vpow2.f32 %v3090_v27  ;;  %v3068_v27 = vmul.f32 1.442695, %v3059_v31 }
 0x6ed   : > { %v3040_v1 = vpop.xlane.xlu1 %3039 }
 0x6ee   : > { %5838 = vpow2.f32 %v3092_v10 }
 0x6ef   : > { %v3043_v39 = vpop.xlane.xlu0 %3042  ;;  %5840 = vpow2.f32 %v3094_v48 }
 0x6f0   : > { %5842 = vpow2.f32 %v3068_v27 }
 0x6f1   : > { %v3022_v26 = vpop.xlane.xlu1 %3021 }
 0x6f2   : > { %v7387_v21 = vmax.f32 %v3022_v26, %v3046_v14  ;;  %v3058_v14 = vsub.f32 %v7270_v15, %v3050_v46 }
 0x6f3   : > { %v3025_v12 = vpop.xlane.xlu0 %3024 }
 0x6f4   : > { %v7384_v47 = vmax.f32 %v3025_v12, %v3049_v4  ;;  %v7391_v5 = vpop.eup %5834  ;;  %v3088_v4 = vsub.f32 %v7283_v50, %v7387_v21 }
 0x6f5   : > { %v3016_v33 = vpop.xlane.xlu1 %3015 }
 0x6f6   : > { %v3089_v16 = vsub.f32 %v7288_v62, %v7384_v47  ;;  %v3054_v54 = vmax.f32 %v3016_v33, %v3040_v1  ;;  %v7393_v17 = vpop.eup %5836  ;;  %v3102_v33 = vmul.f32 1.442695, %v3088_v4 }
 0x6f7   : > { %v3019_v25 = vpop.xlane.xlu0 %3018  ;;  %8322 = vst [vmem:[#allocation61_spill] sm:$0xff] %v7393_v17 }
 0x6f8   : > { %v3055_v3 = vmax.f32 %v3019_v25, %v3043_v39  ;;  %v3086_v10 = vsub.f32 %v7293_v41, %v3054_v54  ;;  %v7398_v22 = vpop.eup %5838  ;;  %v3104_v48 = vmul.f32 1.442695, %v3089_v16  ;;  %v3061_v41 = vsub.f32 %v7273_v24, %v7374_v7 }
 0x6f9   : > { %v3363_v42 = vpop.xlane.xlu1 %3362  ;;  %v7402_v62 = vpop.eup %5840  ;;  %v3174_v12 = vpack.c.bf16 %v7398_v22, %v7393_v17  ;;  %v3060_v7 = vsub.f32 %v7267_v8, %v7376_v35  ;;  %v3065_v35 = vsub.f32 %v7308_v28, %v7384_v47 }
 0x6fa   : > { %v3087_v1 = vsub.f32 %v7298_v57, %v3055_v3  ;;  %8323 = vst [vmem:[#allocation62_spill] sm:$0xff] %v7402_v62  ;;  %v3098_v26 = vmul.f32 1.442695, %v3086_v10  ;;  %v3175_v50 = vpack.c.bf16 %v7391_v5, %v7402_v62  ;;  %v3066_v57 = vmul.f32 1.442695, %v3058_v14  ;;  %v7424_v8 = vpop.eup %5842 }
 0x6fb   : > { %v3366_v39 = vpop.xlane.xlu0 %3365  ;;  %5436 = vmatprep.mubr.msk.bf16.mxu0 %vm1527_vm3, %v3174_v12  ;;  %5844 = vpow2.f32 %v3104_v48  ;;  %v3063_v25 = vsub.f32 %v7318_v40, %v3055_v3  ;;  %v3072_v27 = vmul.f32 1.442695, %v3061_v41  ;;  %v3080_v28 = vmul.f32 1.442695, %v3065_v35 }
 0x6fc   : > { %v3100_v31 = vmul.f32 1.442695, %v3087_v1  ;;  %5437 = vmatmul.mubr.msk.bf16.vlgmr.msra.gmra.mrb[80].mxu0 %vm1527_vm3, %v3175_v50  ;;  %5846 = vpow2.f32 %v3098_v26  ;;  %v3070_v26 = vmul.f32 1.442695, %v3060_v7  ;;  %v8327_v7 = vld [vmem:[#allocation17_spill] sm:$0xff] }
 0x6fd   : > { %v3357_v15 = vpop.xlane.xlu1 %3356  ;;  %v3076_v40 = vmul.f32 1.442695, %v3063_v25 }
 0x6fe   : > { %v7412_v46 = vmax.f32 %v3357_v15, %v3363_v42  ;;  %5848 = vpow2.f32 %v3100_v31  ;;  %v3062_v42 = vsub.f32 %v7313_v11, %v3054_v54 }
 0x6ff   : > { %v3360_v16 = vpop.xlane.xlu0 %3359  ;;  %5850 = vpow2.f32 %v3102_v33 }
 0x700   : > { %v3375_v10 = vsub.f32 %v7323_v13, %v7412_v46  ;;  %v3368_v24 = vmax.f32 %v3360_v16, %v3366_v39  ;;  %5852 = vpow2.f32 %v3066_v57  ;;  %v3074_v13 = vmul.f32 1.442695, %v3062_v42 }
 0x701   : > { %v7419_v4 = vpop.permute.xlu1 %3260  ;;  %5854 = vpow2.f32 %v3072_v27  ;;  %v3064_v39 = vsub.f32 %v7303_v6, %v7387_v21  ;;  %v3369_v16 = vsub.f32 %v7333_v51, %v7412_v46 }
 0x702   : > { %v3377_v14 = vmul.f32 1.442695, %v3375_v10  ;;  %v3376_v48 = vsub.f32 %v7328_v34, %v3368_v24  ;;  %v3370_v6 = vsub.f32 %v7338_v19, %v3368_v24 }
 0x703   : > { %v3259_v1 = vpop.permute.xlu0 %3258  ;;  %v3078_v33 = vmul.f32 1.442695, %v3064_v39 }
 0x704   : > { %v3379_v3 = vmul.f32 1.442695, %v3376_v48  ;;  %5444 = vmatprep.subr.bf16.mxu0 %v3259_v1  ;;  %5856 = vpow2.f32 %v3377_v14  ;;  %v3373_v10 = vmul.f32 1.442695, %v3370_v6  ;;  %v3371_v14 = vmul.f32 1.442695, %v3369_v16 }
 0x705   : > { %5445 = vmatpush3.bf16.msra.mxu0 %v3259_v1  ;;  %v3263_v11 = vpop.permute.xlu1 %3262  ;;  %v7428_v54 = vpop.eup %5844  ;;  %v8334_v6 = vld [vmem:[#allocation18_spill] sm:$0xff] }
 0x706   : > { %5446 = vmatprep.subr.bf16.mxu0 %v7419_v4  ;;  %5858 = vpow2.f32 %v3379_v3  ;;  %v7430_v34 = vpop.eup %5846 }
 0x707   : > { %5860 = vpow2.f32 %v3076_v40  ;;  %8324 = vst [vmem:[#allocation63_spill] sm:$0xff] %v7430_v34  ;;  %v8330_v40 = vld [vmem:[#allocation19_spill] sm:$0xff] }
 0x708   : > { %5862 = vpow2.f32 %v3070_v26  ;;  %v7435_v12 = vpop.eup %5848 }
 0x709   : > { %5447 = vmatpush3.bf16.msra.mxu0 %v7419_v4  ;;  %5864 = vpow2.f32 %v3074_v13  ;;  %v7437_v31 = vpop.eup %5850  ;;  %v3176_v47 = vpack.c.bf16 %v7435_v12, %v7430_v34  ;;  %v3265_v21 = vpop.permute.xlu1 %3264 }
 0x70a   : > { %5448 = vmatprep.subr.bf16.mxu0 %v3263_v11  ;;  %8325 = vst [vmem:[#allocation64_spill] sm:$0xff] %v7437_v31  ;;  %v7441_v50 = vpop.eup %5852  ;;  %v3177_v41 = vpack.c.bf16 %v7428_v54, %v7437_v31  ;;  %5866 = vpow2.f32 %v3080_v28 }
 0x70b   : > { %5440 = vmatprep.mubr.msk.bf16.mxu0 %vm1527_vm3, %v3176_v47  ;;  %v3170_v15 = vpack.c.bf16 %v7424_v8, %v7441_v50  ;;  %v7450_v57 = vpop.eup %5854  ;;  %5868 = vpow2.f32 %v3078_v33  ;;  %v8333_v47 = vld [vmem:[#allocation16_spill] sm:$0xff] }
 0x70c   : > { %5441 = vmatmul.mubr.msk.bf16.gmra.mrb[84].mxu0 %vm1527_vm3, %v3177_v41  ;;  %5870 = vpow2.f32 %v3373_v10 }
 0x70d   : > { %5449 = vmatpush3.bf16.msra.mxu0 %v3263_v11  ;;  %5452 = vmatprep.mubr.msk.bf16.mxu0 %vm1502_vm2, %v3170_v15  ;;  %5872 = vpow2.f32 %v3371_v14 }
 0x70e   : > { %5450 = vmatprep.subr.bf16.mxu0 %v3265_v21  ;;  %v7455_v25 = vpop.eup %5856 }
 0x70f   : > { %8326 = vst [vmem:[#allocation65_spill] sm:$0xff] %v7455_v25 }
 0x710   : > { %v7457_v19 = vpop.eup %5858 }
 0x711   : > { %5451 = vmatpush3.bf16.msra.mxu0 %v3265_v21  ;;  %v7459_v24 = vpop.eup %5860  ;;  %v3398_v27 = vpack.c.bf16 %v7457_v19, %v7455_v25 }
 0x712   : > { %5490 = vmatprep.subr.bf16.mxu0 %v8327_v7  ;;  %v7464_v42 = vpop.eup %5862 }
 0x713   : > { %8328 = vst [vmem:[#allocation17_spill] sm:$0xff] %v7464_v42  ;;  %v7466_v51 = vpop.eup %5864  ;;  %v3171_v46 = vpack.c.bf16 %v7450_v57, %v7464_v42  ;;  %5463 = vmatmul.mubr.msk.bf16.vlgmr.msra.gmra.mrb[80].mxu1 %vm1527_vm3, %v3398_v27 }
 0x714   : > { %8329 = vst [vmem:[#allocation66_spill] sm:$0xff] %v7466_v51  ;;  %5467 = vmatpush3.bf16.msra.mxu1 %v3259_v1  ;;  %v3172_v48 = vpack.c.bf16 %v7459_v24, %v7466_v51  ;;  %5474 = vmatprep.mubr.msk.bf16.mxu1 %vm6179_vm0, %v8287_v32  ;;  %v7480_v3 = vpop.eup %5866  ;;  %v3575_v1 = vpop.permute.xlu1 %3574 }
 0x715   : > { %5453 = vmatmul.mubr.msk.bf16.vlgmr.msra.gmra.mrb[80].mxu0 %vm1502_vm2, %v3171_v46  ;;  %5468 = vmatprep.subr.bf16.mxu1 %v8287_v32  ;;  %v7484_v26 = vpop.eup %5868 }
 0x716   : > { %5456 = vmatprep.mubr.msk.bf16.mxu0 %vm1502_vm2, %v3172_v48  ;;  %5491 = vmatpush3.bf16.msra.mxu0 %v8327_v7  ;;  %8331 = vst [vmem:[#allocation19_spill] sm:$0xff] %v7484_v26  ;;  %v3173_v13 = vpack.c.bf16 %v7480_v3, %v7484_v26  ;;  %v7492_v35 = vpop.eup %5870 }
 0x717   : > { %5492 = vmatprep.subr.bf16.mxu0 %v8330_v40  ;;  %v7495_v28 = vpop.eup %5872 }
 0x718   : > { %5469 = vmatpush3.bf16.msra.mxu1 %v7419_v4  ;;  %v3490_v4 = vpop.permute.xlu0 %3489  ;;  %v3577_v39 = vpop.permute.xlu1 %3576  ;;  %8332 = vst [vmem:[#allocation67_spill] sm:$0xff] %v7495_v28  ;;  %v3397_v41 = vpack.c.bf16 %v7492_v35, %v7495_v28 }
 0x719   : > { %5470 = vmatprep.subr.bf16.mxu1 %v8287_v32 }
 0x71a   : > { %5493 = vmatpush3.bf16.msra.mxu0 %v8330_v40 }
 0x71b   : > { %5510 = vmatprep.subr.bf16.mxu0 %v8287_v32 }
 0x71c   : > { %5471 = vmatpush3.bf16.msra.mxu1 %v3263_v11  ;;  %v3492_v11 = vpop.permute.xlu0 %3491  ;;  %v3579_v33 = vpop.permute.xlu1 %3578 }
 0x71d   : > { %5457 = vmatmul.mubr.msk.bf16.gmra.mrb[84].mxu0 %vm1502_vm2, %v3173_v13  ;;  %5472 = vmatprep.subr.bf16.mxu1 %v8287_v32 }
 0x71e   : > { %5494 = vmatprep.mubr.msk.bf16.mxu0 %vm1253_vm1, %v3575_v1 }
 0x720   : > { %5473 = vmatpush3.bf16.msra.mxu1 %v3265_v21  ;;  %v3494_v21 = vpop.permute.xlu0 %3493  ;;  %v3581_v15 = vpop.permute.xlu1 %3580 }
 0x721   : > { %5478 = vmatprep.subr.bf16.mxu1 %v8333_v47 }
 0x723   : > { %5475 = vmatmul.mubr.msk.bf16.vlgmr.msra.gmra.mrb[80].mxu1 %vm1502_vm2, %v3397_v41 }
 0x724   : > { %5479 = vmatpush3.bf16.msra.mxu1 %v8333_v47  ;;  %5482 = vmatprep.mubr.msk.bf16.mxu1 %vm1253_vm1, %v3490_v4  ;;  %v3496_v16 = vpop.permute.xlu0 %3495  ;;  %v3706_v10 = vpop.permute.xlu1 %3705 }
 0x725   : > { %5480 = vmatprep.subr.bf16.mxu1 %v8334_v6  ;;  %5495 = vmatmul.mubr.msk.bf16.vlgmr.msra.gmra.mrb[88].mxu0 %vm1253_vm1, %v3577_v39 }
 0x726   : > { %5511 = vmatpush3.bf16.msra.mxu0 %v8327_v7  ;;  %5498 = vmatprep.mubr.msk.bf16.mxu0 %vm1253_vm1, %v3579_v33 }
 0x727   : > { %5512 = vmatprep.subr.bf16.mxu0 %v8287_v32 }
 0x728   : > { %5481 = vmatpush3.bf16.msra.mxu1 %v8334_v6  ;;  %v3660_v7 = vpop.permute.xlu0 %3659 }
 0x729   : > { %5502 = vmatprep.subr.bf16.mxu1 %v8287_v32 }
 0x72a   : > { %5513 = vmatpush3.bf16.msra.mxu0 %v8330_v40 }
 0x72b   : > { %5483 = vmatmul.mubr.msk.bf16.vlgmr.msra.gmra.mrb[84].mxu1 %vm1253_vm1, %v3492_v11  ;;  %5544 = vmatprep.subr.bf16.mxu0 %v8287_v32 }
 0x72c   : > { %5486 = vmatprep.mubr.msk.bf16.mxu1 %vm1253_vm1, %v3494_v21  ;;  %5503 = vmatpush3.bf16.msra.mxu1 %v8333_v47 }
 0x72d   : > { %5499 = vmatmul.mubr.msk.bf16.gmra.mrb[92].mxu0 %vm1253_vm1, %v3581_v15  ;;  %5504 = vmatprep.subr.bf16.mxu1 %v8287_v32 }
 0x72e   : > { %5514 = vmatprep.mubr.msk.bf16.mxu0 %vm6179_vm0, %v8287_v32 }
 0x730   : > { %5505 = vmatpush3.bf16.msra.mxu1 %v8334_v6 }
 0x733   : > { %5487 = vmatmul.mubr.msk.bf16.gmra.mrb[88].mxu1 %vm1253_vm1, %v3496_v16 }
 0x734   : > { %5506 = vmatprep.mubr.msk.bf16.mxu1 %vm6179_vm0, %v8287_v32 }
 0x735   : > { %5515 = vmatmul.mubr.msk.bf16.vlgmr.msra.gmra.mrb[96].mxu0 %vm1253_vm1, %v3706_v10 }
 0x736   : > { %5546 = vmatprep.mubr.msk.bf16.mxu0 %vm6179_vm0, %v8287_v32 }
 0x73b   : > { %5507 = vmatmul.mubr.msk.bf16.vlgmr.msra.gmra.mrb[92].mxu1 %vm1253_vm1, %v3660_v7 }
 0x7e8   : > { %v7527_v27 = vpop.f32.mrb[80].mxu0 }
 0x7e9   : > { %8335 = vst [vmem:[#allocation16_spill] sm:$0xff] %v7527_v27  ;;  %v7529_v14 = vpop.f32.mrb[81].mxu0 }
 0x7ea   : > { %8336 = vst [vmem:[#allocation18_spill] sm:$0xff] %v7529_v14  ;;  %v7531_v46 = vpop.f32.mrb[82].mxu0 }
 0x7eb   : > { %8337 = vst [vmem:[#allocation68_spill] sm:$0xff] %v7531_v46  ;;  %v7533_v48 = vpop.f32.mrb[83].mxu0 }
 0x7ec   : > { %8338 = vst [vmem:[#allocation69_spill] sm:$0xff] %v7533_v48 }
 0x7f0   : > { %v7535_v40 = vpop.f32.mrb[84].mxu0 }
 0x7f1   : > { %8339 = vst [vmem:[#allocation70_spill] sm:$0xff] %v7535_v40  ;;  %v7537_v1 = vpop.f32.mrb[85].mxu0 }
 0x7f2   : > { %8340 = vst [vmem:[#allocation71_spill] sm:$0xff] %v7537_v1  ;;  %v7539_v13 = vpop.f32.mrb[86].mxu0 }
 0x7f3   : > { %8341 = vst [vmem:[#allocation72_spill] sm:$0xff] %v7539_v13  ;;  %v7541_v4 = vpop.f32.mrb[87].mxu0 }
 0x7f4   : > { %8342 = vst [vmem:[#allocation73_spill] sm:$0xff] %v7541_v4 }
 0x7f6   : > { %v7543_v39 = vpop.f32.mrb[80].mxu1 }
 0x7f7   : > { %8343 = vst [vmem:[#allocation74_spill] sm:$0xff] %v7543_v39  ;;  %v5476_v47 = vpop.f32.mrb[81].mxu1 }
 0x7f8   : > { %v7545_v41 = vpop.f32.mrb[82].mxu1  ;;  %v5496_v11 = vpop.f32.mrb[88].mxu0 }
 0x7f9   : > { %8344 = vst [vmem:[#allocation75_spill] sm:$0xff] %v7545_v41  ;;  %v7548_v33 = vadd.f32 %v7237_v53, %v5496_v11  ;;  %v5477_v6 = vpop.f32.mrb[83].mxu1  ;;  %v3628_v21 = vpop.f32.mrb[89].mxu0 }
 0x7fa   : > { %v5497_v15 = vpop.f32.mrb[90].mxu0  ;;  %v7551_v16 = vadd.f32 %v7237_v53, %v3628_v21 }
 0x7fb   : > { %v7554_v10 = vadd.f32 %v7237_v53, %v5497_v15  ;;  %v3631_v7 = vpop.f32.mrb[91].mxu0  ;;  %v3781_v39 = vsel %vm1527_vm3, %v7548_v33, -inf }
 0x7fc   : > { %3782 = vmax.xlane.f32.xlu0 %v3781_v39  ;;  %v7561_v11 = vadd.f32 %v7237_v53, %v3631_v7  ;;  %v3775_v21 = vsel %vm1527_vm3, %v7551_v16, -inf }
 0x7fd   : > { %v3784_v47 = vsel %vm1527_vm3, %v7554_v10, -inf }
 0x7fe   : > { %v5484_v40 = vpop.f32.mrb[84].mxu1  ;;  %3785 = vmax.xlane.f32.xlu1 %v3784_v47 }
 0x7ff   : > { %v3543_v6 = vpop.f32.mrb[85].mxu1  ;;  %v7569_v13 = vadd.f32 %v7264_v37, %v5484_v40 }
 0x800   : > { %v5485_v1 = vpop.f32.mrb[86].mxu1  ;;  %3776 = vmax.xlane.f32.xlu0 %v3775_v21  ;;  %v5500_v15 = vpop.f32.mrb[92].mxu0  ;;  %v3778_v21 = vsel %vm1527_vm3, %v7561_v11, -inf  ;;  %v7579_v46 = vadd.f32 %v7264_v37, %v3543_v6 }
 0x801   : > { %v7566_v27 = vadd.f32 %v7264_v37, %v5485_v1  ;;  %v3546_v14 = vpop.f32.mrb[87].mxu1  ;;  %v3644_v39 = vpop.f32.mrb[93].mxu0  ;;  %v3757_v25 = vsel %vm1502_vm2, %v7569_v13, -inf  ;;  %v7589_v6 = vadd.f32 %v7237_v53, %v5500_v15 }
 0x802   : > { %v5501_v41 = vpop.f32.mrb[94].mxu0  ;;  %v7572_v47 = vadd.f32 %v7264_v37, %v3546_v14  ;;  %v3751_v17 = vsel %vm1502_vm2, %v7579_v46, -inf }
 0x803   : > { %v3647_v7 = vpop.f32.mrb[95].mxu0  ;;  %v3760_v4 = vsel %vm1502_vm2, %v7566_v27, -inf  ;;  %v7582_v48 = vadd.f32 %v7237_v53, %v5501_v41 }
 0x804   : > { %3761 = vmax.xlane.f32.xlu1 %v3760_v4  ;;  %3779 = vmax.xlane.f32.xlu0 %v3778_v21  ;;  %v3754_v14 = vsel %vm1502_vm2, %v7572_v47, -inf  ;;  %v7592_v41 = vadd.f32 %v7237_v53, %v3647_v7  ;;  %v3793_v7 = vsel %vm1527_vm3, %v7589_v6, -inf }
 0x805   : > { %v3796_v26 = vsel %vm1527_vm3, %v7582_v48, -inf }
 0x806   : > { %v5488_v1 = vpop.f32.mrb[88].mxu1 }
 0x807   : > { %v3559_v40 = vpop.f32.mrb[89].mxu1 }
 0x808   : > { %v5489_v28 = vpop.f32.mrb[90].mxu1  ;;  %3755 = vmax.xlane.f32.xlu1 %v3754_v14  ;;  %3758 = vmax.xlane.f32.xlu0 %v3757_v25  ;;  %v3744_v31 = vpop.f32.mrb[96].mxu0  ;;  %v7599_v14 = vadd.f32 %v7237_v53, %v3644_v39 }
 0x809   : > { %v3562_v4 = vpop.f32.mrb[91].mxu1  ;;  %v5516_v21 = vpop.f32.mrb[97].mxu0 }
 0x80a   : > { %v3747_v34 = vpop.f32.mrb[98].mxu0  ;;  %v7602_v21 = vadd.f32 %v7264_v37, %v5489_v28  ;;  %v3787_v39 = vsel %vm1527_vm3, %v7599_v14, -inf }
 0x80b   : > { %v5517_v62 = vpop.f32.mrb[99].mxu0 }
 0x80c   : > { %3752 = vmax.xlane.f32.xlu0 %v3751_v17  ;;  %3797 = vmax.xlane.f32.xlu1 %v3796_v26  ;;  %v3790_v62 = vsel %vm1527_vm3, %v7592_v41, -inf  ;;  %v7609_v17 = vadd.f32 %v7264_v37, %v5488_v1  ;;  %v7612_v26 = vadd.f32 %v7264_v37, %v3562_v4  ;;  %v3772_v28 = vsel %vm1502_vm2, %v7602_v21, -inf }
 0x80d   : > { %v7629_v4 = vadd.f32 %v7237_v53, %v3744_v31 }
 0x80e   : > { %v3698_v25 = vpop.f32.mrb[92].mxu1  ;;  %v3769_v1 = vsel %vm1502_vm2, %v7609_v17, -inf }
 0x80f   : > { %v5508_v15 = vpop.f32.mrb[93].mxu1 }
 0x810   : > { %v3701_v51 = vpop.f32.mrb[94].mxu1  ;;  %3794 = vmax.xlane.f32.xlu0 %v3793_v7  ;;  %3791 = vmax.xlane.f32.xlu1 %v3790_v62  ;;  %v7619_v15 = vadd.f32 %v7264_v37, %v3559_v40  ;;  %v7622_v7 = vadd.f32 %v7237_v53, %v3747_v34  ;;  %v7636_v34 = vadd.f32 %v7264_v37, %v3698_v25  ;;  %v1611_v25 = vsel %vm1502_vm2, %v6800_v30, 0.0  ;;  %v8345_v30 = vld [vmem:[#allocation21_spill] sm:$0xff] }
 0x811   : > { %v5509_v42 = vpop.f32.mrb[95].mxu1  ;;  %v7651_v53 = vadd.f32 %v7264_v37, %v3701_v51  ;;  %v1635_v37 = vsel %vm1527_vm3, %v8345_v30, 0.0 }
 0x812   : > { %v3766_v42 = vsel %vm1502_vm2, %v7612_v26, -inf  ;;  %v3763_v62 = vsel %vm1502_vm2, %v7619_v15, -inf  ;;  %v4113_v40 = vsel %vm1527_vm3, %v7622_v7, -inf }
 0x813   : > { %v4107_v31 = vsel %vm1502_vm2, %v7651_v53, -inf }
 0x814   : > { %3773 = vmax.xlane.f32.xlu1 %v3772_v28  ;;  %3788 = vmax.xlane.f32.xlu0 %v3787_v39  ;;  %v4110_v28 = vsel %vm1527_vm3, %v7629_v4, -inf  ;;  %v4104_v39 = vsel %vm1502_vm2, %v7636_v34, -inf }
 0x818   : > { %3767 = vmax.xlane.f32.xlu1 %v3766_v42  ;;  %3770 = vmax.xlane.f32.xlu0 %v3769_v1  ;;  %v8349_v1 = vld [vmem:[#allocation33_spill] sm:$0xff] }
 0x81c   : > { %3764 = vmax.xlane.f32.xlu0 %v3763_v62  ;;  %4114 = vmax.xlane.f32.xlu1 %v4113_v40  ;;  %v8350_v62 = vld [vmem:[#allocation30_spill] sm:$0xff] }
 0x81d   : > { %v1877_v40 = vsel %vm1527_vm3, %v8350_v62, 0.0 }
 0x820   : > { %4111 = vmax.xlane.f32.xlu0 %v4110_v28  ;;  %v2355_v28 = vsel %vm1502_vm2, %v7121_v2, 0.0 }
 0x824   : > { %4105 = vmax.xlane.f32.xlu0 %v4104_v39 }
 0x82d   : > { %4007 = vrot.lane.b32.xlu1 %v6523_v20, %s6182_s12  ;;  %v1614_v20 = vsel %vm1502_vm2, %v6840_v29, 0.0  ;;  %v8346_v29 = vld [vmem:[#allocation20_spill] sm:$0xff] }
 0x82e   : > { %v1641_v51 = vsel %vm1527_vm3, %v8346_v29, 0.0 }
 0x831   : > { %4009 = vrot.lane.b32.xlu1 %v6531_v38, %s6182_s12  ;;  %v1617_v38 = vsel %vm1502_vm2, %v6838_v63, 0.0  ;;  %v8347_v63 = vld [vmem:[#allocation26_spill] sm:$0xff] }
 0x832   : > { %v1647_v42 = vsel %vm1527_vm3, %v8347_v63, 0.0 }
 0x83a   : > { %3927 = vrot.lane.b32.xlu0 %v6548_v9, %s6182_s12  ;;  %v1629_v9 = vsel %vm1502_vm2, %v6860_v58, 0.0  ;;  %v1871_v58 = vsel %vm1502_vm2, %v8349_v1, 0.0 }
 0x83e   : > { %4013 = vrot.lane.b32.xlu0 %v6542_v60, %s6182_s12  ;;  %v1623_v60 = vsel %vm1502_vm2, %v6843_v0, 0.0 }
 0x855   : > { %4108 = vmax.xlane.f32.xlu1 %v4107_v31  ;;  %v8351_v31 = vld [vmem:[#allocation28_spill] sm:$0xff] }
 0x85d   : > { %1612 = vadd.xlane.f32.xlu0 %v1611_v25  ;;  %v1608_v25 = vsel %vm1502_vm2, %v8351_v31, 0.0  ;;  %v8355_v31 = vld [vmem:[#allocation23_spill] sm:$0xff] }
 0x861   : > { %1615 = vadd.xlane.f32.xlu0 %v1614_v20  ;;  %v2361_v20 = vsel %vm1502_vm2, %v7146_v18, 0.0  ;;  %v2373_v18 = vsel %vm1502_vm2, %v7159_v55, 0.0  ;;  %v1638_v55 = vsel %vm1527_vm3, %v8355_v31, 0.0 }
 0x865   : > { %1618 = vadd.xlane.f32.xlu0 %v1617_v38 }
 0x866   : > { %4011 = vrot.lane.b32.xlu1 %v6535_v45, %s6182_s12  ;;  %v8348_v45 = vld [vmem:[#allocation24_spill] sm:$0xff] }
 0x867   : > { %v1653_v0 = vsel %vm1527_vm3, %v8348_v45, 0.0 }
 0x869   : > { %1624 = vadd.xlane.f32.xlu0 %v1623_v60 }
 0x86d   : > { %1630 = vadd.xlane.f32.xlu0 %v1629_v9  ;;  %v8352_v9 = vld [vmem:[#allocation31_spill] sm:$0xff] }
 0x86e   : > { %v1620_v30 = vsel %vm1502_vm2, %v8352_v9, 0.0 }
 0x871   : > { %1636 = vadd.xlane.f32.xlu0 %v1635_v37  ;;  %v2367_v37 = vsel %vm1502_vm2, %v7148_v36, 0.0  ;;  %v2379_v36 = vsel %vm1527_vm3, %v7078_v61, 0.0 }
 0x875   : > { %1642 = vadd.xlane.f32.xlu0 %v1641_v51  ;;  %v8353_v51 = vld [vmem:[#allocation32_spill] sm:$0xff] }
 0x876   : > { %v1626_v63 = vsel %vm1502_vm2, %v8353_v51, 0.0 }
 0x879   : > { %1648 = vadd.xlane.f32.xlu0 %v1647_v42 }
 0x87d   : > { %1654 = vadd.xlane.f32.xlu0 %v1653_v0  ;;  %v8354_v0 = vld [vmem:[#allocation22_spill] sm:$0xff] }
 0x87e   : > { %v1632_v1 = vsel %vm1527_vm3, %v8354_v0, 0.0 }
 0x881   : > { %1872 = vadd.xlane.f32.xlu0 %v1871_v58 }
 0x885   : > { %1878 = vadd.xlane.f32.xlu0 %v1877_v40 }
 0x889   : > { %v3783_v39 = vpop.xlane.xlu0 %3782  ;;  %2356 = vadd.xlane.f32.xlu0 %v2355_v28 }
 0x88a   : > { %1609 = vadd.xlane.f32.xlu1 %v1608_v25 }
 0x88b   : > { %v3786_v38 = vpop.xlane.xlu1 %3785 }
 0x88d   : > { %v3777_v60 = vpop.xlane.xlu0 %3776  ;;  %2362 = vadd.xlane.f32.xlu0 %v2361_v20 }
 0x88e   : > { %1621 = vadd.xlane.f32.xlu1 %v1620_v30  ;;  %v2385_v30 = vsel %vm1527_vm3, %v7096_v56, 0.0 }
 0x891   : > { %v3780_v2 = vpop.xlane.xlu0 %3779  ;;  %2368 = vadd.xlane.f32.xlu0 %v2367_v37  ;;  %v3762_v29 = vpop.xlane.xlu1 %3761 }
 0x892   : > { %1627 = vadd.xlane.f32.xlu1 %v1626_v63 }
 0x895   : > { %v3759_v42 = vpop.xlane.xlu0 %3758  ;;  %2374 = vadd.xlane.f32.xlu0 %v2373_v18  ;;  %v3756_v45 = vpop.xlane.xlu1 %3755  ;;  %v7712_v18 = vmax.f32 %v3762_v29, %v3786_v38  ;;  %v8358_v29 = vld [vmem:[#allocation34_spill] sm:$0xff] }
 0x896   : > { %v7695_v58 = vmax.f32 %v3756_v45, %v3780_v2  ;;  %1633 = vadd.xlane.f32.xlu1 %v1632_v1  ;;  %v8356_v2 = vld [vmem:[#allocation25_spill] sm:$0xff]  ;;  %v7708_v63 = vmax.f32 %v3759_v42, %v3783_v39  ;;  %v8357_v45 = vld [vmem:[#allocation27_spill] sm:$0xff]  ;;  %v2397_v39 = vsel %vm1527_vm3, %v7118_v43, 0.0 }
 0x897   : > { %v1650_v0 = vsel %vm1527_vm3, %v8357_v45, 0.0  ;;  %v3834_v42 = vsub.f32 %v7554_v10, %v7712_v18 }
 0x898   : > { %v3832_v62 = vsub.f32 %v7561_v11, %v7695_v58  ;;  %v1644_v11 = vsel %vm1527_vm3, %v8356_v2, 0.0  ;;  %v3833_v1 = vsub.f32 %v7548_v33, %v7708_v63  ;;  %v2635_v33 = vsel %vm1502_vm2, %v7188_v59, 0.0 }
 0x899   : > { %v3753_v40 = vpop.xlane.xlu0 %3752  ;;  %2380 = vadd.xlane.f32.xlu0 %v2379_v36  ;;  %v3798_v28 = vpop.xlane.xlu1 %3797  ;;  %v1868_v36 = vsel %vm1502_vm2, %v8358_v29, 0.0 }
 0x89a   : > { %v3799_v25 = vmax.f32 %v3753_v40, %v3777_v60  ;;  %1639 = vadd.xlane.f32.xlu1 %v1638_v55  ;;  %v3841_v20 = vmul.f32 1.442695, %v3832_v62  ;;  %v2391_v60 = vsel %vm1527_vm3, %v7102_v49, 0.0  ;;  %v3843_v40 = vmul.f32 1.442695, %v3833_v1 }
 0x89b   : > { %v3845_v55 = vmul.f32 1.442695, %v3834_v42 }
 0x89c   : > { %v3831_v9 = vsub.f32 %v7551_v16, %v3799_v25  ;;  %5874 = vpow2.f32 %v3841_v20 }
 0x89d   : > { %v3795_v37 = vpop.xlane.xlu0 %3794  ;;  %2386 = vadd.xlane.f32.xlu0 %v2385_v30  ;;  %v3792_v61 = vpop.xlane.xlu1 %3791 }
 0x89e   : > { %v3839_v51 = vmul.f32 1.442695, %v3831_v9  ;;  %1645 = vadd.xlane.f32.xlu1 %v1644_v11  ;;  %v8359_v9 = vld [vmem:[#allocation29_spill] sm:$0xff] }
 0x89f   : > { %v1874_v30 = vsel %vm1527_vm3, %v8359_v9, 0.0 }
 0x8a0   : > { %5876 = vpow2.f32 %v3839_v51 }
 0x8a1   : > { %v3789_v16 = vpop.xlane.xlu0 %3788  ;;  %2392 = vadd.xlane.f32.xlu0 %v2391_v60  ;;  %v3774_v56 = vpop.xlane.xlu1 %3773  ;;  %5878 = vpow2.f32 %v3843_v40  ;;  %v8361_v40 = vld [vmem:[#allocation50_spill] sm:$0xff] }
 0x8a2   : > { %1651 = vadd.xlane.f32.xlu1 %v1650_v0  ;;  %v7730_v43 = vmax.f32 %v3774_v56, %v3798_v28  ;;  %v2641_v28 = vsel %vm1527_vm3, %v7167_v44, 0.0  ;;  %5880 = vpow2.f32 %v3845_v55  ;;  %v3808_v44 = vsub.f32 %v7572_v47, %v7695_v58 }
 0x8a3   : > { %v3115_v58 = vsel %vm1502_vm2, %v7450_v57, 0.0  ;;  %v3121_v57 = vsel %vm1502_vm2, %v7459_v24, 0.0  ;;  %v3127_v24 = vsel %vm1502_vm2, %v7480_v3, 0.0  ;;  %v3133_v3 = vsel %vm1527_vm3, %v7398_v22, 0.0 }
 0x8a4   : > { %v3817_v47 = vmul.f32 1.442695, %v3808_v44  ;;  %v3810_v44 = vsub.f32 %v7566_v27, %v7712_v18  ;;  %v3139_v22 = vsel %vm1527_vm3, %v7391_v5, 0.0  ;;  %v3151_v27 = vsel %vm1527_vm3, %v7428_v54, 0.0  ;;  %v8366_v5 = vld [vmem:[#allocation52_spill] sm:$0xff] }
 0x8a5   : > { %v3771_v49 = vpop.xlane.xlu0 %3770  ;;  %2398 = vadd.xlane.f32.xlu0 %v2397_v39  ;;  %v3768_v38 = vpop.xlane.xlu1 %3767  ;;  %v2632_v18 = vsel %vm1502_vm2, %v8366_v5, 0.0 }
 0x8a6   : > { %v7724_v62 = vmax.f32 %v3768_v38, %v3792_v61  ;;  %1869 = vadd.xlane.f32.xlu1 %v1868_v36  ;;  %v7726_v31 = vmax.f32 %v3771_v49, %v3795_v37  ;;  %v7736_v61 = vpop.eup %5874  ;;  %v8360_v49 = vld [vmem:[#allocation49_spill] sm:$0xff] }
 0x8a8   : > { %v3836_v10 = vsub.f32 %v7592_v41, %v7724_v62  ;;  %v3837_v59 = vsub.f32 %v7589_v6, %v7726_v31  ;;  %v3807_v41 = vsub.f32 %v7579_v46, %v3799_v25  ;;  %v2352_v6 = vsel %vm1502_vm2, %v7115_v23, 0.0 }
 0x8a9   : > { %v3765_v20 = vpop.xlane.xlu0 %3764  ;;  %2636 = vadd.xlane.f32.xlu0 %v2635_v33  ;;  %v7760_v25 = vpop.xlane.xlu1 %4114  ;;  %v2358_v23 = vsel %vm1502_vm2, %v7142_v52, 0.0  ;;  %v2364_v52 = vsel %vm1502_vm2, %v8360_v49, 0.0  ;;  %v2370_v33 = vsel %vm1502_vm2, %v8361_v40, 0.0  ;;  %v3390_v49 = vsel %vm1527_vm3, %v7457_v19, 0.0 }
 0x8aa   : > { %v7738_v2 = vmax.f32 %v3765_v20, %v3789_v16  ;;  %1875 = vadd.xlane.f32.xlu1 %v1874_v30  ;;  %v7740_v37 = vpop.eup %5876  ;;  %v3849_v11 = vmul.f32 1.442695, %v3836_v10  ;;  %v3838_v16 = vsub.f32 %v7582_v48, %v7730_v43  ;;  %v3815_v45 = vmul.f32 1.442695, %v3807_v41 }
 0x8ab   : > { %v3923_v60 = vpack.c.bf16 %v7736_v61, %v7740_v37  ;;  %v3109_v48 = vsel %vm1502_vm2, %v7424_v8, 0.0  ;;  %v7770_v39 = vpop.eup %5878  ;;  %v3812_v40 = vsub.f32 %v7612_v26, %v7724_v62  ;;  %v3813_v26 = vsub.f32 %v7609_v17, %v7726_v31 }
 0x8ac   : > { %v3835_v51 = vsub.f32 %v7599_v14, %v7738_v2  ;;  %v3851_v14 = vmul.f32 1.442695, %v3837_v59  ;;  %5882 = vpow2.f32 %v3849_v11  ;;  %v3853_v0 = vmul.f32 1.442695, %v3838_v16  ;;  %v7776_v38 = vpop.eup %5880  ;;  %v8362_v59 = vld [vmem:[#allocation45_spill] sm:$0xff]  ;;  %v8363_v16 = vld [vmem:[#allocation46_spill] sm:$0xff] }
 0x8ad   : > { %2642 = vadd.xlane.f32.xlu0 %v2641_v28  ;;  %v7753_v56 = vpop.xlane.xlu0 %4111  ;;  %5520 = vmatprep.mubr.msk.bf16.mxu1 %vm1527_vm3, %v3923_v60  ;;  %v7772_v42 = vpop.permute.xlu1 %4007  ;;  %v3924_v29 = vpack.c.bf16 %v7776_v38, %v7770_v39  ;;  %v2376_v28 = vsel %vm1527_vm3, %v8362_v59, 0.0 }
 0x8ae   : > { %v3847_v46 = vmul.f32 1.442695, %v3835_v51  ;;  %2353 = vadd.xlane.f32.xlu1 %v2352_v6  ;;  %v2382_v6 = vsel %vm1527_vm3, %v8363_v16, 0.0 }
 0x8b0   : > { %5884 = vpow2.f32 %v3847_v46  ;;  %v8364_v46 = vld [vmem:[#allocation47_spill] sm:$0xff] }
 0x8b1   : > { %3110 = vadd.xlane.f32.xlu0 %v3109_v48  ;;  %v7764_v1 = vpop.xlane.xlu0 %4105  ;;  %5886 = vpow2.f32 %v3851_v14  ;;  %v7791_v10 = vpop.permute.xlu1 %4009  ;;  %v2388_v14 = vsel %vm1527_vm3, %v8364_v46, 0.0  ;;  %v3145_v48 = vsel %vm1527_vm3, %v7435_v12, 0.0 }
 0x8b2   : > { %2359 = vadd.xlane.f32.xlu1 %v2358_v23  ;;  %5888 = vpow2.f32 %v3815_v45  ;;  %v3821_v45 = vmul.f32 1.442695, %v3810_v44 }
 0x8b3   : > { %5890 = vpow2.f32 %v3853_v0  ;;  %v8365_v0 = vld [vmem:[#allocation48_spill] sm:$0xff] }
 0x8b4   : > { %5892 = vpow2.f32 %v3817_v47  ;;  %v2394_v23 = vsel %vm1527_vm3, %v8365_v0, 0.0  ;;  %v3384_v47 = vsel %vm1502_vm2, %v7492_v35, 0.0  ;;  %v3809_v35 = vsub.f32 %v7569_v13, %v7708_v63 }
 0x8b5   : > { %3116 = vadd.xlane.f32.xlu0 %v3115_v58  ;;  %v3928_v8 = vpop.permute.xlu0 %3927  ;;  %5894 = vpow2.f32 %v3821_v45  ;;  %v8367_v58 = vld [vmem:[#allocation51_spill] sm:$0xff]  ;;  %v7858_v63 = vmax.f32 %v7764_v1, %v7753_v56 }
 0x8b6   : > { %5518 = vmatprep.subr.bf16.mxu1 %v3928_v8  ;;  %5545 = vmatpush3.bf16.msra.mxu0 %v3928_v8  ;;  %v7784_v36 = vpop.eup %5882  ;;  %v2638_v12 = vsel %vm1527_vm3, %v8367_v58, 0.0 }
 0x8b7   : > { %2365 = vadd.xlane.f32.xlu1 %v2364_v52  ;;  %5519 = vmatpush3.bf16.msra.mxu1 %v3928_v8  ;;  %v3814_v8 = vsub.f32 %v7602_v21, %v7730_v43  ;;  %v3106_v52 = vsel %vm1502_vm2, %v7441_v50, 0.0  ;;  %v3811_v21 = vsub.f32 %v7619_v15, %v7738_v2  ;;  %v8368_v43 = vld [vmem:[#allocation17_spill] sm:$0xff]  ;;  %v3819_v50 = vmul.f32 1.442695, %v3809_v35  ;;  %v8369_v15 = vld [vmem:[#allocation66_spill] sm:$0xff] }
 0x8b8   : > { %5528 = vmatprep.subr.bf16.mxu1 %v7772_v42  ;;  %5550 = vmatprep.subr.bf16.mxu0 %v8287_v32  ;;  %v3112_v19 = vsel %vm1502_vm2, %v8368_v43, 0.0  ;;  %v3118_v2 = vsel %vm1502_vm2, %v8369_v15, 0.0  ;;  %v4118_v58 = vsub.f32 %v7636_v34, %v7858_v63 }
 0x8b9   : > { %3122 = vadd.xlane.f32.xlu0 %v3121_v57  ;;  %v3829_v57 = vmul.f32 1.442695, %v3814_v8  ;;  %v3823_v13 = vmul.f32 1.442695, %v3811_v21  ;;  %v8374_v8 = vld [vmem:[#allocation64_spill] sm:$0xff] }
 0x8ba   : > { %5521 = vmatmul.mubr.msk.bf16.vlgmr.msra.gmra.mrb[96].mxu1 %vm1527_vm3, %v3924_v29  ;;  %v7789_v55 = vpop.eup %5884  ;;  %v4120_v21 = vmul.f32 1.442695, %v4118_v58 }
 0x8bb   : > { %2371 = vadd.xlane.f32.xlu1 %v2370_v33  ;;  %5529 = vmatpush3.bf16.msra.mxu1 %v7772_v42  ;;  %v3925_v20 = vpack.c.bf16 %v7784_v36, %v7789_v55  ;;  %v7799_v9 = vpop.eup %5886  ;;  %5896 = vpow2.f32 %v3829_v57  ;;  %v3888_v33 = vsel %vm1527_vm3, %v7776_v38, 0.0  ;;  %v4124_v38 = vsub.f32 %v7629_v4, %v7858_v63  ;;  %v7874_v4 = vpop.permute.xlu0 %4013 }
 0x8bc   : > { %5530 = vmatprep.subr.bf16.mxu1 %v7791_v10  ;;  %v7801_v30 = vpop.eup %5888  ;;  %5898 = vpow2.f32 %v3819_v50  ;;  %v3894_v57 = vsel %vm1527_vm3, %v7784_v36, 0.0 }
 0x8bd   : > { %3128 = vadd.xlane.f32.xlu0 %v3127_v24  ;;  %5524 = vmatprep.mubr.msk.bf16.mxu1 %vm1527_vm3, %v3925_v20  ;;  %v7806_v41 = vpop.eup %5890  ;;  %v3825_v24 = vmul.f32 1.442695, %v3812_v40  ;;  %5900 = vpow2.f32 %v3823_v13  ;;  %v8370_v20 = vld [vmem:[#allocation19_spill] sm:$0xff]  ;;  %v4126_v31 = vmul.f32 1.442695, %v4124_v38 }
 0x8be   : > { %v5893_v11 = vpop.eup %5892  ;;  %v3926_v51 = vpack.c.bf16 %v7806_v41, %v7799_v9  ;;  %v3124_v56 = vsel %vm1502_vm2, %v8370_v20, 0.0  ;;  %v3900_v45 = vsel %vm1527_vm3, %v7806_v41, 0.0  ;;  %v3855_v20 = vsel %vm1502_vm2, %v7801_v30, 0.0 }
 0x8bf   : > { %2377 = vadd.xlane.f32.xlu1 %v2376_v28  ;;  %5531 = vmatpush3.bf16.msra.mxu1 %v7791_v10  ;;  %v3919_v60 = vpack.c.bf16 %v5893_v11, %v7801_v30  ;;  %v7840_v54 = vpop.eup %5894  ;;  %v3858_v62 = vsel %vm1502_vm2, %v5893_v11, 0.0  ;;  %5902 = vpow2.f32 %v3825_v24  ;;  %v3827_v28 = vmul.f32 1.442695, %v3813_v26 }
 0x8c0   : > { %v3864_v29 = vsel %vm1502_vm2, %v7840_v54, 0.0  ;;  %v3885_v24 = vsel %vm1527_vm3, %v7770_v39, 0.0  ;;  %v3879_v39 = vsel %vm1527_vm3, %v7740_v37, 0.0 }
 0x8c1   : > { %3134 = vadd.xlane.f32.xlu0 %v3133_v3  ;;  %v3882_v3 = vsel %vm1527_vm3, %v7736_v61, 0.0  ;;  %5904 = vpow2.f32 %v3827_v28 }
 0x8c2   : > { %5525 = vmatmul.mubr.msk.bf16.gmra.mrb[100].mxu1 %vm1527_vm3, %v3926_v51  ;;  %5906 = vpow2.f32 %v4126_v31 }
 0x8c3   : > { %2383 = vadd.xlane.f32.xlu1 %v2382_v6  ;;  %5536 = vmatprep.mubr.msk.bf16.mxu1 %vm1502_vm2, %v3919_v60  ;;  %v8371_v60 = vld [vmem:[#allocation61_spill] sm:$0xff] }
 0x8c4   : > { %v3130_v16 = vsel %vm1527_vm3, %v8371_v60, 0.0  ;;  %v8378_v60 = vld [vmem:[#allocation42_spill] sm:$0xff] }
 0x8c5   : > { %3140 = vadd.xlane.f32.xlu0 %v3139_v22  ;;  %v5897_v17 = vpop.eup %5896  ;;  %v8372_v22 = vld [vmem:[#allocation62_spill] sm:$0xff] }
 0x8c6   : > { %v3136_v46 = vsel %vm1527_vm3, %v8372_v22, 0.0 }
 0x8c7   : > { %2389 = vadd.xlane.f32.xlu1 %v2388_v14 }
 0x8c9   : > { %3146 = vadd.xlane.f32.xlu0 %v3145_v48 }
 0x8cb   : > { %2395 = vadd.xlane.f32.xlu1 %v2394_v23 }
 0x8cd   : > { %3152 = vadd.xlane.f32.xlu0 %v3151_v27  ;;  %v8373_v27 = vld [vmem:[#allocation63_spill] sm:$0xff] }
 0x8ce   : > { %v3142_v5 = vsel %vm1527_vm3, %v8373_v27, 0.0  ;;  %v8380_v27 = vld [vmem:[#allocation44_spill] sm:$0xff] }
 0x8cf   : > { %2633 = vadd.xlane.f32.xlu1 %v2632_v18 }
 0x8d1   : > { %3385 = vadd.xlane.f32.xlu0 %v3384_v47 }
 0x8d3   : > { %2639 = vadd.xlane.f32.xlu1 %v2638_v12 }
 0x8d5   : > { %3391 = vadd.xlane.f32.xlu0 %v3390_v49  ;;  %v3148_v49 = vsel %vm1527_vm3, %v8374_v8, 0.0 }
 0x8d7   : > { %3107 = vadd.xlane.f32.xlu1 %v3106_v52 }
 0x8d9   : > { %3865 = vadd.xlane.f32.xlu0 %v3864_v29 }
 0x8db   : > { %3113 = vadd.xlane.f32.xlu1 %v3112_v19  ;;  %v8375_v19 = vld [vmem:[#allocation67_spill] sm:$0xff] }
 0x8dc   : > { %v3381_v34 = vsel %vm1502_vm2, %v8375_v19, 0.0 }
 0x8dd   : > { %3889 = vadd.xlane.f32.xlu0 %v3888_v33  ;;  %v8376_v33 = vld [vmem:[#allocation65_spill] sm:$0xff] }
 0x8de   : > { %v3387_v13 = vsel %vm1527_vm3, %v8376_v33, 0.0 }
 0x8df   : > { %3119 = vadd.xlane.f32.xlu1 %v3118_v2 }
 0x8e1   : > { %3859 = vadd.xlane.f32.xlu0 %v3858_v62 }
 0x8e2   : > { %v4109_v1 = vpop.xlane.xlu1 %4108 }
 0x8e3   : > { %3125 = vadd.xlane.f32.xlu1 %v3124_v56  ;;  %v4117_v59 = vmax.f32 %v4109_v1, %v7760_v25 }
 0x8e5   : > { %v4119_v11 = vsub.f32 %v7651_v53, %v4117_v59  ;;  %v4125_v51 = vsub.f32 %v7622_v7, %v4117_v59  ;;  %3883 = vadd.xlane.f32.xlu0 %v3882_v3  ;;  %v3876_v53 = vsel %vm1502_vm2, %v5897_v17, 0.0  ;;  %v5899_v7 = vpop.eup %5898 }
 0x8e6   : > { %v7878_v6 = vpop.permute.xlu1 %4011  ;;  %v7888_v14 = vpop.eup %5900  ;;  %v3920_v0 = vpack.c.bf16 %v7840_v54, %v5899_v7  ;;  %v3861_v15 = vsel %vm1502_vm2, %v5899_v7, 0.0 }
 0x8e7   : > { %v4122_v44 = vmul.f32 1.442695, %v4119_v11  ;;  %v4128_v25 = vmul.f32 1.442695, %v4125_v51  ;;  %3131 = vadd.xlane.f32.xlu1 %v3130_v16  ;;  %5532 = vmatprep.subr.bf16.mxu1 %v7878_v6  ;;  %v5903_v48 = vpop.eup %5902  ;;  %v3897_v11 = vsel %vm1527_vm3, %v7799_v9, 0.0  ;;  %v3891_v9 = vsel %vm1527_vm3, %v7789_v55, 0.0 }
 0x8e8   : > { %5533 = vmatpush3.bf16.msra.mxu1 %v7878_v6  ;;  %v3921_v18 = vpack.c.bf16 %v5903_v48, %v7888_v14  ;;  %v3870_v47 = vsel %vm1502_vm2, %v5903_v48, 0.0  ;;  %v5905_v41 = vpop.eup %5904 }
 0x8e9   : > { %3877 = vadd.xlane.f32.xlu0 %v3876_v53  ;;  %5534 = vmatprep.subr.bf16.mxu1 %v7874_v4  ;;  %5908 = vpow2.f32 %v4128_v25  ;;  %v7906_v54 = vpop.eup %5906  ;;  %v3922_v40 = vpack.c.bf16 %v5897_v17, %v5905_v41  ;;  %v3873_v28 = vsel %vm1502_vm2, %v5905_v41, 0.0  ;;  %v8377_v17 = vld [vmem:[#allocation37_spill] sm:$0xff] }
 0x8ea   : > { %v7884_v61 = vpop.xlane.xlu0 %1612  ;;  %5910 = vpow2.f32 %v4122_v44  ;;  %v8379_v53 = vld [vmem:[#allocation41_spill] sm:$0xff] }
 0x8eb   : > { %3137 = vadd.xlane.f32.xlu1 %v3136_v46  ;;  %5912 = vpow2.f32 %v4120_v21 }
 0x8ec   : > { %5535 = vmatpush3.bf16.msra.mxu1 %v7874_v4 }
 0x8ed   : > { %3901 = vadd.xlane.f32.xlu0 %v3900_v45 }
 0x8ee   : > { %v7894_v23 = vpop.xlane.xlu0 %1615 }
 0x8ef   : > { %3143 = vadd.xlane.f32.xlu1 %v3142_v5  ;;  %5537 = vmatmul.mubr.msk.bf16.vlgmr.msra.gmra.mrb[96].mxu1 %vm1502_vm2, %v3920_v0 }
 0x8f0   : > { %5540 = vmatprep.mubr.msk.bf16.mxu1 %vm1502_vm2, %v3921_v18 }
 0x8f1   : > { %3871 = vadd.xlane.f32.xlu0 %v3870_v47  ;;  %v4136_v47 = vsel %vm1527_vm3, %v7906_v54, 0.0 }
 0x8f2   : > { %v1619_v12 = vpop.xlane.xlu0 %1618 }
 0x8f3   : > { %3149 = vadd.xlane.f32.xlu1 %v3148_v49  ;;  %v5909_v52 = vpop.eup %5908 }
 0x8f4   : > { %v5911_v35 = vpop.eup %5910  ;;  %v4147_v29 = vpack.c.bf16 %v5909_v52, %v7906_v54 }
 0x8f5   : > { %3895 = vadd.xlane.f32.xlu0 %v3894_v57  ;;  %v4133_v50 = vsel %vm1502_vm2, %v5911_v35, 0.0 }
 0x8f6   : > { %v1625_v43 = vpop.xlane.xlu0 %1624  ;;  %5547 = vmatmul.mubr.msk.bf16.vlgmr.msra.gmra.mrb[100].mxu0 %vm1527_vm3, %v4147_v29 }
 0x8f7   : > { %3382 = vadd.xlane.f32.xlu1 %v3381_v34  ;;  %5551 = vmatpush3.bf16.msra.mxu0 %v7772_v42  ;;  %v4139_v42 = vsel %vm1527_vm3, %v5909_v52, 0.0  ;;  %v8381_v34 = vld [vmem:[#allocation54_spill] sm:$0xff] }
 0x8f8   : > { %5541 = vmatmul.mubr.msk.bf16.gmra.mrb[100].mxu1 %vm1502_vm2, %v3922_v40  ;;  %5552 = vmatprep.subr.bf16.mxu0 %v8287_v32 }
 0x8f9   : > { %4134 = vadd.xlane.f32.xlu0 %v4133_v50  ;;  %5558 = vmatprep.mubr.msk.bf16.mxu0 %vm6179_vm0, %v8287_v32 }
 0x8fa   : > { %v1631_v36 = vpop.xlane.xlu0 %1630 }
 0x8fb   : > { %3388 = vadd.xlane.f32.xlu1 %v3387_v13  ;;  %5553 = vmatpush3.bf16.msra.mxu0 %v7791_v10  ;;  %v5913_v10 = vpop.eup %5912 }
 0x8fc   : > { %5554 = vmatprep.subr.bf16.mxu0 %v8287_v32  ;;  %v4146_v62 = vpack.c.bf16 %v5911_v35, %v5913_v10  ;;  %v4130_v48 = vsel %vm1502_vm2, %v5913_v10, 0.0  ;;  %v8383_v10 = vld [vmem:[#allocation39_spill] sm:$0xff] }
 0x8fd   : > { %4140 = vadd.xlane.f32.xlu0 %v4139_v42 }
 0x8fe   : > { %v7925_v63 = vpop.xlane.xlu0 %1636 }
 0x8ff   : > { %3862 = vadd.xlane.f32.xlu1 %v3861_v15  ;;  %5555 = vmatpush3.bf16.msra.mxu0 %v7878_v6  ;;  %v3867_v6 = vsel %vm1502_vm2, %v7888_v14, 0.0 }
 0x900   : > { %5556 = vmatprep.subr.bf16.mxu0 %v8287_v32 }
 0x902   : > { %v1643_v2 = vpop.xlane.xlu0 %1642 }
 0x903   : > { %v1659_v26 = vadd.f32 %v1643_v2, %v1619_v12  ;;  %3886 = vadd.xlane.f32.xlu1 %v3885_v24  ;;  %5557 = vmatpush3.bf16.msra.mxu0 %v7874_v4  ;;  %v8382_v24 = vld [vmem:[#allocation58_spill] sm:$0xff] }
 0x905   : > { %5914 = vrcp.f32 %v1659_v26 }
 0x906   : > { %v1649_v38 = vpop.xlane.xlu0 %1648  ;;  %5559 = vmatmul.mubr.msk.bf16.vlgmr.msra.gmra.mrb[100].mxu0 %vm1502_vm2, %v4146_v62 }
 0x907   : > { %v1661_v56 = vadd.f32 %v1649_v38, %v1625_v43  ;;  %3856 = vadd.xlane.f32.xlu1 %v3855_v20 }
 0x909   : > { %5916 = vrcp.f32 %v1661_v56 }
 0x90a   : > { %v1655_v32 = vpop.xlane.xlu0 %1654 }
 0x90b   : > { %v1663_v1 = vadd.f32 %v1655_v32, %v1631_v36  ;;  %3880 = vadd.xlane.f32.xlu1 %v3879_v39  ;;  %v8384_v32 = vld [vmem:[#allocation57_spill] sm:$0xff] }
 0x90d   : > { %5918 = vrcp.f32 %v1663_v1 }
 0x90e   : > { %v1873_v59 = vpop.xlane.xlu0 %1872 }
 0x90f   : > { %v5915_v3 = vpop.eup %5914  ;;  %3874 = vadd.xlane.f32.xlu1 %v3873_v28 }
 0x910   : > { %v7940_v31 = vmul.f32 %v5915_v3, %v8377_v17  ;;  %v8385_v3 = vld [vmem:[#allocation43_spill] sm:$0xff] }
 0x912   : > { %v1879_v30 = vpop.xlane.xlu0 %1878 }
 0x913   : > { %v5917_v51 = vpop.eup %5916  ;;  %v1881_v4 = vadd.f32 %v1879_v30, %v1873_v59  ;;  %3898 = vadd.xlane.f32.xlu1 %v3897_v11 }
 0x914   : > { %v7945_v37 = vmul.f32 %v5917_v51, %v8378_v60 }
 0x915   : > { %5920 = vrcp.f32 %v1881_v4 }
 0x916   : > { %v2357_v16 = vpop.xlane.xlu0 %2356 }
 0x917   : > { %v5919_v44 = vpop.eup %5918  ;;  %3868 = vadd.xlane.f32.xlu1 %v3867_v6  ;;  %v7949_v25 = vpop.xlane.xlu1 %1609 }
 0x918   : > { %v7952_v7 = vmul.f32 %v5919_v44, %v8379_v53 }
 0x91a   : > { %v2363_v22 = vpop.xlane.xlu0 %2362 }
 0x91b   : > { %3892 = vadd.xlane.f32.xlu1 %v3891_v9  ;;  %v7956_v46 = vpop.xlane.xlu1 %1621 }
 0x91e   : > { %v2369_v45 = vpop.xlane.xlu0 %2368 }
 0x91f   : > { %v5921_v0 = vpop.eup %5920  ;;  %4131 = vadd.xlane.f32.xlu1 %v4130_v48  ;;  %v1628_v14 = vpop.xlane.xlu1 %1627 }
 0x920   : > { %v7960_v5 = vmul.f32 %v5921_v0, %v8380_v27 }
 0x922   : > { %v2375_v18 = vpop.xlane.xlu0 %2374 }
 0x923   : > { %4137 = vadd.xlane.f32.xlu1 %v4136_v47  ;;  %v7964_v41 = vpop.xlane.xlu1 %1633 }
 0x926   : > { %v2381_v55 = vpop.xlane.xlu0 %2380 }
 0x927   : > { %v2401_v58 = vadd.f32 %v2381_v55, %v2357_v16  ;;  %v7966_v12 = vpop.xlane.xlu1 %1639 }
 0x929   : > { %5922 = vrcp.f32 %v2401_v58 }
 0x92a   : > { %v2387_v8 = vpop.xlane.xlu0 %2386 }
 0x92b   : > { %v7968_v49 = vpop.xlane.xlu1 %1645  ;;  %v2403_v44 = vadd.f32 %v2387_v8, %v2363_v22 }
 0x92e   : > { %v2393_v52 = vpop.xlane.xlu0 %2392 }
 0x92f   : > { %v2405_v57 = vadd.f32 %v2393_v52, %v2369_v45  ;;  %v1652_v35 = vpop.xlane.xlu1 %1651 }
 0x930   : > { %v1662_v29 = vadd.f32 %v1652_v35, %v1628_v14 }
 0x931   : > { %5924 = vrcp.f32 %v2405_v57  ;;  %v8386_v57 = vld [vmem:[#allocation15_spill] sm:$0xff] }
 0x932   : > { %5926 = vrcp.f32 %v1662_v29  ;;  %v2399_v21 = vpop.xlane.xlu0 %2398 }
 0x933   : > { %v5923_v43 = vpop.eup %5922  ;;  %v2407_v54 = vadd.f32 %v2399_v21, %v2375_v18  ;;  %v1870_v19 = vpop.xlane.xlu1 %1869 }
 0x934   : > { %v2599_v40 = vmul.f32 %v5923_v43, %v8381_v34  ;;  %v8387_v43 = vld [vmem:[#allocation69_spill] sm:$0xff] }
 0x935   : > { %5928 = vrcp.f32 %v2407_v54 }
 0x936   : > { %v2637_v50 = vpop.xlane.xlu0 %2636  ;;  %4248 = vrot.lane.b32.xlu0 %v2599_v40, %s6182_s12 }
 0x937   : > { %v1876_v36 = vpop.xlane.xlu1 %1875 }
 0x938   : > { %v1880_v33 = vadd.f32 %v1876_v36, %v1870_v19  ;;  %v8388_v36 = vld [vmem:[#allocation14_spill] sm:$0xff] }
 0x93a   : > { %5930 = vrcp.f32 %v1880_v33  ;;  %v2643_v13 = vpop.xlane.xlu0 %2642 }
 0x93b   : > { %v5925_v42 = vpop.eup %5924  ;;  %v2354_v15 = vpop.xlane.xlu1 %2353  ;;  %v2645_v35 = vadd.f32 %v2643_v13, %v2637_v50  ;;  %v8389_v13 = vld [vmem:[#allocation68_spill] sm:$0xff] }
 0x93c   : > { %v5927_v2 = vpop.eup %5926  ;;  %v2603_v26 = vmul.f32 %v5925_v42, %v8382_v24 }
 0x93d   : > { %v7974_v62 = vmul.f32 %v5927_v2, %v8383_v10 }
 0x93e   : > { %v3111_v38 = vpop.xlane.xlu0 %3110  ;;  %4256 = vrot.lane.b32.xlu0 %v2603_v26, %s6182_s12  ;;  %v8390_v26 = vld [vmem:[#allocation53_spill] sm:$0xff] }
 0x93f   : > { %v5929_v20 = vpop.eup %5928  ;;  %v2360_v56 = vpop.xlane.xlu1 %2359 }
 0x940   : > { %v2605_v39 = vmul.f32 %v5929_v20, %v8384_v32  ;;  %v8391_v32 = vld [vmem:[#allocation73_spill] sm:$0xff] }
 0x942   : > { %v3117_v1 = vpop.xlane.xlu0 %3116  ;;  %4260 = vrot.lane.b32.xlu0 %v2605_v39, %s6182_s12 }
 0x944   : > { %v5931_v59 = vpop.eup %5930  ;;  %v2366_v28 = vpop.xlane.xlu1 %2365 }
 0x945   : > { %v7980_v17 = vmul.f32 %v5931_v59, %v8385_v3  ;;  %v8392_v59 = vld [vmem:[#allocation56_spill] sm:$0xff] }
 0x946   : > { %v3123_v30 = vpop.xlane.xlu0 %3122 }
 0x948   : > { %v2372_v11 = vpop.xlane.xlu1 %2371 }
 0x94a   : > { %v3129_v51 = vpop.xlane.xlu0 %3128 }
 0x94c   : > { %v2378_v4 = vpop.xlane.xlu1 %2377 }
 0x94d   : > { %v2400_v60 = vadd.f32 %v2378_v4, %v2354_v15 }
 0x94e   : > { %v3135_v16 = vpop.xlane.xlu0 %3134 }
 0x94f   : > { %5932 = vrcp.f32 %v2400_v60  ;;  %v3155_v6 = vadd.f32 %v3135_v16, %v3111_v38  ;;  %v8394_v60 = vld [vmem:[#allocation55_spill] sm:$0xff] }
 0x950   : > { %v2384_v53 = vpop.xlane.xlu1 %2383 }
 0x951   : > { %5934 = vrcp.f32 %v3155_v6  ;;  %v2402_v9 = vadd.f32 %v2384_v53, %v2360_v56 }
 0x952   : > { %v3141_v45 = vpop.xlane.xlu0 %3140 }
 0x953   : > { %5936 = vrcp.f32 %v2402_v9  ;;  %v3157_v48 = vadd.f32 %v3141_v45, %v3117_v1 }
 0x954   : > { %5938 = vrcp.f32 %v2403_v44  ;;  %v2390_v0 = vpop.xlane.xlu1 %2389  ;;  %v8395_v44 = vld [vmem:[#allocation60_spill] sm:$0xff] }
 0x955   : > { %5940 = vrcp.f32 %v3157_v48  ;;  %v2404_v14 = vadd.f32 %v2390_v0, %v2366_v28  ;;  %v8396_v48 = vld [vmem:[#allocation75_spill] sm:$0xff] }
 0x956   : > { %v3147_v27 = vpop.xlane.xlu0 %3146 }
 0x957   : > { %v3159_v18 = vadd.f32 %v3147_v27, %v3123_v30  ;;  %5942 = vrcp.f32 %v2404_v14 }
 0x958   : > { %v2396_v47 = vpop.xlane.xlu1 %2395 }
 0x959   : > { %v5933_v55 = vpop.eup %5932  ;;  %5944 = vrcp.f32 %v3159_v18  ;;  %v2406_v58 = vadd.f32 %v2396_v47, %v2372_v11  ;;  %v8393_v11 = vld [vmem:[#allocation72_spill] sm:$0xff] }
 0x95a   : > { %v3153_v52 = vpop.xlane.xlu0 %3152  ;;  %v2598_v22 = vmul.f32 %v5933_v55, %v8386_v57 }
 0x95b   : > { %v5935_v8 = vpop.eup %5934  ;;  %v3161_v29 = vadd.f32 %v3153_v52, %v3129_v51  ;;  %5946 = vrcp.f32 %v2406_v58 }
 0x95c   : > { %4246 = vrot.lane.b32.xlu1 %v2598_v22, %s6182_s12  ;;  %v2634_v21 = vpop.xlane.xlu1 %2633  ;;  %v3348_v54 = vmul.f32 %v5935_v8, %v8387_v43 }
 0x95d   : > { %v5937_v19 = vpop.eup %5936  ;;  %5948 = vrcp.f32 %v3161_v29 }
 0x95e   : > { %v5939_v34 = vpop.eup %5938  ;;  %v3386_v40 = vpop.xlane.xlu0 %3385  ;;  %4280 = vrot.lane.b32.xlu0 %v3348_v54, %s6181_s27  ;;  %v2600_v33 = vmul.f32 %v5937_v19, %v8388_v36  ;;  %5950 = vrcp.f32 %v2645_v35  ;;  %v8397_v35 = vld [vmem:[#allocation18_spill] sm:$0xff]  ;;  %v8398_v19 = vld [vmem:[#allocation16_spill] sm:$0xff] }
 0x95f   : > { %v5941_v42 = vpop.eup %5940  ;;  %v2601_v10 = vmul.f32 %v5939_v34, %v8390_v26 }
 0x960   : > { %4250 = vrot.lane.b32.xlu1 %v2600_v33, %s6182_s12  ;;  %v2640_v50 = vpop.xlane.xlu1 %2639  ;;  %v3350_v15 = vmul.f32 %v5941_v42, %v8389_v13  ;;  %v8399_v42 = vld [vmem:[#allocation71_spill] sm:$0xff] }
 0x961   : > { %v5943_v2 = vpop.eup %5942  ;;  %v2644_v22 = vadd.f32 %v2640_v50, %v2634_v21  ;;  %v8400_v50 = vld [vmem:[#allocation70_spill] sm:$0xff] }
 0x962   : > { %v3392_v24 = vpop.xlane.xlu0 %3391  ;;  %4284 = vrot.lane.b32.xlu0 %v3350_v15, %s6181_s27  ;;  %v2602_v28 = vmul.f32 %v5943_v2, %v8392_v59 }
 0x963   : > { %v5945_v38 = vpop.eup %5944  ;;  %v3394_v20 = vadd.f32 %v3392_v24, %v3386_v40  ;;  %v8401_v24 = vld [vmem:[#allocation59_spill] sm:$0xff] }
 0x964   : > { %4252 = vrot.lane.b32.xlu1 %v2601_v10, %s6182_s12  ;;  %v3108_v56 = vpop.xlane.xlu1 %3107  ;;  %v3352_v39 = vmul.f32 %v5945_v38, %v8391_v32 }
 0x965   : > { %5952 = vrcp.f32 %v3394_v20  ;;  %v5947_v1 = vpop.eup %5946 }
 0x966   : > { %4288 = vrot.lane.b32.xlu0 %v3352_v39, %s6181_s27  ;;  %v2604_v16 = vmul.f32 %v5947_v1, %v8394_v60  ;;  %v3866_v20 = vpop.xlane.xlu0 %3865 }
 0x967   : > { %v5949_v3 = vpop.eup %5948 }
 0x968   : > { %4254 = vrot.lane.b32.xlu1 %v2602_v28, %s6182_s12  ;;  %v3114_v30 = vpop.xlane.xlu1 %3113  ;;  %v3354_v51 = vmul.f32 %v5949_v3, %v8393_v11  ;;  %v5951_v4 = vpop.eup %5950 }
 0x969   : > { %v2739_v53 = vmul.f32 %v5951_v4, %v8395_v44 }
 0x96a   : > { %4292 = vrot.lane.b32.xlu0 %v3354_v51, %s6181_s27  ;;  %v3890_v1 = vpop.xlane.xlu0 %3889 }
 0x96c   : > { %4258 = vrot.lane.b32.xlu1 %v2604_v16, %s6182_s12  ;;  %v3120_v6 = vpop.xlane.xlu1 %3119 }
 0x96e   : > { %4371 = vrot.lane.b32.xlu0 %v2739_v53, %s6182_s12  ;;  %v3860_v28 = vpop.xlane.xlu0 %3859 }
 0x96f   : > { %v5953_v9 = vpop.eup %5952 }
 0x970   : > { %v3126_v45 = vpop.xlane.xlu1 %3125  ;;  %v3488_v0 = vmul.f32 %v5953_v9, %v8396_v48 }
 0x972   : > { %4379 = vrot.lane.b32.xlu0 %v3488_v0, %s6181_s27 }
 0x974   : > { %v3132_v14 = vpop.xlane.xlu1 %3131 }
 0x975   : > { %v3154_v27 = vadd.f32 %v3132_v14, %v3108_v56  ;;  %v8402_v56 = vld [vmem:[#allocation74_spill] sm:$0xff] }
 0x977   : > { %5954 = vrcp.f32 %v3154_v27 }
 0x978   : > { %v3138_v18 = vpop.xlane.xlu1 %3137 }
 0x979   : > { %v3156_v47 = vadd.f32 %v3138_v18, %v3114_v30  ;;  %v3884_v30 = vpop.xlane.xlu0 %3883 }
 0x97b   : > { %5956 = vrcp.f32 %v3156_v47 }
 0x97c   : > { %v3144_v55 = vpop.xlane.xlu1 %3143 }
 0x97d   : > { %v3158_v58 = vadd.f32 %v3144_v55, %v3120_v6  ;;  %v3878_v51 = vpop.xlane.xlu0 %3877  ;;  %v3906_v6 = vadd.f32 %v3890_v1, %v3866_v20 }
 0x97f   : > { %5958 = vrcp.f32 %v3158_v58 }
 0x980   : > { %v3150_v52 = vpop.xlane.xlu1 %3149 }
 0x981   : > { %v5955_v57 = vpop.eup %5954  ;;  %v3160_v8 = vadd.f32 %v3150_v52, %v3126_v45  ;;  %v3902_v60 = vpop.xlane.xlu0 %3901  ;;  %v3904_v45 = vadd.f32 %v3884_v30, %v3860_v28 }
 0x982   : > { %v3347_v29 = vmul.f32 %v5955_v57, %v8397_v35  ;;  %v3910_v14 = vadd.f32 %v3902_v60, %v3878_v51 }
 0x983   : > { %5960 = vrcp.f32 %v3160_v8 }
 0x984   : > { %4278 = vrot.lane.b32.xlu1 %v3347_v29, %s6181_s27  ;;  %v3383_v43 = vpop.xlane.xlu1 %3382  ;;  %5962 = vrcp.f32 %v2644_v22 }
 0x985   : > { %v5957_v54 = vpop.eup %5956  ;;  %v3872_v9 = vpop.xlane.xlu0 %3871 }
 0x986   : > { %v3349_v34 = vmul.f32 %v5957_v54, %v8398_v19 }
 0x988   : > { %4282 = vrot.lane.b32.xlu1 %v3349_v34, %s6181_s27  ;;  %v3389_v40 = vpop.xlane.xlu1 %3388 }
 0x989   : > { %v5959_v36 = vpop.eup %5958  ;;  %v3393_v33 = vadd.f32 %v3389_v40, %v3383_v43  ;;  %v3896_v27 = vpop.xlane.xlu0 %3895 }
 0x98a   : > { %v3351_v13 = vmul.f32 %v5959_v36, %v8399_v42  ;;  %v3908_v58 = vadd.f32 %v3896_v27, %v3872_v9 }
 0x98b   : > { %5964 = vrcp.f32 %v3393_v33 }
 0x98c   : > { %4286 = vrot.lane.b32.xlu1 %v3351_v13, %s6181_s27  ;;  %v3863_v10 = vpop.xlane.xlu1 %3862 }
 0x98d   : > { %v5961_v21 = vpop.eup %5960  ;;  %v4135_v29 = vpop.xlane.xlu0 %4134 }
 0x98e   : > { %v3353_v15 = vmul.f32 %v5961_v21, %v8400_v50  ;;  %v5963_v2 = vpop.eup %5962 }
 0x98f   : > { %v2738_v26 = vmul.f32 %v5963_v2, %v8401_v24 }
 0x990   : > { %4290 = vrot.lane.b32.xlu1 %v3353_v15, %s6181_s27  ;;  %v3887_v39 = vpop.xlane.xlu1 %3886 }
 0x991   : > { %v3905_v16 = vadd.f32 %v3887_v39, %v3863_v10  ;;  %v4141_v13 = vpop.xlane.xlu0 %4140 }
 0x992   : > { %v4143_v10 = vadd.f32 %v4141_v13, %v4135_v29 }
 0x993   : > { %5966 = vrcp.f32 %v3905_v16 }
 0x994   : > { %4369 = vrot.lane.b32.xlu1 %v2738_v26, %s6182_s12  ;;  %v3857_v59 = vpop.xlane.xlu1 %3856  ;;  %5968 = vrcp.f32 %v3906_v6 }
 0x995   : > { %v5965_v38 = vpop.eup %5964 }
 0x996   : > { %v3487_v32 = vmul.f32 %v5965_v38, %v8402_v56 }
 0x998   : > { %4377 = vrot.lane.b32.xlu1 %v3487_v32, %s6181_s27  ;;  %v3881_v3 = vpop.xlane.xlu1 %3880 }
 0x999   : > { %v3903_v53 = vadd.f32 %v3881_v3, %v3857_v59 }
 0x99b   : > { %5970 = vrcp.f32 %v3903_v53 }
 0x99c   : > { %v3875_v11 = vpop.xlane.xlu1 %3874  ;;  %5972 = vrcp.f32 %v3904_v45 }
 0x99d   : > { %v5967_v47 = vpop.eup %5966 }
 0x99e   : > { %v5969_v8 = vpop.eup %5968 }
 0x9a0   : > { %v3899_v4 = vpop.xlane.xlu1 %3898 }
 0x9a1   : > { %v3909_v48 = vadd.f32 %v3899_v4, %v3875_v11 }
 0x9a3   : > { %5974 = vrcp.f32 %v3909_v48 }
 0x9a4   : > { %v3869_v44 = vpop.xlane.xlu1 %3868  ;;  %5976 = vrcp.f32 %v3910_v14 }
 0x9a5   : > { %v5971_v19 = vpop.eup %5970 }
 0x9a6   : > { %v5973_v40 = vpop.eup %5972 }
 0x9a8   : > { %v3893_v0 = vpop.xlane.xlu1 %3892  ;;  %v4249_v53 = vpop.permute.xlu0 %4248 }
 0x9a9   : > { %v3907_v18 = vadd.f32 %v3893_v0, %v3869_v44 }
 0x9ab   : > { %5978 = vrcp.f32 %v3907_v18 }
 0x9ac   : > { %v4132_v52 = vpop.xlane.xlu1 %4131  ;;  %5980 = vrcp.f32 %v3908_v58  ;;  %v1658_v58 = vadd.f32 %v7966_v12, %v7894_v23  ;;  %v1660_v23 = vadd.f32 %v7968_v49, %v7956_v46  ;;  %v8404_v49 = vld [vmem:[#allocation36_spill] sm:$0xff] }
 0x9ad   : > { %v5975_v42 = vpop.eup %5974 }
 0x9ae   : > { %v5977_v24 = vpop.eup %5976 }
 0x9b0   : > { %v4138_v36 = vpop.xlane.xlu1 %4137  ;;  %v8028_v45 = vpop.permute.xlu0 %4256 }
 0x9b1   : > { %v4142_v50 = vadd.f32 %v4138_v36, %v4132_v52 }
 0x9b3   : > { %5982 = vrcp.f32 %v4142_v50  ;;  %v8405_v50 = vld [vmem:[#allocation38_spill] sm:$0xff] }
 0x9b4   : > { %5984 = vrcp.f32 %v4143_v10  ;;  %v4261_v0 = vpop.permute.xlu0 %4260 }
 0x9b5   : > { %v5979_v56 = vpop.eup %5978  ;;  %5986 = vrcp.f32 %v1658_v58 }
 0x9b6   : > { %v5981_v39 = vpop.eup %5980 }
 0x9bd   : > { %v5983_v59 = vpop.eup %5982 }
 0x9be   : > { %v5985_v11 = vpop.eup %5984 }
 0x9bf   : > { %v5987_v12 = vpop.eup %5986 }
 0x9c2   : > { %v5538_v55 = vpop.f32.mrb[96].mxu1 }
 0x9c3   : > { %v4098_v57 = vmul.f32 %v5967_v47, %v5538_v55  ;;  %v4065_v22 = vpop.f32.mrb[97].mxu1 }
 0x9c4   : > { %v5539_v35 = vpop.f32.mrb[98].mxu1  ;;  %v4096_v34 = vmul.f32 %v5971_v19, %v4065_v22 }
 0x9c5   : > { %v4099_v43 = vmul.f32 %v5969_v8, %v5539_v35  ;;  %v4068_v54 = vpop.f32.mrb[99].mxu1  ;;  %4314 = vrot.lane.b32.xlu1 %v4098_v57, %s6180_s16  ;;  %v1656_v57 = vadd.f32 %v7964_v41, %v7949_v25  ;;  %v1657_v8 = vadd.f32 %v7925_v63, %v7884_v61  ;;  %v8403_v25 = vld [vmem:[#allocation35_spill] sm:$0xff] }
 0x9c6   : > { %v4097_v33 = vmul.f32 %v5973_v40, %v4068_v54  ;;  %v1836_v41 = vmul.f32 %v5987_v12, %v8403_v25 }
 0x9c7   : > { %4316 = vrot.lane.b32.xlu0 %v4099_v43, %s6180_s16  ;;  %5988 = vrcp.f32 %v1656_v57 }
 0x9c8   : > { %5990 = vrcp.f32 %v1657_v8 }
 0x9c9   : > { %4310 = vrot.lane.b32.xlu1 %v4096_v34, %s6180_s16  ;;  %5992 = vrcp.f32 %v1660_v23 }
 0x9cb   : > { %v5542_v21 = vpop.f32.mrb[100].mxu1  ;;  %4312 = vrot.lane.b32.xlu0 %v4097_v33, %s6180_s16 }
 0x9cc   : > { %v4102_v15 = vmul.f32 %v5975_v42, %v5542_v21  ;;  %v4081_v2 = vpop.f32.mrb[101].mxu1 }
 0x9cd   : > { %v5543_v26 = vpop.f32.mrb[102].mxu1  ;;  %v4100_v32 = vmul.f32 %v5979_v56, %v4081_v2 }
 0x9ce   : > { %v4103_v38 = vmul.f32 %v5977_v24, %v5543_v26  ;;  %v4084_v20 = vpop.f32.mrb[103].mxu1  ;;  %4322 = vrot.lane.b32.xlu1 %v4102_v15, %s6180_s16  ;;  %v4247_v16 = vpop.permute.xlu1 %4246 }
 0x9cf   : > { %v4101_v1 = vmul.f32 %v5981_v39, %v4084_v20 }
 0x9d0   : > { %4324 = vrot.lane.b32.xlu0 %v4103_v38, %s6180_s16  ;;  %v4281_v27 = vpop.permute.xlu0 %4280 }
 0x9d1   : > { %v5989_v19 = vpop.eup %5988 }
 0x9d2   : > { %4318 = vrot.lane.b32.xlu1 %v4100_v32, %s6180_s16  ;;  %v4251_v6 = vpop.permute.xlu1 %4250  ;;  %v5991_v40 = vpop.eup %5990  ;;  %v1834_v33 = vmul.f32 %v5989_v19, %v8404_v49 }
 0x9d3   : > { %v4336_v61 = vsel %vm1253_vm1, %v1836_v41, %v4251_v6  ;;  %v5993_v32 = vpop.eup %5992 }
 0x9d4   : > { %4320 = vrot.lane.b32.xlu0 %v4101_v1, %s6180_s16  ;;  %v4285_v47 = vpop.permute.xlu0 %4284  ;;  %v4334_v15 = vsel %vm1253_vm1, %v1834_v33, %v4247_v16 }
 0x9d6   : > { %v4253_v44 = vpop.permute.xlu1 %4252 }
 0x9d7   : > { %v4337_v63 = vsel %vm1253_vm1, %v7940_v31, %v4253_v44  ;;  %v1835_v31 = vmul.f32 %v5991_v40, %v8405_v50  ;;  %v4339_v44 = vsel %vm1253_vm1, %v7945_v37, %v8028_v45 }
 0x9d8   : > { %v8032_v52 = vpop.permute.xlu0 %4288  ;;  %v4345_v21 = vsel %vm1502_vm2, %v4337_v63, %v4285_v47 }
 0x9d9   : > { %v4229_v28 = vpop.f32.mrb[100].mxu0  ;;  %v4335_v10 = vsel %vm1253_vm1, %v1835_v31, %v4249_v53 }
 0x9da   : > { %v4236_v3 = vmul.f32 %v5983_v59, %v4229_v28  ;;  %v5560_v30 = vpop.f32.mrb[101].mxu0  ;;  %v8026_v9 = vpop.permute.xlu1 %4254  ;;  %v4343_v20 = vsel %vm1502_vm2, %v4335_v10, %v4281_v27 }
 0x9db   : > { %v4232_v51 = vpop.f32.mrb[102].mxu0  ;;  %v8406_v30 = vld [vmem:[#allocation40_spill] sm:$0xff] }
 0x9dc   : > { %v4237_v4 = vmul.f32 %v5985_v11, %v4232_v51  ;;  %v5561_v60 = vpop.f32.mrb[103].mxu0  ;;  %4385 = vrot.lane.b32.xlu1 %v4236_v3, %s6180_s16  ;;  %v4293_v35 = vpop.permute.xlu0 %4292  ;;  %v4341_v3 = vsel %vm1253_vm1, %v7952_v7, %v4261_v0  ;;  %v1838_v11 = vmul.f32 %v5993_v32, %v8406_v30 }
 0x9de   : > { %4387 = vrot.lane.b32.xlu0 %v4237_v4, %s6180_s16  ;;  %v4259_v48 = vpop.permute.xlu1 %4258  ;;  %v4349_v4 = vsel %vm1502_vm2, %v4341_v3, %v4293_v35  ;;  %s6183_s16 = smov [#allocation7]  }
 0x9df   : > { %v4340_v1 = vsel %vm1253_vm1, %v7974_v62, %v4259_v48  ;;  %v4338_v62 = vsel %vm1253_vm1, %v1838_v11, %v8026_v9  ;;  %v4347_v9 = vsel %vm1502_vm2, %v4339_v44, %v8032_v52  ;;  %s6058_s27 = sshll.u32 %s6183_s16, 4  ;;  %s6059_s27 = int_to_ptr.vmem [resolvable:$false] %s6058_s27 }
 0x9e0   : > { %v8040_v43 = vpop.permute.xlu0 %4371  ;;  %s6060_s12 = scalar_lea.vmem %s6059_s27, 2048  ;;  %p6061_p13 = scmp.lt.s32.totalorder %s8086_s28, %s6059_s27 }
 0x9e1   : > { %p6062_p0 = scmp.lt.s32.totalorder %s6060_s12, %s6054_s15 }
 0x9e3   : > { %p6063_p5 = por %p6062_p0, %p6061_p13 }
 0x9e4   : > { %v8048_v34 = vpop.permute.xlu0 %4379 }
 0x9e5   : > { %p6064_p9 = pnand %p6063_p5, %p6057_p12 }
 0x9f6   : > { %v4279_v14 = vpop.permute.xlu1 %4278 }
 0x9f7   : > { %v4342_v24 = vsel %vm1502_vm2, %v4334_v15, %v4279_v14 }
 0x9fa   : > { %v4283_v18 = vpop.permute.xlu1 %4282 }
 0x9fb   : > { %v4344_v36 = vsel %vm1502_vm2, %v4336_v61, %v4283_v18 }
 0x9fe   : > { %v4287_v55 = vpop.permute.xlu1 %4286 }
 0x9ff   : > { %v4346_v7 = vsel %vm1502_vm2, %v4338_v62, %v4287_v55 }
 0xa02   : > { %v4291_v22 = vpop.permute.xlu1 %4290 }
 0xa03   : > { %v4348_v59 = vsel %vm1502_vm2, %v4340_v1, %v4291_v22 }
 0xa06   : > { %v8038_v29 = vpop.permute.xlu1 %4369 }
 0xa0a   : > { %v8044_v54 = vpop.permute.xlu1 %4377 }
 0xa37   : > { %v4315_v46 = vpop.permute.xlu1 %4314 }
 0xa38   : > { %v4353_v42 = vsel %vm4350_vm4, %v4344_v36, %v4315_v46 }
 0xa39   : > { %4361 = vst [vmem:[%s8056_s18 + $0x10] sm:$0xff] %v4353_v42  ;;  %v4317_v13 = vpop.permute.xlu0 %4316 }
 0xa3a   : > { %v4354_v2 = vsel %vm4350_vm4, %v4345_v21, %v4317_v13 }
 0xa3b   : > { %4362 = vst [vmem:[%s8056_s18 + $0x18] sm:$0xff] %v4354_v2  ;;  %v4311_v26 = vpop.permute.xlu1 %4310 }
 0xa3c   : > { %v4351_v38 = vsel %vm4350_vm4, %v4342_v24, %v4311_v26 }
 0xa3d   : > { %4359 = vst [vmem:[%s8056_s18] sm:$0xff] %v4351_v38  ;;  %v4313_v56 = vpop.permute.xlu0 %4312 }
 0xa3e   : > { %v4352_v39 = vsel %vm4350_vm4, %v4343_v20, %v4313_v56 }
 0xa3f   : > { %4360 = vst [vmem:[%s8056_s18 + $0x8] sm:$0xff] %v4352_v39 }
 0xa40   : > { %v4323_v28 = vpop.permute.xlu1 %4322 }
 0xa41   : > { %v4357_v51 = vsel %vm4350_vm4, %v4348_v59, %v4323_v28 }
 0xa42   : > { %4365 = vst [vmem:[%s8056_s18 + $0x30] sm:$0xff] %v4357_v51  ;;  %v4325_v60 = vpop.permute.xlu0 %4324 }
 0xa43   : > { %v4358_v16 = vsel %vm4350_vm4, %v4349_v4, %v4325_v60 }
 0xa44   : > { %4366 = vst [vmem:[%s8056_s18 + $0x38] sm:$0xff] %v4358_v16  ;;  %v4319_v6 = vpop.permute.xlu1 %4318 }
 0xa45   : > { %v4355_v53 = vsel %vm4350_vm4, %v4346_v7, %v4319_v6 }
 0xa46   : > { %4363 = vst [vmem:[%s8056_s18 + $0x20] sm:$0xff] %v4355_v53  ;;  %v4321_v48 = vpop.permute.xlu0 %4320 }
 0xa47   : > { %v4356_v0 = vsel %vm4350_vm4, %v4347_v9, %v4321_v48 }
 0xa48   : > { %4364 = vst [vmem:[%s8056_s18 + $0x28] sm:$0xff] %v4356_v0 }
 0xa49   : > { %6067 = shalt.err (!%p6064_p9)
}
 0xa4a   : > { %s6068_s11 = scalar_lea.hbm %s8096_s9, 1024  ;;  %s6072_s29 = scalar_lea.hbm %s8208_s5, 2048 }
 0xa4b   : > { %p6069_p1 = scmp.ne.s32.totalorder %s8096_s9, %s6068_s11  ;;  %p6073_p7 = scmp.lt.u32.totalorder %s8096_s9, %s8208_s5 }
 0xa4c   : > { %p6074_p11 = scmp.lt.u32.totalorder %s6072_s29, %s6068_s11  ;;  %p6076_p6 = scmp.lt.u32.totalorder %s6068_s11, %s8096_s9 }
 0xa4d   : > { %p6070_p2 = pnand %p6069_p1, %p6317_p10 }
 0xa4e   : > { %p6075_p4 = por %p6074_p11, %p6073_p7 }
 0xa4f   : > { %p6071_p3 = pneg %p6070_p2 }
 0xa50   : > { %p6077_p8 = por %p6076_p6, %p6075_p4 }
 0xa52   : > { %p6078_p12 = pnand %p6077_p8, %p6071_p3 }
 0xa54   : > { %6081 = shalt.err (!%p6078_p12)
}
 0xa55   : > { %s6184_s15 = smov 128   ;;  %s6185_s27 = smov 8   ;;  %v4391_v37 = vsel %vm1253_vm1, %v7980_v17, %v8038_v29  ;;  %v4386_v14 = vpop.permute.xlu1 %4385  ;;  %v4392_v27 = vsel %vm1253_vm1, %v7960_v5, %v8040_v43  ;;  %v4388_v47 = vpop.permute.xlu0 %4387 }
 0xa56   : > { %5619 = dma.vmem_to_hbm [thread:$0]  (%p6317_p10), %s8086_s28, 1024, %s8096_s9, %s4400_s14, %s6184_s15, %s6184_s15, %s6185_s27   ;;  %v4393_v45 = vsel %vm1502_vm2, %v4391_v37, %v8044_v54  ;;  %v4394_v17 = vsel %vm1502_vm2, %v4392_v27, %v8048_v34 }
 0xa57   : > { %s333_s12 = scalar_lea.vmem [#allocation8], %s4614_s10  ;;  %s4845_s18 = sshll.u32 %s6164_s24, 8  ;;  %v4395_v18 = vsel %vm4350_vm4, %v4393_v45, %v4386_v14  ;;  %v4396_v55 = vsel %vm4350_vm4, %v4394_v17, %v4388_v47 }
 0xa58   : > { %s4436_s11 = sshll.u32 %s333_s12, 4  ;;  %4397 = vst [vmem:[%s333_s12] sm:$0xff] %v4395_v18  ;;  %s8150_s9 = scalar_lea.hbm %s8209_s6, %s4845_s18  ;;  %4398 = vst [vmem:[%s333_s12 + $0x8] sm:$0xff] %v4396_v55  ;;  %s8142_s11 = int_to_ptr.vmem [resolvable:$true] %s4436_s11 }
 0xa59   : > { %s4405_s10 = scalar_lea.sflag [#allocation9], %s6374_s30  ;;  %s6082_s14 = scalar_lea.vmem %s8142_s11, 256 }
 0xa5a   : > { %p6083_p13 = scmp.ne.s32.totalorder %s8142_s11, %s6082_s14  ;;  %s6186_s19 = smov [#allocation8]  }
 0xa5b   : > { %s6086_s29 = sshll.u32 %s6186_s19, 4  ;;  %s6087_s29 = int_to_ptr.vmem [resolvable:$false] %s6086_s29 }
 0xa5c   : > { %p6084_p0 = pnand %p6083_p13, %p6317_p10  ;;  %s6088_s7 = scalar_lea.vmem %s6087_s29, 512 }
 0xa5d   : > { %p6089_p9 = scmp.lt.s32.totalorder %s8142_s11, %s6087_s29  ;;  %p6090_p1 = scmp.lt.s32.totalorder %s6088_s7, %s6082_s14 }
 0xa5e   : > { %p6085_p5 = pneg %p6084_p0 }
 0xa5f   : > { %p6091_p2 = por %p6090_p1, %p6089_p9 }
 0xa61   : > { %p6092_p3 = pnand %p6091_p2, %p6085_p5 }
 0xa63   : > { %6095 = shalt.err (!%p6092_p3)
}
 0xa64   : > { %s6096_s16 = scalar_lea.hbm %s8150_s9, 256  ;;  %s6100_s24 = scalar_lea.hbm %s8209_s6, 512 }
 0xa65   : > { %p6097_p7 = scmp.ne.s32.totalorder %s8150_s9, %s6096_s16  ;;  %p6101_p6 = scmp.lt.u32.totalorder %s8150_s9, %s8209_s6 }
 0xa66   : > { %p6102_p8 = scmp.lt.u32.totalorder %s6100_s24, %s6096_s16  ;;  %p6104_p13 = scmp.lt.u32.totalorder %s6096_s16, %s8150_s9 }
 0xa67   : > { %p6098_p11 = pnand %p6097_p7, %p6317_p10 }
 0xa68   : > { %p6103_p12 = por %p6102_p8, %p6101_p6 }
 0xa69   : > { %p6099_p4 = pneg %p6098_p11 }
 0xa6a   : > { %p6105_p0 = por %p6104_p13, %p6103_p12 }
 0xa6c   : > { %p6106_p5 = pnand %p6105_p0, %p6099_p4 }
 0xa6e   : > { %6109 = shalt.err (!%p6106_p5)
}
 0xa6f   : > { %5620 = dma.vmem_to_hbm [thread:$0]  (%p6317_p10), %s8142_s11, 256, %s8150_s9, %s4405_s10, %s6184_s15, %s6184_s15, %s6185_s27  }
 0xa70 PF: > { %s4451_s14 = sand.u32 1, %s6152_s21   ;;  %p8407_p9 = scmp.ne.s32.totalorder %s8259_s8, 0 }
 0xa71   : > { %p8408_p1 = scmp.ge.s32.totalorder %s6172_s26, 2  ;;  %s4452_s29 = scalar_lea.sflag [#allocation4], %s4451_s14 }
 0xa73   : > { %p5632_p2 = pnand %p8408_p1, %p8407_p9 }
 0xa75   : > { %6143 = dma.done.wait (!%p5632_p2), %s4452_s29, 1024  }
 0xa76   : > { %6145 = vsyncadd (!%p5632_p2), %s4452_s29, 4294966272  ;;  %s4461_s17 = scalar_lea.sflag [#allocation9], %s4451_s14 }
 0xa77   : > { %6147 = dma.done.wait (!%p5632_p2), %s4461_s17, 256  }
 0xa78   : > { %6149 = vsyncadd (!%p5632_p2), %s4461_s17, 4294967040  ;;  %s27_s26 = sadd.s32 1, %s6172_s26   ;;  %s8409_s21 = smov %s6156_s22 }
 0xa79   : > { %p24_p3 = scmp.ge.s32.totalorder %s27_s26, 4   ;;  %s8410_s22 = smov %s6160_s23 }
 0xa7a   : > { %s8411_s23 = smov %s6326_s20  ;;  %s8412_s24 = smov %s6168_s25 }
 0xa7b   : > { %s8413_s25 = smov %s8415_s13  ;;  %26 = sbr.rel (!%p24_p3) target bundleno = 9 (0x9), region = 119 }
 0xa82   :  { %4466 = vsyncpa [#allocation3], 1 }
 0xa83   :  { %4468 = vsyncpa [#allocation3 + $0x1], 1 }
 0xa84   :  { %4469 = vsyncpa [#allocation6], 1 }
 0xa85   :  { %4470 = vsyncpa [#allocation4], 1 }
 0xa86   :  { %4472 = vsyncpa [#allocation4 + $0x1], 1 }
 0xa87   :  { %4473 = vsyncpa [#allocation9], 1 }
 0xa88   :  { %4475 = vsyncpa [#allocation9 + $0x1], 1 }

</bundles_post_ra>
